<compile_context>
chip_gen: v6e
topology: v6e:2x2x1
jax: 0.10.0
libtpu: 0.0.40
codegen_flags: <defaults>
</compile_context>

<pallas_src>
import math
import functools

import jax
import jax.numpy as jnp
from jax import lax
from jax.experimental import pallas as pl
from jax.experimental.pallas import tpu as pltpu


def _soft_sign(x, k):
    # e2efold soft_sign: sigmoid(k * x)
    return jax.nn.sigmoid(k * x)


# ----------------------------------------------------------------------------
# Shared per-batch init and per-step update (operate on VMEM scratch refs).
# ----------------------------------------------------------------------------
def _init_state(u, x4, k, s, w, m_ref, g0_ref, ah_ref, lm_ref, rd_ref):
    """u: (L,L) values; x4: (4,L) values (A/U/C/G channels on sublanes)."""
    L = u.shape[-1]

    # constraint_matrix_batch via rank-1 outer products (no (L,L) transposes).
    xc = x4.T                                             # (L, 4): one tiny relayout
    a_c, u_c, c_c, g_c = xc[:, 0:1], xc[:, 1:2], xc[:, 2:3], xc[:, 3:4]
    a_r, u_r, c_r, g_r = x4[0:1, :], x4[1:2, :], x4[2:3, :], x4[3:4, :]
    m = (a_c * u_r + u_c * a_r
         + c_c * g_r + g_c * c_r
         + u_c * g_r + g_c * u_r)

    row = lax.broadcasted_iota(jnp.int32, (L, L), 0)
    col = lax.broadcasted_iota(jnp.int32, (L, L), 1)
    m = jnp.where(jnp.abs(row - col) <= 3, 0.0, m)        # zero the 7 central diags

    m_half = m * 0.5
    m_ref[...] = m_half              # carry m/2: folds the per-step 0.5 of contact/grad

    uu = _soft_sign(u - s, k) * u
    g0_ref[...] = -(uu + uu.T)       # un-halved; pairs with m/2 above

    a_hat = jax.nn.sigmoid(uu) * _soft_sign(uu - s, k)
    ah_ref[...] = a_hat

    a_sq_h = (a_hat * m_half) * a_hat                     # a_hat^2 * m / 2
    a = a_sq_h + a_sq_h.T                                 # contact_a (m symmetric)
    rd = jnp.sum(a, axis=-1, keepdims=True) - 1.0
    rd_ref[...] = rd
    lm_ref[...] = w * jnp.maximum(rd, 0.0)


def _lag_step(k, rho, lr_a, lr_b, m_ref, g0_ref, ah_ref, lm_ref, rd_ref):
    """One update_rule step; updates ah/lm/rd refs; returns this step's contact map."""
    # c is 2x the reference's (lambda * soft_sign(rowsum-1)) column; the missing
    # 1/2 lives in m_ref (= m/2).
    c = (2.0 * lm_ref[...]) * _soft_sign(rd_ref[...], k)       # (L, 1)
    grad_sym = g0_ref[...] + c + c.T                            # == 2*(grad_a + grad_a.T)

    m_half = m_ref[...]
    a_hat = ah_ref[...]
    grad = (a_hat * m_half) * grad_sym                          # == a_hat*m*(grad_a+grad_a.T)

    a_hat = a_hat - lr_a * grad
    a_hat = jnp.maximum(jnp.abs(a_hat) - rho * lr_a, 0.0)
    a_hat = jnp.minimum(a_hat, 1.0)          # clamp lower bound (-1) is dead: a_hat >= 0
    ah_ref[...] = a_hat

    a_sq_h = (a_hat * m_half) * a_hat                           # a_hat^2 * m / 2
    a = a_sq_h + a_sq_h.T                                       # contact_a (m symmetric)

    rd = jnp.sum(a, axis=-1, keepdims=True) - 1.0
    rd_ref[...] = rd
    lm_ref[...] = lm_ref[...] + lr_b * jnp.maximum(rd, 0.0)
    return a


# ----------------------------------------------------------------------------
# Kernel A: fused steps, grid = (B,).  For small/medium L.
# ----------------------------------------------------------------------------
def _lag_pp_fused_kernel(params_ref, u_ref, x_ref, out_ref,
                         m_ref, g0_ref, ah_ref, lm_ref, rd_ref, *, k, steps):
    s, w, rho = params_ref[0], params_ref[1], params_ref[2]
    alpha, beta = params_ref[3], params_ref[4]
    dec_a, dec_b = params_ref[5], params_ref[6]

    _init_state(u_ref[0], x_ref[0], k, s, w, m_ref, g0_ref, ah_ref, lm_ref, rd_ref)

    def body(t, lr):
        lr_a, lr_b = lr
        a = _lag_step(k, rho, lr_a, lr_b, m_ref, g0_ref, ah_ref, lm_ref, rd_ref)
        out_ref[t] = a[None].astype(out_ref.dtype)
        return (lr_a * dec_a, lr_b * dec_b)

    lax.fori_loop(0, steps, body, (alpha, beta))


# ----------------------------------------------------------------------------
# Kernel B: one step per grid iteration, grid = (B, steps).  For large L.
# ----------------------------------------------------------------------------
def _lag_pp_step_kernel(params_ref, x_ref, u_hbm, out_ref,
                        m_ref, g0_ref, ah_ref, lm_ref, rd_ref, lr_ref, dma_sem, *, k):
    b = pl.program_id(0)
    t = pl.program_id(1)

    s, w, rho = params_ref[0], params_ref[1], params_ref[2]
    alpha, beta = params_ref[3], params_ref[4]
    dec_a, dec_b = params_ref[5], params_ref[6]

    @pl.when(t == 0)
    def _init():
        # u is only needed at t == 0: one explicit DMA per batch (staged through
        # g0_ref, which is overwritten right after) instead of keeping u
        # double-buffered in VMEM for the whole steps loop.
        cp = pltpu.make_async_copy(u_hbm.at[b], g0_ref, dma_sem)
        cp.start()
        cp.wait()
        _init_state(g0_ref[...], x_ref[0], k, s, w,
                    m_ref, g0_ref, ah_ref, lm_ref, rd_ref)
        lr_ref[0] = alpha          # alpha * dec_a^0
        lr_ref[1] = beta           # beta  * dec_b^0

    lr_a = lr_ref[0]
    lr_b = lr_ref[1]
    a = _lag_step(k, rho, lr_a, lr_b, m_ref, g0_ref, ah_ref, lm_ref, rd_ref)
    out_ref[0, 0] = a.astype(out_ref.dtype)
    lr_ref[0] = lr_a * dec_a
    lr_ref[1] = lr_b * dec_b


# ----------------------------------------------------------------------------
# Wrapper
# ----------------------------------------------------------------------------
def lag_pp_final(u, x, params, *, steps, k, out_dtype=jnp.float32,
                 fuse_steps=None, trim_output=True):
    """u: (B,L,L) f32, x: (B,L,4) f32, params: (7,) f32 -> (steps,B,L,L)."""
    assert steps >= 1
    B, L, _ = u.shape

    # Pad L to a lane-dense multiple of 128; put x channels on sublanes.
    LP = max(128, ((L + 127) // 128) * 128)
    xt = jnp.swapaxes(x, 1, 2)                      # (B, 4, L), tiny copy
    if LP != L:
        # Zero padding is what keeps pad rows/cols inert (m == 0 there); do not
        # replace with nonzero sentinel padding.
        u = jnp.pad(u, ((0, 0), (0, LP - L), (0, LP - L)))
        xt = jnp.pad(xt, ((0, 0), (0, 0), (0, LP - L)))

    blk = LP * LP * 4
    small = 2 * (4 * LP * 4) + 4 * LP * 4 + (1 << 20)          # x bufs + (L,1) + slack
    # fused:   3 scratch + 2x double-buffered u + 2x double-buffered (steps,...) out
    fused_resident = (3 + 2 + 2 * steps) * blk + small
    # stepped: 3 scratch + 2x double-buffered out; u stays in HBM (pl.ANY)
    step_resident = (3 + 2) * blk + small

    # Generation-aware VMEM budget (128 MiB on v5e/v6e, 64 MiB per core on v7x).
    try:
        vmem_cap = int(pltpu.get_tpu_info().vmem_capacity_bytes)
    except Exception:
        vmem_cap = 64 << 20                         # conservative: v7x per-core VMEM
    vmem_budget = vmem_cap - (8 << 20)              # leave compiler headroom

    if fuse_steps is None:
        fuse_steps = (LP <= 512) and (fused_resident <= vmem_budget // 2)

    vmem_needed = fused_resident if fuse_steps else step_resident
    vmem_limit = int(min(max(vmem_needed, 32 << 20), vmem_budget))
    # TODO(synk): the stepped path keeps 5 resident (LP,LP) f32 buffers (20*LP^2 B),
    # capping LP at ~1664 on v7x (64 MiB VMEM) / ~2300 on v5e-v6e (128 MiB); add a
    # row-tiled (Lt, LP) variant beyond that.

    if fuse_steps:
        kernel = functools.partial(_lag_pp_fused_kernel, k=k, steps=steps)
        out = pl.pallas_call(
            kernel,
            out_shape=jax.ShapeDtypeStruct((steps, B, LP, LP), out_dtype),
            grid=(B,),
            in_specs=[
                pl.BlockSpec(memory_space=pltpu.MemorySpace.SMEM),   # params (7,)
                pl.BlockSpec((1, LP, LP), lambda b: (b, 0, 0)),      # u, one batch row
                pl.BlockSpec((1, 4, LP), lambda b: (b, 0, 0)),       # x (channels, L)
            ],
            out_specs=pl.BlockSpec((steps, 1, LP, LP), lambda b: (0, b, 0, 0)),
            scratch_shapes=[
                pltpu.VMEM((LP, LP), jnp.float32),   # m / 2
                pltpu.VMEM((LP, LP), jnp.float32),   # -(uu + uu.T)
                pltpu.VMEM((LP, LP), jnp.float32),   # a_hat
                pltpu.VMEM((LP, 1), jnp.float32),    # lambda
                pltpu.VMEM((LP, 1), jnp.float32),    # sum(a,-1) - 1
            ],
            compiler_params=pltpu.CompilerParams(
                # B is the only parallel axis: both v7x TensorCores are used when
                # B >= 2 (balanced when even).
                dimension_semantics=("parallel",),
                vmem_limit_bytes=vmem_limit),
        )(params, u, xt)
    else:
        kernel = functools.partial(_lag_pp_step_kernel, k=k)
        out = pl.pallas_call(
            kernel,
            out_shape=jax.ShapeDtypeStruct((steps, B, LP, LP), out_dtype),
            grid=(B, steps),
            in_specs=[
                pl.BlockSpec(memory_space=pltpu.MemorySpace.SMEM),   # params (7,)
                pl.BlockSpec((1, 4, LP), lambda b, t: (b, 0, 0)),    # x (channels, L)
                pl.BlockSpec(memory_space=pl.ANY),                   # u stays in HBM
            ],
            out_specs=pl.BlockSpec((1, 1, LP, LP), lambda b, t: (t, b, 0, 0)),
            scratch_shapes=[
                pltpu.VMEM((LP, LP), jnp.float32),   # m / 2
                pltpu.VMEM((LP, LP), jnp.float32),   # -(uu + uu.T) (also u DMA staging)
                pltpu.VMEM((LP, LP), jnp.float32),   # a_hat
                pltpu.VMEM((LP, 1), jnp.float32),    # lambda
                pltpu.VMEM((LP, 1), jnp.float32),    # sum(a,-1) - 1
                pltpu.SMEM((2,), jnp.float32),       # [lr_a, lr_b]
                pltpu.SemaphoreType.DMA(()),         # u fetch semaphore
            ],
            compiler_params=pltpu.CompilerParams(
                dimension_semantics=("parallel", "arbitrary"),
                vmem_limit_bytes=vmem_limit),
        )(params, xt, u)

    if trim_output and LP != L:
        # NOTE: this slice is a full extra HBM round-trip of the output; pass
        # trim_output=False and slice lazily in the consumer to avoid it.
        out = out[:, :, :L, :L]
    return out


# ----------------------------------------------------------------------------
# Pure-JAX reference mirroring the PyTorch module.
# ----------------------------------------------------------------------------
def lag_pp_final_reference(u, x, params, *, steps, k):
    s, w, rho, alpha, beta, dec_a, dec_b = [params[i] for i in range(7)]
    ba, bu, bc, bg = x[..., 0], x[..., 1], x[..., 2], x[..., 3]

    def outer(p, q):
        o = jnp.einsum('bi,bj->bij', p, q)
        return o + jnp.swapaxes(o, -1, -2)

    m = outer(ba, bu) + outer(bc, bg) + outer(bu, bg)
    L = u.shape[-1]
    idx = jnp.arange(L)
    band = jnp.abs(idx[:, None] - idx[None, :]) <= 3
    m = jnp.where(band[None], 0.0, m)

    ss = lambda v: jax.nn.sigmoid(k * v)
    uu = ss(u - s) * u
    a_hat = jax.nn.sigmoid(uu) * ss(uu - s)

    def contact(a_hat_):
        a_ = a_hat_ * a_hat_
        a_ = (a_ + jnp.swapaxes(a_, -1, -2)) / 2
        return a_ * m

    a = contact(a_hat)
    lmbd = w * jax.nn.relu(jnp.sum(a, -1) - 1.0)
    outs = []
    for t in range(steps):
        grad_a = -uu / 2 + (lmbd * ss(jnp.sum(a, -1) - 1.0))[..., None]
        grad = a_hat * m * (grad_a + jnp.swapaxes(grad_a, -1, -2))
        lr_a = alpha * dec_a ** t
        a_hat = a_hat - lr_a * grad
        a_hat = jax.nn.relu(jnp.abs(a_hat) - rho * lr_a)
        a_hat = jnp.clip(a_hat, -1.0, 1.0)
        a = contact(a_hat)
        lmbd = lmbd + beta * dec_b ** t * jax.nn.relu(jnp.sum(a, -1) - 1.0)
        outs.append(a)
    return jnp.stack(outs, 0)


if __name__ == "__main__":
    B, L = 2, 16
    steps = 4
    k = 1.0

    key = jax.random.PRNGKey(0)
    ku, kx, kw = jax.random.split(key, 3)

    u = jax.random.normal(ku, (B, L, L), dtype=jnp.float32) * 2.0
    # sequence encoding: soft one-hot-like values in [0, 1]
    x = jax.nn.softmax(jax.random.normal(kx, (B, L, 4), dtype=jnp.float32), axis=-1)

    # deterministic parameter init (mirrors nn.Parameter shapes in __init__)
    w_param = jax.random.normal(kw, (), dtype=jnp.float32)          # torch.randn(1)
    params = jnp.array(
        [math.log(9.0),            # s
         float(w_param),           # w
         1.0,                      # rho
         0.01,                     # alpha
         0.1,                      # beta
         0.99,                     # lr_decay_alpha
         0.99],                    # lr_decay_beta
        dtype=jnp.float32)

    ref = jax.block_until_ready(
        lag_pp_final_reference(u, x, params, steps=steps, k=k))

    # Exercise both kernel variants (fused-steps and one-step-per-grid-iteration).
    out_fused = jax.block_until_ready(
        lag_pp_final(u, x, params, steps=steps, k=k, fuse_steps=True))
    out_step = jax.block_until_ready(
        lag_pp_final(u, x, params, steps=steps, k=k, fuse_steps=False))

    for name, out in (("fused", out_fused), ("stepped", out_step)):
        assert out.shape == (steps, B, L, L), (name, out.shape)
        assert bool(jnp.all(jnp.isfinite(out))), name
        assert bool(jnp.allclose(out, ref, rtol=1e-4, atol=1e-4)), (
            f"{name} path mismatch vs pure-JAX reference")

    print("KERNEL_OK")
</pallas_src>

<mosaic_0001>
module attributes {stable_mosaic.version = 11 : i64} {
  func.func @_lag_pp_fused_kernel(%arg0: i32, %arg1: memref<7xf32, #tpu.memory_space<smem>>, %arg2: memref<1x128x128xf32, #tpu.memory_space<vmem>>, %arg3: memref<1x4x128xf32, #tpu.memory_space<vmem>>, %arg4: memref<4x1x128x128xf32, #tpu.memory_space<vmem>>, %arg5: memref<128x128xf32, #tpu.memory_space<vmem>>, %arg6: memref<128x128xf32, #tpu.memory_space<vmem>>, %arg7: memref<128x128xf32, #tpu.memory_space<vmem>>, %arg8: memref<128x1xf32, #tpu.memory_space<vmem>>, %arg9: memref<128x1xf32, #tpu.memory_space<vmem>>) attributes {dimension_semantics = [#tpu.dimension_semantics<parallel>], iteration_bounds = array<i64: 2>, scalar_prefetch = 0 : i64, scratch_operands = 5 : i64, tpu.core_type = #tpu.core_type<tc>, window_params = [{transform_indices = @transform_0, window_bounds = array<i64: 7>}, {transform_indices = @transform_1, window_bounds = array<i64: 1, 128, 128>}, {transform_indices = @transform_2, window_bounds = array<i64: 1, 4, 128>}, {transform_indices = @transform_3, window_bounds = array<i64: 4, 1, 128, 128>}]} {
    %c0 = arith.constant 0 : index
    %0 = memref.load %arg1[%c0] : memref<7xf32, #tpu.memory_space<smem>>
    %c1 = arith.constant 1 : index
    %1 = memref.load %arg1[%c1] : memref<7xf32, #tpu.memory_space<smem>>
    %c2 = arith.constant 2 : index
    %2 = memref.load %arg1[%c2] : memref<7xf32, #tpu.memory_space<smem>>
    %c3 = arith.constant 3 : index
    %3 = memref.load %arg1[%c3] : memref<7xf32, #tpu.memory_space<smem>>
    %c4 = arith.constant 4 : index
    %4 = memref.load %arg1[%c4] : memref<7xf32, #tpu.memory_space<smem>>
    %c5 = arith.constant 5 : index
    %5 = memref.load %arg1[%c5] : memref<7xf32, #tpu.memory_space<smem>>
    %c6 = arith.constant 6 : index
    %6 = memref.load %arg1[%c6] : memref<7xf32, #tpu.memory_space<smem>>
    %c0_0 = arith.constant 0 : index
    %c0_1 = arith.constant 0 : index
    %c0_2 = arith.constant 0 : index
    %7 = vector.load %arg2[%c0_0, %c0_1, %c0_2] : memref<1x128x128xf32, #tpu.memory_space<vmem>>, vector<1x128x128xf32>
    %8 = vector.shape_cast %7 : vector<1x128x128xf32> to vector<128x128xf32>
    %c0_3 = arith.constant 0 : index
    %c0_4 = arith.constant 0 : index
    %c0_5 = arith.constant 0 : index
    %9 = vector.load %arg3[%c0_3, %c0_4, %c0_5] : memref<1x4x128xf32, #tpu.memory_space<vmem>>, vector<1x4x128xf32>
    %10 = vector.shape_cast %9 : vector<1x4x128xf32> to vector<4x128xf32>
    %11 = tpu.transpose %10, [1, 0] : vector<4x128xf32> -> vector<128x4xf32>
    %12 = vector.extract_strided_slice %11 {offsets = [0, 0], sizes = [128, 1], strides = [1, 1]} : vector<128x4xf32> to vector<128x1xf32>
    %13 = vector.extract_strided_slice %11 {offsets = [0, 1], sizes = [128, 1], strides = [1, 1]} : vector<128x4xf32> to vector<128x1xf32>
    %14 = vector.extract_strided_slice %11 {offsets = [0, 2], sizes = [128, 1], strides = [1, 1]} : vector<128x4xf32> to vector<128x1xf32>
    %15 = vector.extract_strided_slice %11 {offsets = [0, 3], sizes = [128, 1], strides = [1, 1]} : vector<128x4xf32> to vector<128x1xf32>
    %16 = vector.extract_strided_slice %10 {offsets = [0, 0], sizes = [1, 128], strides = [1, 1]} : vector<4x128xf32> to vector<1x128xf32>
    %17 = vector.extract_strided_slice %10 {offsets = [1, 0], sizes = [1, 128], strides = [1, 1]} : vector<4x128xf32> to vector<1x128xf32>
    %18 = vector.extract_strided_slice %10 {offsets = [2, 0], sizes = [1, 128], strides = [1, 1]} : vector<4x128xf32> to vector<1x128xf32>
    %19 = vector.extract_strided_slice %10 {offsets = [3, 0], sizes = [1, 128], strides = [1, 1]} : vector<4x128xf32> to vector<1x128xf32>
    %20 = vector.broadcast %12 : vector<128x1xf32> to vector<128x128xf32>
    %21 = vector.broadcast %17 : vector<1x128xf32> to vector<128x128xf32>
    %22 = arith.mulf %20, %21 : vector<128x128xf32>
    %23 = vector.broadcast %13 : vector<128x1xf32> to vector<128x128xf32>
    %24 = vector.broadcast %16 : vector<1x128xf32> to vector<128x128xf32>
    %25 = arith.mulf %23, %24 : vector<128x128xf32>
    %26 = arith.addf %22, %25 : vector<128x128xf32>
    %27 = vector.broadcast %14 : vector<128x1xf32> to vector<128x128xf32>
    %28 = vector.broadcast %19 : vector<1x128xf32> to vector<128x128xf32>
    %29 = arith.mulf %27, %28 : vector<128x128xf32>
    %30 = arith.addf %26, %29 : vector<128x128xf32>
    %31 = vector.broadcast %15 : vector<128x1xf32> to vector<128x128xf32>
    %32 = vector.broadcast %18 : vector<1x128xf32> to vector<128x128xf32>
    %33 = arith.mulf %31, %32 : vector<128x128xf32>
    %34 = arith.addf %30, %33 : vector<128x128xf32>
    %35 = vector.broadcast %13 : vector<128x1xf32> to vector<128x128xf32>
    %36 = vector.broadcast %19 : vector<1x128xf32> to vector<128x128xf32>
    %37 = arith.mulf %35, %36 : vector<128x128xf32>
    %38 = arith.addf %34, %37 : vector<128x128xf32>
    %39 = vector.broadcast %15 : vector<128x1xf32> to vector<128x128xf32>
    %40 = vector.broadcast %17 : vector<1x128xf32> to vector<128x128xf32>
    %41 = arith.mulf %39, %40 : vector<128x128xf32>
    %42 = arith.addf %38, %41 : vector<128x128xf32>
    %43 = tpu.iota {dimensions = array<i32: 0>} : vector<128x128xi32>
    %44 = tpu.iota {dimensions = array<i32: 1>} : vector<128x128xi32>
    %45 = arith.subi %43, %44 : vector<128x128xi32>
    %46 = math.absi %45 : vector<128x128xi32>
    %c3_i32 = arith.constant 3 : i32
    %47 = vector.broadcast %c3_i32 : i32 to vector<128x128xi32>
    %48 = arith.cmpi sle, %46, %47 : vector<128x128xi32>
    %cst = arith.constant 0.000000e+00 : f32
    %49 = vector.broadcast %cst : f32 to vector<128x128xf32>
    %50 = arith.select %48, %49, %42 : vector<128x128xi1>, vector<128x128xf32>
    %cst_6 = arith.constant 5.000000e-01 : f32
    %51 = vector.broadcast %cst_6 : f32 to vector<128x128xf32>
    %52 = arith.mulf %50, %51 : vector<128x128xf32>
    %c0_7 = arith.constant 0 : index
    %c0_8 = arith.constant 0 : index
    %53 = vector.load %arg5[%c0_7, %c0_8] : memref<128x128xf32, #tpu.memory_space<vmem>>, vector<128x128xf32>
    tpu.vector_store %arg5[%c0_7, %c0_8], %52 {strides = array<i32>} : memref<128x128xf32, #tpu.memory_space<vmem>>, vector<128x128xf32>,
    %54 = vector.broadcast %0 : f32 to vector<128x128xf32>
    %55 = arith.subf %8, %54 : vector<128x128xf32>
    %cst_9 = arith.constant 1.000000e+00 : f32
    %56 = vector.broadcast %cst_9 : f32 to vector<128x128xf32>
    %57 = arith.mulf %56, %55 : vector<128x128xf32>
    %58 = arith.negf %57 : vector<128x128xf32>
    %59 = math.exp %58 : vector<128x128xf32>
    %cst_10 = arith.constant 1.000000e+00 : f32
    %60 = vector.broadcast %cst_10 : f32 to vector<128x128xf32>
    %61 = arith.addf %60, %59 : vector<128x128xf32>
    %62 = arith.divf %60, %61 : vector<128x128xf32>
    %63 = arith.mulf %62, %8 : vector<128x128xf32>
    %64 = tpu.transpose %63, [1, 0] : vector<128x128xf32> -> vector<128x128xf32>
    %65 = arith.addf %63, %64 : vector<128x128xf32>
    %cst_11 = arith.constant 0.000000e+00 : f32
    %66 = vector.broadcast %cst_11 : f32 to vector<128x128xf32>
    %67 = arith.subf %66, %65 : vector<128x128xf32>
    %c0_12 = arith.constant 0 : index
    %c0_13 = arith.constant 0 : index
    %68 = vector.load %arg6[%c0_12, %c0_13] : memref<128x128xf32, #tpu.memory_space<vmem>>, vector<128x128xf32>
    tpu.vector_store %arg6[%c0_12, %c0_13], %67 {strides = array<i32>} : memref<128x128xf32, #tpu.memory_space<vmem>>, vector<128x128xf32>,
    %69 = arith.negf %63 : vector<128x128xf32>
    %70 = math.exp %69 : vector<128x128xf32>
    %cst_14 = arith.constant 1.000000e+00 : f32
    %71 = vector.broadcast %cst_14 : f32 to vector<128x128xf32>
    %72 = arith.addf %71, %70 : vector<128x128xf32>
    %73 = arith.divf %71, %72 : vector<128x128xf32>
    %74 = vector.broadcast %0 : f32 to vector<128x128xf32>
    %75 = arith.subf %63, %74 : vector<128x128xf32>
    %cst_15 = arith.constant 1.000000e+00 : f32
    %76 = vector.broadcast %cst_15 : f32 to vector<128x128xf32>
    %77 = arith.mulf %76, %75 : vector<128x128xf32>
    %78 = arith.negf %77 : vector<128x128xf32>
    %79 = math.exp %78 : vector<128x128xf32>
    %cst_16 = arith.constant 1.000000e+00 : f32
    %80 = vector.broadcast %cst_16 : f32 to vector<128x128xf32>
    %81 = arith.addf %80, %79 : vector<128x128xf32>
    %82 = arith.divf %80, %81 : vector<128x128xf32>
    %83 = arith.mulf %73, %82 : vector<128x128xf32>
    %c0_17 = arith.constant 0 : index
    %c0_18 = arith.constant 0 : index
    %84 = vector.load %arg7[%c0_17, %c0_18] : memref<128x128xf32, #tpu.memory_space<vmem>>, vector<128x128xf32>
    tpu.vector_store %arg7[%c0_17, %c0_18], %83 {strides = array<i32>} : memref<128x128xf32, #tpu.memory_space<vmem>>, vector<128x128xf32>,
    %85 = arith.mulf %83, %52 : vector<128x128xf32>
    %86 = arith.mulf %85, %83 : vector<128x128xf32>
    %87 = tpu.transpose %86, [1, 0] : vector<128x128xf32> -> vector<128x128xf32>
    %88 = arith.addf %86, %87 : vector<128x128xf32>
    %cst_19 = arith.constant dense<0.000000e+00> : vector<128xf32>
    %89 = vector.multi_reduction <add>, %88, %cst_19 [1] : vector<128x128xf32> to vector<128xf32>
    %90 = vector.shape_cast %89 : vector<128xf32> to vector<128x1xf32>
    %cst_20 = arith.constant 1.000000e+00 : f32
    %91 = vector.broadcast %cst_20 : f32 to vector<128x1xf32>
    %92 = arith.subf %90, %91 : vector<128x1xf32>
    %c0_21 = arith.constant 0 : index
    %c0_22 = arith.constant 0 : index
    %93 = vector.load %arg9[%c0_21, %c0_22] : memref<128x1xf32, #tpu.memory_space<vmem>>, vector<128x1xf32>
    tpu.vector_store %arg9[%c0_21, %c0_22], %92 {strides = array<i32>} : memref<128x1xf32, #tpu.memory_space<vmem>>, vector<128x1xf32>,
    %cst_23 = arith.constant 0.000000e+00 : f32
    %94 = vector.broadcast %cst_23 : f32 to vector<128x1xf32>
    %95 = arith.maximumf %92, %94 : vector<128x1xf32>
    %96 = vector.broadcast %1 : f32 to vector<128x1xf32>
    %97 = arith.mulf %96, %95 : vector<128x1xf32>
    %c0_24 = arith.constant 0 : index
    %c0_25 = arith.constant 0 : index
    %98 = vector.load %arg8[%c0_24, %c0_25] : memref<128x1xf32, #tpu.memory_space<vmem>>, vector<128x1xf32>
    tpu.vector_store %arg8[%c0_24, %c0_25], %97 {strides = array<i32>} : memref<128x1xf32, #tpu.memory_space<vmem>>, vector<128x1xf32>,
    %c0_i32 = arith.constant 0 : i32
    %c4_i32 = arith.constant 4 : i32
    %99 = arith.addi %c0_i32, %c4_i32 : i32
    %c1_i32 = arith.constant 1 : i32
    %100:2 = scf.for %arg10 = %c0_i32 to %99 step %c1_i32 iter_args(%arg11 = %3, %arg12 = %4) -> (f32, f32)  : i32 {
      %c0_27 = arith.constant 0 : index
      %c0_28 = arith.constant 0 : index
      %101 = vector.load %arg8[%c0_27, %c0_28] : memref<128x1xf32, #tpu.memory_space<vmem>>, vector<128x1xf32>
      %cst_29 = arith.constant 2.000000e+00 : f32
      %102 = vector.broadcast %cst_29 : f32 to vector<128x1xf32>
      %103 = arith.mulf %102, %101 : vector<128x1xf32>
      %c0_30 = arith.constant 0 : index
      %c0_31 = arith.constant 0 : index
      %104 = vector.load %arg9[%c0_30, %c0_31] : memref<128x1xf32, #tpu.memory_space<vmem>>, vector<128x1xf32>
      %cst_32 = arith.constant 1.000000e+00 : f32
      %105 = vector.broadcast %cst_32 : f32 to vector<128x1xf32>
      %106 = arith.mulf %105, %104 : vector<128x1xf32>
      %107 = arith.negf %106 : vector<128x1xf32>
      %108 = math.exp %107 : vector<128x1xf32>
      %cst_33 = arith.constant 1.000000e+00 : f32
      %109 = vector.broadcast %cst_33 : f32 to vector<128x1xf32>
      %110 = arith.addf %109, %108 : vector<128x1xf32>
      %111 = arith.divf %109, %110 : vector<128x1xf32>
      %112 = arith.mulf %103, %111 : vector<128x1xf32>
      %c0_34 = arith.constant 0 : index
      %c0_35 = arith.constant 0 : index
      %113 = vector.load %arg6[%c0_34, %c0_35] : memref<128x128xf32, #tpu.memory_space<vmem>>, vector<128x128xf32>
      %114 = vector.broadcast %112 : vector<128x1xf32> to vector<128x128xf32>
      %115 = arith.addf %113, %114 : vector<128x128xf32>
      %116 = tpu.transpose %112, [1, 0] : vector<128x1xf32> -> vector<1x128xf32>
      %117 = vector.broadcast %116 : vector<1x128xf32> to vector<128x128xf32>
      %118 = arith.addf %115, %117 : vector<128x128xf32>
      %c0_36 = arith.constant 0 : index
      %c0_37 = arith.constant 0 : index
      %119 = vector.load %arg5[%c0_36, %c0_37] : memref<128x128xf32, #tpu.memory_space<vmem>>, vector<128x128xf32>
      %c0_38 = arith.constant 0 : index
      %c0_39 = arith.constant 0 : index
      %120 = vector.load %arg7[%c0_38, %c0_39] : memref<128x128xf32, #tpu.memory_space<vmem>>, vector<128x128xf32>
      %121 = arith.mulf %120, %119 : vector<128x128xf32>
      %122 = arith.mulf %121, %118 : vector<128x128xf32>
      %123 = vector.broadcast %arg11 : f32 to vector<128x128xf32>
      %124 = arith.mulf %123, %122 : vector<128x128xf32>
      %125 = arith.subf %120, %124 : vector<128x128xf32>
      %126 = math.absf %125 : vector<128x128xf32>
      %127 = arith.mulf %2, %arg11 : f32
      %128 = vector.broadcast %127 : f32 to vector<128x128xf32>
      %129 = arith.subf %126, %128 : vector<128x128xf32>
      %cst_40 = arith.constant 0.000000e+00 : f32
      %130 = vector.broadcast %cst_40 : f32 to vector<128x128xf32>
      %131 = arith.maximumf %129, %130 : vector<128x128xf32>
      %cst_41 = arith.constant 1.000000e+00 : f32
      %132 = vector.broadcast %cst_41 : f32 to vector<128x128xf32>
      %133 = arith.minimumf %131, %132 : vector<128x128xf32>
      %c0_42 = arith.constant 0 : index
      %c0_43 = arith.constant 0 : index
      %134 = vector.load %arg7[%c0_42, %c0_43] : memref<128x128xf32, #tpu.memory_space<vmem>>, vector<128x128xf32>
      tpu.vector_store %arg7[%c0_42, %c0_43], %133 {strides = array<i32>} : memref<128x128xf32, #tpu.memory_space<vmem>>, vector<128x128xf32>,
      %135 = arith.mulf %133, %119 : vector<128x128xf32>
      %136 = arith.mulf %135, %133 : vector<128x128xf32>
      %137 = tpu.transpose %136, [1, 0] : vector<128x128xf32> -> vector<128x128xf32>
      %138 = arith.addf %136, %137 : vector<128x128xf32>
      %cst_44 = arith.constant dense<0.000000e+00> : vector<128xf32>
      %139 = vector.multi_reduction <add>, %138, %cst_44 [1] : vector<128x128xf32> to vector<128xf32>
      %140 = vector.shape_cast %139 : vector<128xf32> to vector<128x1xf32>
      %cst_45 = arith.constant 1.000000e+00 : f32
      %141 = vector.broadcast %cst_45 : f32 to vector<128x1xf32>
      %142 = arith.subf %140, %141 : vector<128x1xf32>
      %c0_46 = arith.constant 0 : index
      %c0_47 = arith.constant 0 : index
      %143 = vector.load %arg9[%c0_46, %c0_47] : memref<128x1xf32, #tpu.memory_space<vmem>>, vector<128x1xf32>
      tpu.vector_store %arg9[%c0_46, %c0_47], %142 {strides = array<i32>} : memref<128x1xf32, #tpu.memory_space<vmem>>, vector<128x1xf32>,
      %c0_48 = arith.constant 0 : index
      %c0_49 = arith.constant 0 : index
      %144 = vector.load %arg8[%c0_48, %c0_49] : memref<128x1xf32, #tpu.memory_space<vmem>>, vector<128x1xf32>
      %cst_50 = arith.constant 0.000000e+00 : f32
      %145 = vector.broadcast %cst_50 : f32 to vector<128x1xf32>
      %146 = arith.maximumf %142, %145 : vector<128x1xf32>
      %147 = vector.broadcast %arg12 : f32 to vector<128x1xf32>
      %148 = arith.mulf %147, %146 : vector<128x1xf32>
      %149 = arith.addf %144, %148 : vector<128x1xf32>
      %c0_51 = arith.constant 0 : index
      %c0_52 = arith.constant 0 : index
      %150 = vector.load %arg8[%c0_51, %c0_52] : memref<128x1xf32, #tpu.memory_space<vmem>>, vector<128x1xf32>
      tpu.vector_store %arg8[%c0_51, %c0_52], %149 {strides = array<i32>} : memref<128x1xf32, #tpu.memory_space<vmem>>, vector<128x1xf32>,
      %151 = vector.shape_cast %138 : vector<128x128xf32> to vector<1x128x128xf32>
      %152 = arith.index_cast %arg10 : i32 to index
      %c0_53 = arith.constant 0 : index
      %c0_54 = arith.constant 0 : index
      %c0_55 = arith.constant 0 : index
      %153 = vector.load %arg4[%152, %c0_53, %c0_54, %c0_55] : memref<4x1x128x128xf32, #tpu.memory_space<vmem>>, vector<1x1x128x128xf32>
      %154 = vector.shape_cast %153 : vector<1x1x128x128xf32> to vector<1x128x128xf32>
      %155 = vector.shape_cast %151 : vector<1x128x128xf32> to vector<1x1x128x128xf32>
      tpu.vector_store %arg4[%152, %c0_53, %c0_54, %c0_55], %155 {strides = array<i32>} : memref<4x1x128x128xf32, #tpu.memory_space<vmem>>, vector<1x1x128x128xf32>,
      %156 = arith.mulf %arg11, %5 : f32
      %157 = arith.mulf %arg12, %6 : f32
      scf.yield %156, %157 : f32, f32
    }
    %c4_i32_26 = arith.constant 4 : i32
    return
  }
  func.func @transform_0(%arg0: i32) -> i32 {
    %c0_i32 = arith.constant 0 : i32
    %c0_i32_0 = arith.constant 0 : i32
    return %c0_i32 : i32
  }
  func.func @transform_1(%arg0: i32) -> (i32, i32, i32) {
    %c0_i32 = arith.constant 0 : i32
    %c0_i32_0 = arith.constant 0 : i32
    %c0_i32_1 = arith.constant 0 : i32
    return %arg0, %c0_i32, %c0_i32_0 : i32, i32, i32
  }
  func.func @transform_2(%arg0: i32) -> (i32, i32, i32) {
    %c0_i32 = arith.constant 0 : i32
    %c0_i32_0 = arith.constant 0 : i32
    %c0_i32_1 = arith.constant 0 : i32
    return %arg0, %c0_i32, %c0_i32_0 : i32, i32, i32
  }
  func.func @transform_3(%arg0: i32) -> (i32, i32, i32, i32) {
    %c0_i32 = arith.constant 0 : i32
    %c0_i32_0 = arith.constant 0 : i32
    %c0_i32_1 = arith.constant 0 : i32
    %c0_i32_2 = arith.constant 0 : i32
    return %c0_i32, %arg0, %c0_i32_0, %c0_i32_1 : i32, i32, i32, i32
  }
}

</mosaic_0001>

<bundles_post_ra>
// kernel: tpu_custom_call.1
= control target key start
LH: loop header
LB: loop body
LE: loop exit
PB: predicated region body
PF: predicated region fallthrough
CT: control target
= control target key end

     0   :  { %8 = vsyncpa [#allocation10], 0  ;;  %s4669_s0 = inlined_call_operand.hbm [shape: f32[7], index: 0, kind: input, shape index: {}]   ;;  %s4670_s1 = inlined_call_operand.hbm [shape: f32[2,128,128], index: 1, kind: input, shape index: {}]   ;;  %s4671_s2 = inlined_call_operand.hbm [shape: f32[2,4,128], index: 2, kind: input, shape index: {}]   ;;  %s4672_s3 = inlined_call_operand.hbm [shape: f32[4,2,128,128], index: 3, kind: output, shape index: {}]  }
   0x1   :  { %9 = vsyncpa [#allocation8], 0 }
   0x2   :  { %11 = vsyncpa [#allocation8 + $0x1], 0 }
   0x3   :  { %12 = vsyncpa [#allocation13], 0 }
   0x4   :  { %14 = vsyncpa [#allocation13 + $0x1], 0 }
   0x5   :  { %15 = vsyncpa [#allocation9], 0 }
   0x6   :  { %17 = vsyncpa [#allocation9 + $0x1], 0  ;;  %s3195_s12 = smov 0   ;;  %s3197_s13 = smov 0  }
   0x7   :  { %s3199_s14 = smov 0   ;;  %s3201_s15 = smov 0  }
   0x8 LB: > { %s3216_s16 = sadd.s32 4294967295, %s3144_s15   ;;  %s2462_s17 = sadd.s32 4294967294, %s3144_s15   ;;  %s3144_s15 = sphi %s3201_s15, %s4810_s15   ;;  %s3140_s14 = sphi %s3199_s14, %s4809_s14   ;;  %s3136_s13 = sphi %s3197_s13, %s4808_s13   ;;  %s3132_s12 = sphi %s3195_s12, %s4807_s12  }
   0x9   : > { %s3220_s18 = sadd.s32 1, %s3144_s15   ;;  %s51_s19 = sadd.s32 1, %s3140_s14 }
   0xa   : > { %s48_s20 = ssub.s32 %s3144_s15, %s3220_s18  ;;  %p58_p0 = scmp.ne.s32.totalorder %s3140_s14, %s3136_s13 }
   0xb   : > { %p49_p1 = scmp.eq.s32.totalorder %s48_s20, 0  ;;  %p59_p2 = scmp.eq.s32.totalorder %s3144_s15, 0 }
   0xc   : > { %p64_p3 = scmp.ne.s32.totalorder %s3136_s13, %s3132_s12  ;;  %p4673_p4 = scmp.eq.s32.totalorder %s3216_s16, 0 }
   0xd   : > { %s3232_s21 = scalar_select %p49_p1, %s3140_s14, %s51_s19  }
   0xe   : > { %p3234_p5 = por %p59_p2, %p58_p0  ;;  %p3240_p6 = por %p4673_p4, %p64_p3 }
   0xf   : > { %p114_p7 = scmp.eq.s32.totalorder %s3216_s16, 1  ;;  %p120_p8 = scmp.eq.s32.totalorder %s2462_s17, 1 }
  0x10   : > { %s4719_s23 = scalar_select %p3240_p6, 1, 0 }
  0x11   : > { %p2463_p9 = scmp.ge.s32.totalorder %s3144_s15, 1  ;;  %p127_p10 = scmp.lt.s32.totalorder %s3144_s15, 3 }
  0x12   : > { %p3247_p11 = por %p114_p7, %p58_p0  ;;  %p3251_p12 = por %p120_p8, %p64_p3 }
  0x13   : > { %p3255_p13 = pnand %p2463_p9, %p127_p10  ;;  %p2634_p4 = scmp.lt.s32.totalorder %s3144_s15, 2 }
  0x14   : > { %s4720_s24 = scalar_select %p3247_p11, 1, 0 }
  0x15   : > { %s4721_s25 = scalar_select %p3251_p12, 1, 0 }
  0x16   : > { %s4722_s26 = scalar_select %p3255_p13, 1, 0 }
  0x17   : > { %p2618_p2 = pneg %p3255_p13  ;;  %s3264_s27 = sand.u32 1, %s3140_s14  }
  0x18   : > { %s2600_s28 = sshll.u32 %s3144_s15, 11  ;;  %p4723_p0 = scmp.eq.s32.totalorder %s3216_s16, 0 }
  0x19   : > { %p3271_p3 = pnand %p2634_p4, %p3234_p5  ;;  %s2466_s30 = sshll.u32 %s3264_s27, 7 }
  0x1a   : > { %p2619_p7 = pnand %p2618_p2, %p4723_p0  ;;  %s3158_s4 = smov [#allocation7]  }
  0x1b   : > { %s3282_s9 = scalar_lea.hbm %s4670_s1, %s2600_s28  ;;  %s153_s10 = scalar_lea.vmem [#allocation11], %s2466_s30 }
  0x1c   : > { %2621 = dma.hbm_to_smem (!%p2619_p7), %s4669_s0, 16, %s3158_s4, [#allocation10]  }
  0x1d   : > { %s160_s11 = sshll.u32 %s153_s10, 4  ;;  %s150_s17 = scalar_lea.sflag [#allocation8], %s3264_s27  ;;  %s3284_s11 = int_to_ptr.vmem [resolvable:$true] %s160_s11 }
  0x1e   : > { %s3030_s19 = scalar_lea.hbm %s3282_s9, 2048  ;;  %p3032_p5 = pneg %p3271_p3 }
  0x1f   : > { %p3031_p4 = scmp.ne.s32.totalorder %s3282_s9, %s3030_s19  ;;  %s3035_s28 = scalar_lea.hbm %s4670_s1, 4096 }
  0x20   : > { %p3036_p10 = scmp.lt.s32.totalorder %s3282_s9, %s4670_s1  ;;  %p3037_p2 = scmp.lt.s32.totalorder %s3035_s28, %s3030_s19 }
  0x21   : > { %p3033_p8 = pnand %p3032_p5, %p3031_p4 }
  0x22   : > { %p3038_p0 = por %p3037_p2, %p3036_p10 }
  0x23   : > { %p3034_p9 = pneg %p3033_p8 }
  0x25   : > { %p3039_p7 = pnand %p3038_p0, %p3034_p9 }
  0x27   : > { %3042 = shalt.err (!%p3039_p7)
}
  0x28   : > { %s3043_s30 = scalar_lea.vmem %s3284_s11, 2048  ;;  %s3159_s6 = smov [#allocation11]  }
  0x29   : > { %p3044_p1 = scmp.ne.s32.totalorder %s3284_s11, %s3043_s30  ;;  %s3048_s7 = sshll.u32 %s3159_s6, 4  ;;  %s3049_s7 = int_to_ptr.vmem [resolvable:$false] %s3048_s7 }
  0x2a   : > { %s3050_s8 = scalar_lea.vmem %s3049_s7, 4096  ;;  %p3051_p12 = scmp.lt.s32.totalorder %s3284_s11, %s3049_s7 }
  0x2b   : > { %p3046_p4 = pnand %p3044_p1, %p3032_p5  ;;  %p3052_p11 = scmp.lt.s32.totalorder %s3050_s8, %s3043_s30 }
  0x2d   : > { %p3047_p8 = pneg %p3046_p4  ;;  %p3053_p6 = por %p3052_p11, %p3051_p12 }
  0x2f   : > { %p3054_p10 = pnand %p3053_p6, %p3047_p8 }
  0x31   : > { %3057 = shalt.err (!%p3054_p10)
}
  0x32   : > { %s3160_s10 = smov 128   ;;  %s3161_s19 = smov 8  }
  0x33   : > { %2625 = dma.hbm_to_vmem [thread:$0]  (!%p3271_p3), %s3282_s9, 2048, %s3284_s11, %s150_s17, %s3160_s10, %s3160_s10, %s3161_s19  }
  0x34   : > { %s2469_s20 = sshll.u32 %s3264_s27, 2  ;;  %s2470_s22 = sshll.u32 %s3144_s15, 6 }
  0x35   : > { %s3318_s5 = scalar_lea.hbm %s4671_s2, %s2470_s22  ;;  %s174_s30 = scalar_lea.vmem [#allocation12], %s2469_s20 }
  0x36   : > { %s181_s6 = sshll.u32 %s174_s30, 4  ;;  %s171_s7 = scalar_lea.sflag [#allocation13], %s3264_s27  ;;  %s182_s6 = int_to_ptr.vmem [resolvable:$true] %s181_s6 }
  0x37   : > { %s3058_s8 = scalar_lea.hbm %s3318_s5, 64  ;;  %s3063_s17 = scalar_lea.hbm %s4671_s2, 128 }
  0x38   : > { %p3059_p6 = scmp.ne.s32.totalorder %s3318_s5, %s3058_s8  ;;  %p3064_p1 = scmp.lt.s32.totalorder %s3318_s5, %s4671_s2 }
  0x39   : > { %p3065_p9 = scmp.lt.s32.totalorder %s3063_s17, %s3058_s8 }
  0x3a   : > { %p3061_p11 = pnand %p3059_p6, %p3032_p5 }
  0x3b   : > { %p3066_p2 = por %p3065_p9, %p3064_p1 }
  0x3c   : > { %p3062_p12 = pneg %p3061_p11 }
  0x3e   : > { %p3067_p0 = pnand %p3066_p2, %p3062_p12 }
  0x40   : > { %3070 = shalt.err (!%p3067_p0)
}
  0x41   : > { %s3071_s20 = scalar_lea.vmem %s182_s6, 64  ;;  %s3162_s27 = smov [#allocation12]  }
  0x42   : > { %p3072_p7 = scmp.ne.s32.totalorder %s182_s6, %s3071_s20  ;;  %s3076_s22 = sshll.u32 %s3162_s27, 4  ;;  %s3077_s22 = int_to_ptr.vmem [resolvable:$false] %s3076_s22 }
  0x43   : > { %s3078_s28 = scalar_lea.vmem %s3077_s22, 128  ;;  %p3079_p10 = scmp.lt.s32.totalorder %s182_s6, %s3077_s22 }
  0x44   : > { %p3074_p4 = pnand %p3072_p7, %p3032_p5  ;;  %p3080_p6 = scmp.lt.s32.totalorder %s3078_s28, %s3071_s20 }
  0x46   : > { %p3075_p8 = pneg %p3074_p4  ;;  %p3081_p11 = por %p3080_p6, %p3079_p10 }
  0x48   : > { %p3082_p13 = pnand %p3081_p11, %p3075_p8 }
  0x4a   : > { %3085 = shalt.err (!%p3082_p13)
}
  0x4b   : > { %2628 = dma.hbm_to_vmem [thread:$0]  (!%p3271_p3), %s3318_s5, 64, %s182_s6, %s171_s7  }
  0x4c   : > { %p4725_p12 = scmp.ne.s32.totalorder %s4722_s26, 0 }
  0x4e   : > { %190 = sbr.rel (%p4725_p12) target bundleno = 1458 (0x5b2), region = 32 }
  0x53   : > { %p4726_p1 = scmp.eq.s32.totalorder %s3216_s16, 0 }
  0x55   : > { %3115 = dma.done.wait (%p4726_p1), [#allocation10], 16   ;;  %p4727_p5 = pmov %p4726_p1 }
  0x56   : > { %s3346_s4 = sand.u32 1, %s3136_s13   ;;  %p4728_p13 = scmp.ne.s32.totalorder %s4719_s23, 0 }
  0x57   : > { %3117 = vsyncadd (%p4727_p5), [#allocation10], 4294967280  ;;  %s2473_s30 = sshll.u32 %s3346_s4, 7  ;;  %s197_s8 = scalar_lea.sflag [#allocation8], %s3346_s4 }
  0x58   : > { %s3350_s29 = scalar_lea.vmem [#allocation11], %s2473_s30 }
  0x59   : > { %3119 = dma.done.wait (%p4728_p13), %s197_s8, 2048  }
  0x5a   : > { %3121 = vsyncadd (%p4728_p13), %s197_s8, 4294965248  ;;  %s2474_s26 = sshll.u32 %s3346_s4, 2  ;;  %s206_s5 = scalar_lea.sflag [#allocation13], %s3346_s4 }
  0x5b   : > { %s209_s6 = scalar_lea.vmem [#allocation12], %s2474_s26 }
  0x5c   : > { %3123 = dma.done.wait (%p4728_p13), %s206_s5, 64  }
  0x5d   : > { %3125 = vsyncadd (%p4728_p13), %s206_s5, 4294967232 }
  0x5e   : > { %214 = sfence }
  0x5f   : > { %v3362_v0 = vld [vmem:[%s209_s6] sm:$0xf]  ;;  %v3163_v1 = vmov 1   ;;  %v3164_v2 = vmov 0   ;;  %v4680_v5 = vmov 2   ;;  %s238_s23 = sld [smem:[#allocation7]] }
  0x60   : > { %262 = vxpose.xlu0.b32.start.end [1/1] (short) %v3362_v0, 128  ;;  %2710 = vset.pattern.permute.xlu1 %v3163_v1  ;;  %v246_v9 = vld [vmem:[%s3350_s29 + $0x8] sm:$0xff]  ;;  %v249_v14 = vld [vmem:[%s3350_s29 + $0x20] sm:$0xff]  ;;  %v252_v18 = vld [vmem:[%s3350_s29 + $0x38] sm:$0xff]  ;;  %s2475_s7 = sshll.u32 %s3346_s4, 9  ;;  %s4120_s9 = sld [smem:[#allocation7 + $0x2]] }
  0x61   : > { %v3422_v32 = vld [vmem:[%s3350_s29 + $0x50] sm:$0xff]  ;;  %v3463_v56 = vld [vmem:[%s3350_s29] sm:$0xff]  ;;  %s4122_s11 = sld [smem:[#allocation7 + $0x3]]   ;;  %s4182_s27 = scalar_lea.vmem [#allocation14], %s2475_s7 }
  0x62   : > { %s4124_s17 = sld [smem:[#allocation7 + $0x4]]   ;;  %s4190_s22 = smov 0  }
  0x63   : > { %s4126_s10 = sld [smem:[#allocation7 + $0x5]] }
  0x64   : > { %s4128_s19 = sld [smem:[#allocation7 + $0x6]] }
  0x65   : > { %v3389_v10 = vstv %s238_s23  ;;  %s2476_s20 = sld [smem:[#allocation7 + $0x1]] }
  0x66   : > { %v907_v11 = vsub.f32 %v246_v9, %v3389_v10  ;;  %v910_v15 = vsub.f32 %v249_v14, %v3389_v10  ;;  %v913_v19 = vsub.f32 %v252_v18, %v3389_v10  ;;  %v916_v33 = vsub.f32 %v3422_v32, %v3389_v10 }
  0x67   : > { %v906_v57 = vsub.f32 %v3463_v56, %v3389_v10 }
  0x68   : > { %v2499_v13 = vmul.f32 -1.442695, %v907_v11  ;;  %v2502_v17 = vmul.f32 -1.442695, %v910_v15  ;;  %v2505_v21 = vmul.f32 -1.442695, %v913_v19 }
  0x69   : > { %v2508_v35 = vmul.f32 -1.442695, %v916_v33  ;;  %v2498_v58 = vmul.f32 -1.442695, %v906_v57 }
  0x6a   : > { %2756 = vpow2.f32 %v2499_v13 }
  0x6b   : > { %2758 = vpow2.f32 %v2502_v17 }
  0x6c   : > { %2760 = vpow2.f32 %v2505_v21 }
  0x77   : > { %v2757_v23 = vpop.eup %2756 }
  0x78   : > { %v971_v25 = vadd.f32 1.0, %v2757_v23  ;;  %v2759_v26 = vpop.eup %2758 }
  0x79   : > { %v974_v28 = vadd.f32 1.0, %v2759_v26  ;;  %v2761_v29 = vpop.eup %2760 }
  0x7a   : > { %2762 = vrcp.f32 %v971_v25  ;;  %v977_v31 = vadd.f32 1.0, %v2761_v29  ;;  %v4678_v25 = vmov 3  }
  0x7b   : > { %2764 = vrcp.f32 %v974_v28 }
  0x7c   : > { %2766 = vrcp.f32 %v977_v31 }
  0x7d   : > { %2768 = vpow2.f32 %v2508_v35 }
  0x87   : > { %v2763_v36 = vpop.eup %2762 }
  0x88   : > { %v3434_v38 = vmul.f32 %v2763_v36, %v246_v9  ;;  %v2765_v40 = vpop.eup %2764 }
  0x89   : > { %2709 = vset.pattern.permute.xlu0 %v3164_v2  ;;  %v3443_v44 = vmul.f32 %v2765_v40, %v249_v14  ;;  %v2767_v46 = vpop.eup %2766 }
  0x8a   : > { %4729 = vst [vmem:[#allocation21_spill] sm:$0xff] %v3434_v38  ;;  %v1211_v39 = vsub.f32 %v3434_v38, %v3389_v10  ;;  %v2515_v42 = vmul.f32 -1.442695, %v3434_v38  ;;  %v3453_v50 = vmul.f32 %v2767_v46, %v252_v18  ;;  %v2769_v51 = vpop.eup %2768  ;;  %v3479_v18 = vld [vmem:[%s3350_s29 + $0x68] sm:$0xff] }
  0x8b   : > { %4730 = vst [vmem:[#allocation22_spill] sm:$0xff] %v3443_v44  ;;  %v1214_v45 = vsub.f32 %v3443_v44, %v3389_v10  ;;  %v2518_v48 = vmul.f32 -1.442695, %v3443_v44  ;;  %v980_v53 = vadd.f32 1.0, %v2769_v51  ;;  %v919_v23 = vsub.f32 %v3479_v18, %v3389_v10 }
  0x8c   : > { %v2531_v43 = vmul.f32 -1.442695, %v1211_v39  ;;  %2770 = vpow2.f32 %v2515_v42  ;;  %4731 = vst [vmem:[#allocation23_spill] sm:$0xff] %v3453_v50  ;;  %v1217_v52 = vsub.f32 %v3453_v50, %v3389_v10  ;;  %v2521_v54 = vmul.f32 -1.442695, %v3453_v50 }
  0x8d   : > { %v2534_v49 = vmul.f32 -1.442695, %v1214_v45  ;;  %v2511_v29 = vmul.f32 -1.442695, %v919_v23 }
  0x8e   : > { %2772 = vpow2.f32 %v2531_v43  ;;  %v2537_v55 = vmul.f32 -1.442695, %v1217_v52 }
  0x8f   : > { %2774 = vpow2.f32 %v2518_v48 }
  0x90   : > { %2776 = vpow2.f32 %v2534_v49 }
  0x91   : > { %2778 = vrcp.f32 %v980_v53 }
  0x92   : > { %2780 = vpow2.f32 %v2521_v54 }
  0x93   : > { %2782 = vpow2.f32 %v2537_v55  ;;  %v3505_v55 = vld [vmem:[%s3350_s29 + $0x10] sm:$0xff] }
  0x94   : > { %2784 = vpow2.f32 %v2498_v58  ;;  %v908_v57 = vsub.f32 %v3505_v55, %v3389_v10 }
  0x99   : > { %v2771_v59 = vpop.eup %2770 }
  0x9a   : > { %v1163_v61 = vadd.f32 1.0, %v2771_v59 }
  0x9b   : > { %v2773_v60 = vpop.eup %2772 }
  0x9c   : > { %v1275_v62 = vadd.f32 1.0, %v2773_v60  ;;  %2786 = vrcp.f32 %v1163_v61  ;;  %v2775_v63 = vpop.eup %2774  ;;  %v2500_v60 = vmul.f32 -1.442695, %v908_v57 }
  0x9d   : > { %v2777_v9 = vpop.eup %2776  ;;  %v1166_v11 = vadd.f32 1.0, %v2775_v63 }
  0x9e   : > { %2788 = vrcp.f32 %v1275_v62  ;;  %v1278_v13 = vadd.f32 1.0, %v2777_v9  ;;  %v2779_v14 = vpop.eup %2778  ;;  %v3515_v62 = vld [vmem:[%s3350_s29 + $0x18] sm:$0xff] }
  0x9f   : > { %2790 = vrcp.f32 %v1166_v11  ;;  %v2781_v15 = vpop.eup %2780  ;;  %v3476_v17 = vmul.f32 %v2779_v14, %v3422_v32  ;;  %v909_v63 = vsub.f32 %v3515_v62, %v3389_v10  ;;  %v374_v11 = vlaneseq }
  0xa0   : > { %2792 = vrcp.f32 %v1278_v13  ;;  %v2783_v19 = vpop.eup %2782  ;;  %v1169_v21 = vadd.f32 1.0, %v2781_v15 }
  0xa1   : > { %4732 = vst [vmem:[#allocation24_spill] sm:$0xff] %v3476_v17  ;;  %v1281_v26 = vadd.f32 1.0, %v2783_v19  ;;  %v1220_v28 = vsub.f32 %v3476_v17, %v3389_v10  ;;  %v2785_v31 = vpop.eup %2784  ;;  %v2524_v32 = vmul.f32 -1.442695, %v3476_v17  ;;  %v2501_v9 = vmul.f32 -1.442695, %v909_v63 }
  0xa2   : > { %2794 = vrcp.f32 %v1169_v21  ;;  %v970_v33 = vadd.f32 1.0, %v2785_v31  ;;  %v3523_v13 = vshrl.u32 %v374_v11, 7 }
  0xa3   : > { %2796 = vrcp.f32 %v1281_v26  ;;  %v2540_v35 = vmul.f32 -1.442695, %v1220_v28 }
  0xa4   : > { %2798 = vpow2.f32 %v2511_v29  ;;  %4734 = vst [vmem:[#allocation26_spill] sm:$0xff] %v3523_v13  ;;  %v376_v19 = vsub.s32 1, %v3523_v13  ;;  %v4677_v23 = vsub.s32 0, %v3523_v13  ;;  %v3533_v29 = vld [vmem:[%s3350_s29 + $0x28] sm:$0xff] }
  0xa5   : > { %2800 = vpow2.f32 %v2524_v32 }
  0xa6   : > { %2802 = vrcp.f32 %v970_v33 }
  0xa7   : > { %2804 = vpow2.f32 %v2540_v35  ;;  %v911_v35 = vsub.f32 %v3533_v29, %v3389_v10 }
  0xa9   : > { %v2787_v36 = vpop.eup %2786 }
  0xab   : > { %v2789_v39 = vpop.eup %2788 }
  0xac   : > { %v2791_v40 = vpop.eup %2790 }
  0xad   : > { %v2793_v42 = vpop.eup %2792 }
  0xae   : > { %v1326_v43 = vmul.f32 %v2793_v42, %v2791_v40  ;;  %v3548_v40 = vrot.slane %v3362_v0, %v4677_v23 }
  0xb0   : > { %1342 = vst [vmem:[#allocation4 + $0x68] sm:$0xff] %v1326_v43  ;;  %v2503_v43 = vmul.f32 -1.442695, %v911_v35 }
  0xdc   : > { %v3367_v3 = vpop.trf.xlu0 }
  0xdd   : > { %395 = vperm.xlu1 %2710, %v3367_v3   ;;  %296 = vperm.xlu0 %2709, %v3367_v3  }
  0xe0   : > { %v3371_v4 = vpop.trf.xlu0 }
  0xe1   : > { %2711 = vset.pattern.permute.xlu1 %v4680_v5  ;;  %2714 = vset.pattern.permute.xlu0 %v4680_v5 }
  0xe2   : > { %495 = vperm.xlu1 %2711, %v3367_v3   ;;  %499 = vperm.xlu0 %2714, %v3371_v4  }
  0xe4   : > { %v3377_v6 = vpop.trf.xlu0 }
  0xe6   : > { %2712 = vset.pattern.permute.xlu1 %v3164_v2  ;;  %2736 = vset.pattern.permute.xlu0 %v3163_v1 }
  0xe7   : > { %301 = vperm.xlu1 %2712, %v3371_v4  }
  0xe8   : > { %v3382_v7 = vpop.trf.xlu0 }
  0xeb   : > { %2713 = vset.pattern.permute.xlu1 %v3163_v1 }
  0xec   : > { %399 = vperm.xlu1 %2713, %v3371_v4   ;;  %v3386_v8 = vpop.trf.xlu0 }
  0xf0   : > { %2715 = vset.pattern.permute.xlu1 %v3164_v2  ;;  %v3393_v12 = vpop.trf.xlu0 }
  0xf1   : > { %306 = vperm.xlu1 %2715, %v3377_v6  }
  0xf4   : > { %v3398_v16 = vpop.trf.xlu0 }
  0xf5   : > { %2716 = vset.pattern.permute.xlu1 %v3163_v1 }
  0xf6   : > { %403 = vperm.xlu1 %2716, %v3377_v6  }
  0xf8   : > { %v3404_v20 = vpop.trf.xlu0 }
  0xfa   : > { %2717 = vset.pattern.permute.xlu1 %v3164_v2 }
  0xfb   : > { %311 = vperm.xlu1 %2717, %v3382_v7  }
  0xfc   : > { %v3408_v22 = vpop.trf.xlu0 }
  0xff   : > { %2718 = vset.pattern.permute.xlu1 %v3163_v1 }
 0x100   : > { %407 = vperm.xlu1 %2718, %v3382_v7   ;;  %v3412_v24 = vpop.trf.xlu0 }
 0x104   : > { %2719 = vset.pattern.permute.xlu1 %v3164_v2  ;;  %v3415_v27 = vpop.trf.xlu0 }
 0x105   : > { %316 = vperm.xlu1 %2719, %v3386_v8  }
 0x108   : > { %v3418_v30 = vpop.trf.xlu0 }
 0x109   : > { %2720 = vset.pattern.permute.xlu1 %v3163_v1 }
 0x10a   : > { %411 = vperm.xlu1 %2720, %v3386_v8  }
 0x10c   : > { %v3427_v34 = vpop.trf.xlu0 }
 0x10d   : > { %443 = vperm.xlu0 %2736, %v3427_v34  }
 0x10e   : > { %2721 = vset.pattern.permute.xlu1 %v3164_v2 }
 0x10f   : > { %321 = vperm.xlu1 %2721, %v3393_v12  }
 0x110   : > { %v3432_v37 = vpop.trf.xlu0 }
 0x113   : > { %2722 = vset.pattern.permute.xlu1 %v3163_v1 }
 0x114   : > { %415 = vperm.xlu1 %2722, %v3393_v12   ;;  %v3440_v41 = vpop.trf.xlu0 }
 0x118   : > { %2723 = vset.pattern.permute.xlu1 %v3164_v2  ;;  %v3448_v47 = vpop.trf.xlu0 }
 0x119   : > { %326 = vperm.xlu1 %2723, %v3398_v16   ;;  %455 = vperm.xlu0 %2736, %v3448_v47  }
 0x11d   : > { %2724 = vset.pattern.permute.xlu1 %v3163_v1  ;;  %2746 = vset.pattern.permute.xlu0 %v4680_v5 }
 0x11e   : > { %419 = vperm.xlu1 %2724, %v3398_v16   ;;  %511 = vperm.xlu0 %2746, %v3386_v8  }
 0x122   : > { %2725 = vset.pattern.permute.xlu1 %v3164_v2  ;;  %523 = vperm.xlu0 %2746, %v3404_v20  }
 0x123   : > { %331 = vperm.xlu1 %2725, %v3404_v20  }
 0x126   : > { %535 = vperm.xlu0 %2746, %v3415_v27  }
 0x127   : > { %2726 = vset.pattern.permute.xlu1 %v3163_v1 }
 0x128   : > { %423 = vperm.xlu1 %2726, %v3404_v20  }
 0x12a   : > { %547 = vperm.xlu0 %2746, %v3432_v37  }
 0x12c   : > { %2727 = vset.pattern.permute.xlu1 %v3164_v2 }
 0x12d   : > { %336 = vperm.xlu1 %2727, %v3408_v22  }
 0x12e   : > { %2753 = vset.pattern.permute.xlu0 %v4678_v25 }
 0x12f   : > { %599 = vperm.xlu0 %2753, %v3371_v4   ;;  %v1323_v4 = vmul.f32 %v2789_v39, %v2787_v36 }
 0x131   : > { %2728 = vset.pattern.permute.xlu1 %v3163_v1  ;;  %1339 = vst [vmem:[#allocation4] sm:$0xff] %v1323_v4 }
 0x132   : > { %427 = vperm.xlu1 %2728, %v3408_v22  }
 0x133   : > { %611 = vperm.xlu0 %2753, %v3386_v8   ;;  %v2795_v8 = vpop.eup %2794 }
 0x134   : > { %v2797_v45 = vpop.eup %2796 }
 0x135   : > { %v2799_v46 = vpop.eup %2798  ;;  %v1329_v48 = vmul.f32 %v2797_v45, %v2795_v8  ;;  %v3551_v45 = vld [vmem:[%s3350_s29 + $0x30] sm:$0xff] }
 0x136   : > { %2729 = vset.pattern.permute.xlu1 %v3164_v2  ;;  %v2801_v49 = vpop.eup %2800  ;;  %v983_v51 = vadd.f32 1.0, %v2799_v46  ;;  %v560_v46 = vsub.s32 3, %v3523_v13 }
 0x137   : > { %341 = vperm.xlu1 %2729, %v3412_v24   ;;  %623 = vperm.xlu0 %2753, %v3404_v20   ;;  %v2803_v20 = vpop.eup %2802  ;;  %1345 = vst [vmem:[#allocation4 + $0x38] sm:$0xff] %v1329_v48  ;;  %v1172_v52 = vadd.f32 1.0, %v2801_v49 }
 0x138   : > { %v2805_v53 = vpop.eup %2804  ;;  %v3502_v54 = vmul.f32 %v2803_v20, %v3463_v56  ;;  %2806 = vrcp.f32 %v983_v51  ;;  %v912_v20 = vsub.f32 %v3551_v45, %v3389_v10 }
 0x139   : > { %2808 = vrcp.f32 %v1172_v52  ;;  %v1284_v58 = vadd.f32 1.0, %v2805_v53 }
 0x13a   : > { %4733 = vst [vmem:[#allocation25_spill] sm:$0xff] %v3502_v54  ;;  %v1210_v59 = vsub.f32 %v3502_v54, %v3389_v10  ;;  %v2514_v56 = vmul.f32 -1.442695, %v3502_v54 }
 0x13b   : > { %2730 = vset.pattern.permute.xlu1 %v3163_v1  ;;  %635 = vperm.xlu0 %2753, %v3415_v27   ;;  %2810 = vrcp.f32 %v1284_v58  ;;  %v2504_v58 = vmul.f32 -1.442695, %v912_v20 }
 0x13c   : > { %431 = vperm.xlu1 %2730, %v3412_v24   ;;  %v2530_v61 = vmul.f32 -1.442695, %v1210_v59  ;;  %2812 = vpow2.f32 %v2500_v60  ;;  %v3564_v59 = vrot.slane %v3362_v0, %v560_v46 }
 0x13d   : > { %2814 = vpow2.f32 %v2514_v56 }
 0x13e   : > { %2816 = vpow2.f32 %v2530_v61 }
 0x13f   : > { %647 = vperm.xlu0 %2753, %v3432_v37   ;;  %2818 = vpow2.f32 %v2501_v9 }
 0x140   : > { %2731 = vset.pattern.permute.xlu1 %v3164_v2 }
 0x141   : > { %346 = vperm.xlu1 %2731, %v3415_v27  }
 0x143   : > { %655 = vperm.xlu0 %2753, %v3448_v47  }
 0x145   : > { %2732 = vset.pattern.permute.xlu1 %v3163_v1  ;;  %v2807_v14 = vpop.eup %2806 }
 0x146   : > { %435 = vperm.xlu1 %2732, %v3415_v27   ;;  %v2809_v15 = vpop.eup %2808  ;;  %v3529_v21 = vmul.f32 %v2807_v14, %v3479_v18  ;;  %v3540_v18 = vrot.slane %v3362_v0, %v376_v19 }
 0x148   : > { %v2811_v27 = vpop.eup %2810  ;;  %v2527_v31 = vmul.f32 -1.442695, %v3529_v21  ;;  %v1223_v4 = vsub.f32 %v3529_v21, %v3389_v10 }
 0x149   : > { %v1332_v26 = vmul.f32 %v2811_v27, %v2809_v15  ;;  %v2813_v28 = vpop.eup %2812 }
 0x14a   : > { %2733 = vset.pattern.permute.xlu1 %v3164_v2  ;;  %v2815_v32 = vpop.eup %2814  ;;  %v972_v33 = vadd.f32 1.0, %v2813_v28  ;;  %2820 = vpow2.f32 %v2527_v31  ;;  %v2543_v52 = vmul.f32 -1.442695, %v1223_v4  ;;  %v3580_v31 = vld [vmem:[%s3350_s29 + $0x40] sm:$0xff] }
 0x14b   : > { %351 = vperm.xlu1 %2733, %v3418_v30   ;;  %1348 = vst [vmem:[#allocation4 + $0x70] sm:$0xff] %v1332_v26  ;;  %v2817_v36 = vpop.eup %2816  ;;  %v1162_v39 = vadd.f32 1.0, %v2815_v32  ;;  %v914_v35 = vsub.f32 %v3580_v31, %v3389_v10 }
 0x14c   : > { %v1274_v42 = vadd.f32 1.0, %v2817_v36  ;;  %2822 = vrcp.f32 %v972_v33  ;;  %v2819_v8 = vpop.eup %2818 }
 0x14d   : > { %2824 = vrcp.f32 %v1162_v39  ;;  %v973_v51 = vadd.f32 1.0, %v2819_v8  ;;  %v2506_v46 = vmul.f32 -1.442695, %v914_v35 }
 0x14e   : > { %2826 = vrcp.f32 %v1274_v42 }
 0x14f   : > { %2734 = vset.pattern.permute.xlu1 %v3163_v1  ;;  %2828 = vpow2.f32 %v2503_v43 }
 0x150   : > { %439 = vperm.xlu1 %2734, %v3418_v30   ;;  %2830 = vrcp.f32 %v973_v51 }
 0x151   : > { %2832 = vpow2.f32 %v2504_v58 }
 0x152   : > { %2834 = vpow2.f32 %v2543_v52 }
 0x154   : > { %2735 = vset.pattern.permute.xlu1 %v3164_v2 }
 0x155   : > { %356 = vperm.xlu1 %2735, %v3427_v34  }
 0x157   : > { %v2821_v9 = vpop.eup %2820 }
 0x158   : > { %v3554_v48 = vpop.permute.xlu1 %395  ;;  %v297_v49 = vpop.permute.xlu0 %296  ;;  %v1175_v26 = vadd.f32 1.0, %v2821_v9 }
 0x159   : > { %2737 = vset.pattern.permute.xlu1 %v4680_v5  ;;  %v462_v53 = vmul.f32 %v3548_v40, %v3554_v48  ;;  %v378_v57 = vmul.f32 %v3540_v18, %v297_v49  ;;  %v2823_v15 = vpop.eup %2822  ;;  %v3599_v49 = vld [vmem:[%s3350_s29 + $0x48] sm:$0xff] }
 0x15a   : > { %503 = vperm.xlu1 %2737, %v3377_v6   ;;  %v2825_v27 = vpop.eup %2824  ;;  %v3577_v19 = vmul.f32 %v2823_v15, %v3505_v55  ;;  %2836 = vrcp.f32 %v1175_v26 }
 0x15b   : > { %v478_v56 = vadd.f32 %v462_v53, %v378_v57  ;;  %v2827_v28 = vpop.eup %2826 }
 0x15c   : > { %4735 = vst [vmem:[#allocation27_spill] sm:$0xff] %v3577_v19  ;;  %v3583_v32 = vmul.f32 %v2827_v28, %v2825_v27  ;;  %v1212_v33 = vsub.f32 %v3577_v19, %v3389_v10  ;;  %v2516_v4 = vmul.f32 -1.442695, %v3577_v19 }
 0x15d   : > { %v496_v60 = vpop.permute.xlu1 %495 }
 0x15e   : > { %v562_v61 = vmul.f32 %v3564_v59, %v496_v60  ;;  %2738 = vset.pattern.permute.xlu1 %v4678_v25  ;;  %1338 = vst [vmem:[#allocation4 + $0x8] sm:$0xff] %v3583_v32  ;;  %v2532_v43 = vmul.f32 -1.442695, %v1212_v33 }
 0x15f   : > { %595 = vperm.xlu1 %2738, %v3367_v3   ;;  %v2829_v3 = vpop.eup %2828 }
 0x160   : > { %v3569_v63 = vadd.f32 %v562_v61, %v478_v56  ;;  %v2831_v36 = vpop.eup %2830  ;;  %v975_v55 = vadd.f32 1.0, %v2829_v3 }
 0x161   : > { %1034 = vxpose.xlu0.b32.start [1/16] %v3502_v54, 128  ;;  %v2833_v42 = vpop.eup %2832  ;;  %v3596_v8 = vmul.f32 %v2831_v36, %v3515_v62 }
 0x162   : > { %v3572_v14 = vpop.permute.xlu1 %301  ;;  %2838 = vrcp.f32 %v975_v55  ;;  %v2835_v51 = vpop.eup %2834  ;;  %v976_v20 = vadd.f32 1.0, %v2833_v42 }
 0x163   : > { %2739 = vset.pattern.permute.xlu1 %v3164_v2  ;;  %4736 = vst [vmem:[#allocation28_spill] sm:$0xff] %v3596_v8  ;;  %2840 = vpow2.f32 %v2516_v4  ;;  %v1213_v52 = vsub.f32 %v3596_v8, %v3389_v10  ;;  %v2517_v62 = vmul.f32 -1.442695, %v3596_v8  ;;  %v1287_v60 = vadd.f32 1.0, %v2835_v51 }
 0x164   : > { %361 = vperm.xlu1 %2739, %v3432_v37   ;;  %2842 = vpow2.f32 %v2532_v43 }
 0x165   : > { %1035 = vxpose.xlu0.b32.cont [2/16] %v3434_v38, 128  ;;  %2844 = vrcp.f32 %v976_v20  ;;  %v2533_v57 = vmul.f32 -1.442695, %v1213_v52 }
 0x166   : > { %2846 = vpow2.f32 %v2506_v46 }
 0x167   : > { %v3589_v39 = vpop.permute.xlu1 %399  ;;  %2848 = vpow2.f32 %v2517_v62  ;;  %v2837_v27 = vpop.eup %2836 }
 0x168   : > { %2740 = vset.pattern.permute.xlu1 %v3163_v1  ;;  %2850 = vpow2.f32 %v2533_v57  ;;  %v3642_v57 = vld [vmem:[%s3350_s29 + $0x60] sm:$0xff] }
 0x169   : > { %447 = vperm.xlu1 %2740, %v3432_v37   ;;  %1036 = vxpose.xlu0.b32.cont [3/16] %v3577_v19, 128  ;;  %v915_v37 = vsub.f32 %v3599_v49, %v3389_v10  ;;  %v4744_v19 = vmov 3  }
 0x16b   : > { %v2507_v58 = vmul.f32 -1.442695, %v915_v37 }
 0x16c   : > { %v307_v53 = vpop.permute.xlu1 %306 }
 0x16d   : > { %2741 = vset.pattern.permute.xlu1 %v3164_v2  ;;  %1037 = vxpose.xlu0.b32.cont [4/16] %v3596_v8, 128  ;;  %2852 = vpow2.f32 %v2507_v58  ;;  %v380_v61 = vmul.f32 %v3540_v18, %v307_v53 }
 0x16e   : > { %366 = vperm.xlu1 %2741, %v3440_v41   ;;  %2854 = vrcp.f32 %v1287_v60 }
 0x16f   : > { %v2839_v26 = vpop.eup %2838 }
 0x170   : > { %v2841_v3 = vpop.eup %2840  ;;  %v3622_v33 = vmul.f32 %v2839_v26, %v3533_v29  ;;  %v3633_v29 = vld [vmem:[%s3350_s29 + $0x58] sm:$0xff] }
 0x171   : > { %v3610_v56 = vpop.permute.xlu1 %403  ;;  %1038 = vxpose.xlu0.b32.cont [5/16] %v3443_v44, 128  ;;  %v2843_v35 = vpop.eup %2842  ;;  %v1164_v36 = vadd.f32 1.0, %v2841_v3 }
 0x172   : > { %v464_v9 = vmul.f32 %v3548_v40, %v3610_v56  ;;  %2742 = vset.pattern.permute.xlu1 %v3163_v1  ;;  %4737 = vst [vmem:[#allocation29_spill] sm:$0xff] %v3622_v33  ;;  %v2845_v55 = vpop.eup %2844  ;;  %v1276_v1 = vadd.f32 1.0, %v2843_v35  ;;  %v1215_v4 = vsub.f32 %v3622_v33, %v3389_v10  ;;  %v2519_v43 = vmul.f32 -1.442695, %v3622_v33 }
 0x173   : > { %451 = vperm.xlu1 %2742, %v3440_v41   ;;  %v2847_v42 = vpop.eup %2846  ;;  %2856 = vrcp.f32 %v1164_v36 }
 0x174   : > { %v3618_v15 = vadd.f32 %v464_v9, %v380_v61  ;;  %v2849_v46 = vpop.eup %2848  ;;  %2858 = vrcp.f32 %v1276_v1  ;;  %v2535_v20 = vmul.f32 -1.442695, %v1215_v4  ;;  %v917_v61 = vsub.f32 %v3633_v29, %v3389_v10 }
 0x175   : > { %1039 = vxpose.xlu0.b32.cont [6/16] %v3622_v33, 128  ;;  %v2851_v52 = vpop.eup %2850  ;;  %v1165_v62 = vadd.f32 1.0, %v2849_v46  ;;  %2860 = vpow2.f32 %v2519_v43  ;;  %v978_v3 = vadd.f32 1.0, %v2847_v42  ;;  %v766_v33 = vadd.s32 56, %v3523_v13 }
 0x176   : > { %v312_v28 = vpop.permute.xlu1 %311  ;;  %v1277_v58 = vadd.f32 1.0, %v2851_v52  ;;  %2862 = vpow2.f32 %v2535_v20  ;;  %v2509_v43 = vmul.f32 -1.442695, %v917_v61  ;;  %v3664_v20 = vld [vmem:[%s3350_s29 + $0x78] sm:$0xff] }
 0x177   : > { %2743 = vset.pattern.permute.xlu1 %v3164_v2  ;;  %v3630_v2 = vmul.f32 %v2845_v55, %v3551_v45  ;;  %v381_v37 = vmul.f32 %v3540_v18, %v312_v28  ;;  %2864 = vrcp.f32 %v1165_v62  ;;  %v918_v55 = vsub.f32 %v3642_v57, %v3389_v10 }
 0x178   : > { %371 = vperm.xlu1 %2743, %v3448_v47   ;;  %2866 = vrcp.f32 %v1277_v58  ;;  %v921_v52 = vsub.f32 %v3664_v20, %v3389_v10 }
 0x179   : > { %4738 = vst [vmem:[#allocation30_spill] sm:$0xff] %v3630_v2  ;;  %v1216_v60 = vsub.f32 %v3630_v2, %v3389_v10  ;;  %1040 = vxpose.xlu0.b32.cont [7/16] %v3630_v2, 128  ;;  %v2520_v28 = vmul.f32 -1.442695, %v3630_v2  ;;  %v2510_v42 = vmul.f32 -1.442695, %v918_v55 }
 0x17a   : > { %v2853_v45 = vpop.eup %2852 }
 0x17b   : > { %v3635_v51 = vpop.permute.xlu1 %407  ;;  %v2855_v9 = vpop.eup %2854  ;;  %v2536_v35 = vmul.f32 -1.442695, %v1216_v60  ;;  %v979_v36 = vadd.f32 1.0, %v2853_v45  ;;  %2868 = vpow2.f32 %v2520_v28  ;;  %v2513_v45 = vmul.f32 -1.442695, %v921_v52 }
 0x17c   : > { %v465_v53 = vmul.f32 %v3548_v40, %v3635_v51  ;;  %2744 = vset.pattern.permute.xlu1 %v4680_v5  ;;  %v1335_v4 = vmul.f32 %v2855_v9, %v2837_v27  ;;  %v3673_v60 = vpop.permute.xlu0 %499 }
 0x17d   : > { %507 = vperm.xlu1 %2744, %v3382_v7   ;;  %2870 = vpow2.f32 %v2536_v35  ;;  %1041 = vxpose.xlu0.b32.cont [8/16] %v3453_v50, 128  ;;  %v660_v50 = vsub.s32 2, %v3523_v13 }
 0x17e   : > { %v3650_v26 = vadd.f32 %v465_v53, %v381_v37  ;;  %2872 = vrcp.f32 %v978_v3  ;;  %1351 = vst [vmem:[#allocation4 + $0x30] sm:$0xff] %v1335_v4 }
 0x17f   : > { %2874 = vrcp.f32 %v979_v36 }
 0x180   : > { %v3655_v1 = vpop.permute.xlu1 %316  ;;  %2876 = vpow2.f32 %v2509_v43  ;;  %v2857_v27 = vpop.eup %2856 }
 0x181   : > { %2745 = vset.pattern.permute.xlu1 %v4678_v25  ;;  %2878 = vpow2.f32 %v2510_v42  ;;  %v2859_v37 = vpop.eup %2858 }
 0x182   : > { %603 = vperm.xlu1 %2745, %v3377_v6   ;;  %v2861_v53 = vpop.eup %2860  ;;  %v3668_v62 = vmul.f32 %v2859_v37, %v2857_v27  ;;  %v3671_v6 = vld [vmem:[%s3350_s29 + $0x70] sm:$0xff]  ;;  %2880 = vpow2.f32 %v2513_v45 }
 0x183   : > { %v2863_v58 = vpop.eup %2862  ;;  %v920_v9 = vsub.f32 %v3671_v6, %v3389_v10 }
 0x184   : > { %v2865_v28 = vpop.eup %2864  ;;  %1340 = vst [vmem:[#allocation4 + $0x48] sm:$0xff] %v3668_v62  ;;  %v1279_v3 = vadd.f32 1.0, %v2863_v58 }
 0x185   : > { %v3660_v46 = vpop.permute.xlu1 %411  ;;  %v2867_v35 = vpop.eup %2866  ;;  %v2512_v36 = vmul.f32 -1.442695, %v920_v9 }
 0x186   : > { %607 = vperm.xlu1 %2745, %v3382_v7   ;;  %v1167_v7 = vadd.f32 1.0, %v2861_v53  ;;  %v3680_v4 = vmul.f32 %v2867_v35, %v2865_v28 }
 0x188   : > { %2882 = vrcp.f32 %v1167_v7  ;;  %v2869_v55 = vpop.eup %2868  ;;  %v3682_v42 = vpop.permute.xlu0 %443  ;;  %1341 = vst [vmem:[#allocation4 + $0x60] sm:$0xff] %v3680_v4 }
 0x189   : > { %2884 = vrcp.f32 %v1279_v3  ;;  %v1168_v27 = vadd.f32 1.0, %v2869_v55 }
 0x18a   : > { %v322_v61 = vpop.permute.xlu1 %321  ;;  %2747 = vset.pattern.permute.xlu1 %v4680_v5  ;;  %v2871_v43 = vpop.eup %2870  ;;  %2886 = vpow2.f32 %v2512_v36 }
 0x18b   : > { %515 = vperm.xlu1 %2747, %v3393_v12   ;;  %v2873_v52 = vpop.eup %2872  ;;  %v1280_v53 = vadd.f32 1.0, %v2871_v43  ;;  %v383_v58 = vmul.f32 %v3540_v18, %v322_v61  ;;  %2888 = vrcp.f32 %v1168_v27 }
 0x18c   : > { %v2875_v45 = vpop.eup %2874  ;;  %v3692_v9 = vmul.f32 %v2873_v52, %v3580_v31 }
 0x18d   : > { %2890 = vrcp.f32 %v1280_v53  ;;  %v3695_v28 = vmul.f32 %v2875_v45, %v3599_v49  ;;  %v2877_v3 = vpop.eup %2876 }
 0x18e   : > { %4739 = vst [vmem:[#allocation31_spill] sm:$0xff] %v3692_v9  ;;  %v2522_v36 = vmul.f32 -1.442695, %v3692_v9  ;;  %v1218_v55 = vsub.f32 %v3692_v9, %v3389_v10  ;;  %1042 = vxpose.xlu0.b32.cont [9/16] %v3692_v9, 128  ;;  %v2879_v43 = vpop.eup %2878  ;;  %v981_v53 = vadd.f32 1.0, %v2877_v3 }
 0x18f   : > { %v3684_v37 = vpop.permute.xlu1 %415  ;;  %519 = vperm.xlu1 %2747, %v3398_v16   ;;  %4740 = vst [vmem:[#allocation32_spill] sm:$0xff] %v3695_v28  ;;  %v2523_v61 = vmul.f32 -1.442695, %v3695_v28  ;;  %v1219_v31 = vsub.f32 %v3695_v28, %v3389_v10  ;;  %v982_v23 = vadd.f32 1.0, %v2879_v43 }
 0x190   : > { %v467_v7 = vmul.f32 %v3548_v40, %v3684_v37  ;;  %2892 = vpow2.f32 %v2522_v36  ;;  %v2538_v52 = vmul.f32 -1.442695, %v1218_v55 }
 0x191   : > { %v2539_v45 = vmul.f32 -1.442695, %v1219_v31 }
 0x192   : > { %v3697_v35 = vadd.f32 %v467_v7, %v383_v58  ;;  %2894 = vpow2.f32 %v2538_v52  ;;  %1043 = vxpose.xlu0.b32.cont [10/16] %v3695_v28, 128  ;;  %v760_v58 = vadd.s32 8, %v3523_v13  ;;  %v3713_v7 = vand.u32 127, %v374_v11 }
 0x193   : > { %2748 = vset.pattern.permute.xlu1 %v4678_v25  ;;  %2896 = vpow2.f32 %v2523_v61  ;;  %v2881_v25 = vpop.eup %2880 }
 0x194   : > { %v327_v49 = vpop.permute.xlu1 %326  ;;  %615 = vperm.xlu1 %2748, %v3393_v12   ;;  %v3708_v27 = vpop.permute.xlu0 %455  ;;  %2898 = vpow2.f32 %v2539_v45  ;;  %v985_v3 = vadd.f32 1.0, %v2881_v25  ;;  %v778_v43 = vsub.s32 %v760_v58, %v3713_v7 }
 0x195   : > { %v2883_v12 = vpop.eup %2882  ;;  %2900 = vrcp.f32 %v981_v53  ;;  %v384_v31 = vmul.f32 %v3540_v18, %v327_v49  ;;  %v4742_v53 = vmov 2  }
 0x196   : > { %v2885_v55 = vpop.eup %2884  ;;  %1044 = vxpose.xlu0.b32.cont [11/16] %v3476_v17, 128  ;;  %2902 = vrcp.f32 %v982_v23  ;;  %v797_v9 = vsub.s32 0, %v778_v43 }
 0x197   : > { %v2887_v61 = vpop.eup %2886  ;;  %v3726_v52 = vmul.f32 %v2885_v55, %v2883_v12  ;;  %2904 = vrcp.f32 %v985_v3 }
 0x198   : > { %619 = vperm.xlu1 %2748, %v3398_v16   ;;  %v763_v16 = vadd.s32 32, %v3523_v13  ;;  %v984_v25 = vadd.f32 1.0, %v2887_v61  ;;  %v2889_v28 = vpop.eup %2888  ;;  %v3747_v2 = vmin.u32 %v797_v9, %v778_v43  ;;  %v3757_v9 = vrot.slane %v3362_v0, %v660_v50 }
 0x199   : > { %v3716_v5 = vpop.permute.xlu1 %419  ;;  %v3718_v36 = vpop.permute.xlu0 %511  ;;  %4741 = vst [vmem:[#allocation33_spill] sm:$0xff] %v3726_v52  ;;  %1343 = vst [vmem:[#allocation4 + $0x18] sm:$0xff] %v3726_v52  ;;  %v563_v52 = vmul.f32 %v3564_v59, %v3673_v60  ;;  %v3772_v0 = vsub.s32 %v766_v33, %v3713_v7 }
 0x19a   : > { %v468_v11 = vmul.f32 %v3548_v40, %v3716_v5  ;;  %v2891_v17 = vpop.eup %2890  ;;  %2906 = vrcp.f32 %v984_v25  ;;  %v781_v12 = vsub.s32 %v763_v16, %v3713_v7  ;;  %v379_v16 = vmul.f32 %v3540_v18, %v3572_v14 }
 0x19b   : > { %v3736_v23 = vmul.f32 %v2891_v17, %v2889_v28  ;;  %vm842_vm0 = vcmp.le.s32.totalorder %v3747_v2, 3  ;;  %v566_v33 = vmul.f32 %v3564_v59, %v3718_v36 }
 0x19c   : > { %v3728_v45 = vadd.f32 %v468_v11, %v384_v31  ;;  %2749 = vset.pattern.permute.xlu1 %v4742_v53  ;;  %v463_v11 = vmul.f32 %v3548_v40, %v3589_v39  ;;  %v806_v17 = vsub.s32 0, %v781_v12 }
 0x19d   : > { %527 = vperm.xlu1 %2749, %v3408_v22   ;;  %v3732_v49 = vpop.permute.xlu0 %523  ;;  %4743 = vst [vmem:[#allocation34_spill] sm:$0xff] %v3736_v23  ;;  %v2893_v55 = vpop.eup %2892  ;;  %1344 = vst [vmem:[#allocation4 + $0x10] sm:$0xff] %v3736_v23 }
 0x19e   : > { %v332_v58 = vpop.permute.xlu1 %331  ;;  %v1170_v61 = vadd.f32 1.0, %v2893_v55  ;;  %v479_v23 = vadd.f32 %v463_v11, %v379_v16  ;;  %v3759_v43 = vmin.u32 %v806_v17, %v781_v12 }
 0x19f   : > { %v2895_v3 = vpop.eup %2894  ;;  %v385_v17 = vmul.f32 %v3540_v18, %v332_v58 }
 0x1a0   : > { %v2897_v28 = vpop.eup %2896  ;;  %2908 = vrcp.f32 %v1170_v61  ;;  %v1282_v44 = vadd.f32 1.0, %v2895_v3  ;;  %vm845_vm1 = vcmp.le.s32.totalorder %v3759_v43, 3 }
 0x1a1   : > { %531 = vperm.xlu1 %2749, %v3412_v24   ;;  %v3739_v31 = vpop.permute.xlu0 %535  ;;  %v2899_v8 = vpop.eup %2898  ;;  %v1171_v38 = vadd.f32 1.0, %v2897_v28  ;;  %v466_v28 = vmul.f32 %v3548_v40, %v3660_v46 }
 0x1a2   : > { %v2901_v54 = vpop.eup %2900  ;;  %2910 = vrcp.f32 %v1282_v44  ;;  %v1283_v14 = vadd.f32 1.0, %v2899_v8  ;;  %v382_v8 = vmul.f32 %v3540_v18, %v3655_v1 }
 0x1a3   : > { %v3745_v25 = vpop.permute.xlu1 %423  ;;  %v3762_v61 = vmul.f32 %v2901_v54, %v3633_v29  ;;  %v2903_v3 = vpop.eup %2902  ;;  %2912 = vrcp.f32 %v1171_v38  ;;  %v579_v29 = vadd.f32 %v563_v52, %v479_v23 }
 0x1a4   : > { %2914 = vrcp.f32 %v1283_v14  ;;  %v2905_v54 = vpop.eup %2904  ;;  %v3786_v60 = vmul.f32 %v2903_v3, %v3642_v57  ;;  %v695_v57 = vmul.f32 %v3564_v59, %v3589_v39  ;;  %v701_v2 = vmul.f32 %v3564_v59, %v3745_v25 }
 0x1a5   : > { %2750 = vset.pattern.permute.xlu1 %v4744_v19  ;;  %v3753_v55 = vpop.permute.xlu0 %547  ;;  %4745 = vst [vmem:[#allocation35_spill] sm:$0xff] %v3762_v61  ;;  %v2525_v44 = vmul.f32 -1.442695, %v3762_v61  ;;  %v1221_v50 = vsub.f32 %v3762_v61, %v3389_v10  ;;  %1045 = vxpose.xlu0.b32.cont [12/16] %v3762_v61, 128  ;;  %v482_v61 = vadd.f32 %v466_v28, %v382_v8 }
 0x1a6   : > { %627 = vperm.xlu1 %2750, %v3408_v22   ;;  %v469_v22 = vmul.f32 %v3548_v40, %v3745_v25  ;;  %v2526_v1 = vmul.f32 -1.442695, %v3786_v60  ;;  %v1222_v36 = vsub.f32 %v3786_v60, %v3389_v10  ;;  %v569_v28 = vmul.f32 %v3564_v59, %v3732_v49 }
 0x1a7   : > { %v2907_v12 = vpop.eup %2906  ;;  %2916 = vpow2.f32 %v2525_v44  ;;  %v2541_v14 = vmul.f32 -1.442695, %v1221_v50  ;;  %v582_v58 = vadd.f32 %v566_v33, %v482_v61  ;;  %v698_v61 = vmul.f32 %v3564_v59, %v3660_v46 }
 0x1a8   : > { %v3768_v11 = vpop.permute.xlu1 %336  ;;  %v485_v52 = vadd.f32 %v469_v22, %v385_v17  ;;  %v2542_v8 = vmul.f32 -1.442695, %v1222_v36  ;;  %v815_v49 = vsub.s32 0, %v3772_v0 }
 0x1a9   : > { %2918 = vpow2.f32 %v2541_v14  ;;  %1046 = vxpose.xlu0.b32.cont [13/16] %v3786_v60, 128 }
 0x1aa   : > { %631 = vperm.xlu1 %2750, %v3412_v24   ;;  %v600_v38 = vpop.permute.xlu0 %599  ;;  %v3794_v24 = vmul.f32 %v2907_v12, %v3671_v6  ;;  %2920 = vpow2.f32 %v2526_v1  ;;  %v3805_v6 = vmul.f32 %v2905_v54, %v3664_v20  ;;  %v585_v17 = vadd.f32 %v569_v28, %v485_v52 }
 0x1ab   : > { %v663_v16 = vmul.f32 %v3757_v9, %v600_v38  ;;  %v727_v39 = vmul.f32 %v600_v38, %v3540_v18  ;;  %2922 = vpow2.f32 %v2542_v8 }
 0x1ac   : > { %v2528_v33 = vmul.f32 -1.442695, %v3794_v24  ;;  %v2529_v46 = vmul.f32 -1.442695, %v3805_v6  ;;  %v1225_v1 = vsub.f32 %v3805_v6, %v3389_v10 }
 0x1ad   : > { %v679_v23 = vadd.f32 %v663_v16, %v579_v29  ;;  %v3798_v3 = vpop.permute.xlu1 %427  ;;  %v1224_v29 = vsub.f32 %v3794_v24, %v3389_v10  ;;  %v2909_v20 = vpop.eup %2908  ;;  %1047 = vxpose.xlu0.b32.cont [14/16] %v3529_v21, 128 }
 0x1ae   : > { %2751 = vset.pattern.permute.xlu1 %v4742_v53  ;;  %v612_v44 = vpop.permute.xlu0 %611  ;;  %2924 = vpow2.f32 %v2528_v33  ;;  %v2545_v43 = vmul.f32 -1.442695, %v1225_v1 }
 0x1af   : > { %v711_v50 = vadd.f32 %v695_v57, %v679_v23  ;;  %v666_v22 = vmul.f32 %v3757_v9, %v612_v44  ;;  %539 = vperm.xlu1 %2751, %v3418_v30   ;;  %v2544_v14 = vmul.f32 -1.442695, %v1224_v29  ;;  %v2911_v36 = vpop.eup %2910  ;;  %v730_v52 = vmul.f32 %v612_v44, %v3540_v18 }
 0x1b0   : > { %v2913_v10 = vpop.eup %2912 }
 0x1b1   : > { %v743_v54 = vadd.f32 %v727_v39, %v711_v50  ;;  %v682_v12 = vadd.f32 %v666_v22, %v582_v58  ;;  %v2489_v50 = vmin.u32 %v815_v49, %v3772_v0  ;;  %v3831_v39 = vmul.f32 %v2911_v36, %v2909_v20  ;;  %1048 = vxpose.xlu0.b32.cont [15/16] %v3794_v24, 128  ;;  %v2915_v44 = vpop.eup %2914 }
 0x1b2   : > { %v3817_v38 = vpop.permute.xlu1 %341  ;;  %v624_v16 = vpop.permute.xlu0 %623  ;;  %2926 = vpow2.f32 %v2544_v14 }
 0x1b3   : > { %v858_v57 = vsel %vm842_vm0, 0.0, %v743_v54  ;;  %v714_v23 = vadd.f32 %v698_v61, %v682_v12  ;;  %v669_v58 = vmul.f32 %v3757_v9, %v624_v16  ;;  %543 = vperm.xlu1 %2751, %v3427_v34   ;;  %1346 = vst [vmem:[#allocation4 + $0x40] sm:$0xff] %v3831_v39  ;;  %2928 = vpow2.f32 %v2529_v46 }
 0x1b4   : > { %v3827_v28 = vmul.f32 0.5, %v858_v57  ;;  %v733_v49 = vmul.f32 %v624_v16, %v3540_v18  ;;  %v2917_v25 = vpop.eup %2916  ;;  %vm848_vm2 = vcmp.le.s32.totalorder %v2489_v50, 3  ;;  %v3845_v54 = vmul.f32 %v2915_v44, %v2913_v10 }
 0x1b5   : > { %v746_v22 = vadd.f32 %v730_v52, %v714_v23  ;;  %v685_v8 = vadd.f32 %v669_v58, %v585_v17  ;;  %v1173_v12 = vadd.f32 1.0, %v2917_v25  ;;  %1049 = vxpose.xlu0.b32.end [16/16] %v3805_v6, 128  ;;  %2930 = vpow2.f32 %v2545_v43 }
 0x1b6   : > { %890 = vst [vmem:[#allocation2] sm:$0xff] %v3827_v28  ;;  %v2919_v17 = vpop.eup %2918  ;;  %v769_v46 = vadd.s32 80, %v3523_v13  ;;  %1347 = vst [vmem:[#allocation4 + $0x28] sm:$0xff] %v3845_v54  ;;  %v636_v43 = vpop.permute.xlu0 %635  ;;  %vm1482_vm0 = vcmask 7168  }
 0x1b7   : > { %v861_v61 = vsel %vm845_vm1, 0.0, %v746_v22  ;;  %v717_v0 = vadd.f32 %v701_v2, %v685_v8  ;;  %v3839_v33 = vpop.permute.xlu1 %431  ;;  %2752 = vset.pattern.permute.xlu1 %v4744_v19  ;;  %v2921_v16 = vpop.eup %2920  ;;  %2932 = vrcp.f32 %v1173_v12 }
 0x1b8   : > { %v3842_v29 = vmul.f32 0.5, %v861_v61  ;;  %639 = vperm.xlu1 %2752, %v3418_v30   ;;  %v1285_v30 = vadd.f32 1.0, %v2919_v17  ;;  %v1174_v57 = vadd.f32 1.0, %v2921_v16  ;;  %v2923_v23 = vpop.eup %2922  ;;  %v787_v58 = vsub.s32 %v769_v46, %v3713_v7 }
 0x1b9   : > { %v749_v20 = vadd.f32 %v733_v49, %v717_v0  ;;  %v1286_v50 = vadd.f32 1.0, %v2923_v23 }
 0x1ba   : > { %893 = vst [vmem:[#allocation2 + $0x50] sm:$0xff] %v3842_v29  ;;  %2934 = vrcp.f32 %v1285_v30  ;;  %v824_v61 = vsub.s32 0, %v787_v58 }
 0x1bb   : > { %v864_v14 = vsel %vm848_vm2, 0.0, %v749_v20  ;;  %v2925_v52 = vpop.eup %2924  ;;  %2936 = vrcp.f32 %v1174_v57  ;;  %v672_v20 = vmul.f32 %v3757_v9, %v636_v43 }
 0x1bc   : > { %v3851_v1 = vmul.f32 0.5, %v864_v14  ;;  %v347_v36 = vpop.permute.xlu1 %346  ;;  %643 = vperm.xlu1 %2752, %v3427_v34   ;;  %v1176_v10 = vadd.f32 1.0, %v2925_v52  ;;  %2938 = vrcp.f32 %v1286_v50  ;;  %v2492_v14 = vmin.u32 %v824_v61, %v787_v58 }
 0x1bd   : > { %v388_v34 = vmul.f32 %v3540_v18, %v347_v36 }
 0x1be   : > { %896 = vst [vmem:[#allocation2 + $0x48] sm:$0xff] %v3851_v1  ;;  %2940 = vrcp.f32 %v1176_v10  ;;  %vm851_vm3 = vcmp.le.s32.totalorder %v2492_v14, 3 }
 0x1bf   : > { %v2927_v22 = vpop.eup %2926 }
 0x1c0   : > { %2754 = vset.pattern.permute.xlu1 %v4742_v53  ;;  %v2929_v44 = vpop.eup %2928  ;;  %v1288_v0 = vadd.f32 1.0, %v2927_v22  ;;  %v572_v53 = vmul.f32 %v3564_v59, %v3739_v31  ;;  %v736_v31 = vmul.f32 %v636_v43, %v3540_v18 }
 0x1c1   : > { %v436_v2 = vpop.permute.xlu1 %435  ;;  %551 = vperm.xlu1 %2754, %v3440_v41   ;;  %v1177_v25 = vadd.f32 1.0, %v2929_v44 }
 0x1c2   : > { %v472_v8 = vmul.f32 %v3548_v40, %v436_v2  ;;  %2942 = vrcp.f32 %v1288_v0  ;;  %v2931_v16 = vpop.eup %2930  ;;  %v704_v36 = vmul.f32 %v3564_v59, %v436_v2 }
 0x1c3   : > { %2944 = vrcp.f32 %v1177_v25  ;;  %v1289_v30 = vadd.f32 1.0, %v2931_v16 }
 0x1c4   : > { %v488_v49 = vadd.f32 %v472_v8, %v388_v34  ;;  %v2933_v57 = vpop.eup %2932 }
 0x1c5   : > { %555 = vperm.xlu1 %2754, %v3448_v47   ;;  %2946 = vrcp.f32 %v1289_v30 }
 0x1c6   : > { %v588_v12 = vadd.f32 %v572_v53, %v488_v49  ;;  %v3864_v17 = vpop.permute.xlu1 %351  ;;  %v777_v49 = vsub.s32 %v3523_v13, %v3713_v7 }
 0x1c7   : > { %v2935_v47 = vpop.eup %2934 }
 0x1c8   : > { %v688_v46 = vadd.f32 %v672_v20, %v588_v12  ;;  %v3872_v58 = vmul.f32 %v2935_v47, %v2933_v57  ;;  %v2937_v10 = vpop.eup %2936  ;;  %v794_v16 = vsub.s32 0, %v777_v49  ;;  %v694_v57 = vmul.f32 %v3564_v59, %v3554_v48  ;;  %v648_v48 = vpop.permute.xlu0 %647 }
 0x1c9   : > { %2755 = vset.pattern.permute.xlu1 %v4744_v19  ;;  %v2939_v22 = vpop.eup %2938  ;;  %v474_v19 = vmul.f32 %v3548_v40, %v3682_v42 }
 0x1ca   : > { %v720_v23 = vadd.f32 %v704_v36, %v688_v46  ;;  %651 = vperm.xlu1 %2755, %v3440_v41   ;;  %1349 = vst [vmem:[#allocation4 + $0x20] sm:$0xff] %v3872_v58  ;;  %v3879_v44 = vmul.f32 %v2939_v22, %v2937_v10  ;;  %v2482_v30 = vmin.u32 %v794_v16, %v777_v49 }
 0x1cb   : > { %v3870_v52 = vpop.permute.xlu1 %439  ;;  %v2941_v8 = vpop.eup %2940  ;;  %v575_v49 = vmul.f32 %v3564_v59, %v3753_v55 }
 0x1cc   : > { %v752_v50 = vadd.f32 %v736_v31, %v720_v23  ;;  %1350 = vst [vmem:[#allocation4 + $0x58] sm:$0xff] %v3879_v44  ;;  %v772_v23 = vadd.s32 104, %v3523_v13  ;;  %vm841_vm4 = vcmp.le.s32.totalorder %v2482_v30, 3 }
 0x1ce   : > { %v867_v2 = vsel %vm851_vm3, 0.0, %v752_v50  ;;  %v790_v22 = vsub.s32 %v772_v23, %v3713_v7  ;;  %v739_v23 = vmul.f32 %v648_v48, %v3540_v18 }
 0x1cf   : > { %v3877_v34 = vmul.f32 0.5, %v867_v2  ;;  %v2943_v61 = vpop.eup %2942 }
 0x1d0   : > { %v357_v41 = vpop.permute.xlu1 %356  ;;  %v3886_v53 = vmul.f32 %v2943_v61, %v2941_v8  ;;  %v2945_v25 = vpop.eup %2944 }
 0x1d1   : > { %899 = vst [vmem:[#allocation2 + $0x10] sm:$0xff] %v3877_v34  ;;  %v390_v43 = vmul.f32 %v3540_v18, %v357_v41 }
 0x1d2   : > { %1352 = vst [vmem:[#allocation4 + $0x50] sm:$0xff] %v3886_v53  ;;  %v2947_v12 = vpop.eup %2946 }
 0x1d3   : > { %v3884_v0 = vadd.f32 %v474_v19, %v390_v43  ;;  %v3891_v14 = vmul.f32 %v2947_v12, %v2945_v25  ;;  %v675_v12 = vmul.f32 %v3757_v9, %v648_v48 }
 0x1d5   : > { %v504_v20 = vpop.permute.xlu1 %503  ;;  %1353 = vst [vmem:[#allocation4 + $0x78] sm:$0xff] %v3891_v14 }
 0x1da   : > { %v596_v46 = vpop.permute.xlu1 %595 }
 0x1db   : > { %v662_v36 = vmul.f32 %v3757_v9, %v596_v46  ;;  %v726_v50 = vmul.f32 %v596_v46, %v3540_v18 }
 0x1dd   : > { %v678_v31 = vadd.f32 %v662_v36, %v3569_v63  ;;  %v833_v63 = vsub.s32 0, %v790_v22 }
 0x1df   : > { %v710_v47 = vadd.f32 %v694_v57, %v678_v31  ;;  %v362_v10 = vpop.permute.xlu1 %361  ;;  %v2495_v36 = vmin.u32 %v833_v63, %v790_v22 }
 0x1e0   : > { %v391_v43 = vmul.f32 %v3540_v18, %v362_v10 }
 0x1e1   : > { %v742_v2 = vadd.f32 %v726_v50, %v710_v47  ;;  %vm854_vm5 = vcmp.le.s32.totalorder %v2495_v36, 3  ;;  %v564_v36 = vmul.f32 %v3564_v59, %v504_v20 }
 0x1e3   : > { %v857_v19 = vsel %vm841_vm4, 0.0, %v742_v2 }
 0x1e4   : > { %v873_v8 = vmul.f32 0.5, %v857_v19  ;;  %v448_v41 = vpop.permute.xlu1 %447  ;;  %v2948_v19 = vld [vmem:[#allocation4] sm:$0xff] }
 0x1e5   : > { %v475_v61 = vmul.f32 %v3548_v40, %v448_v41  ;;  %v707_v57 = vmul.f32 %v3564_v59, %v448_v41  ;;  %v1355_v22 = vmul.f32 %v2948_v19, %v3827_v28  ;;  %v477_v41 = vmul.f32 %v3548_v40, %v3708_v27 }
 0x1e6   : > { %889 = vst [vmem:[#allocation2 + $0x30] sm:$0xff] %v873_v8  ;;  %v1354_v31 = vmul.f32 %v3583_v32, %v873_v8 }
 0x1e7   : > { %v491_v25 = vadd.f32 %v475_v61, %v391_v43 }
 0x1e8   : > { %v3918_v8 = vmul.f32 %v1354_v31, %v3583_v32 }
 0x1e9   : > { %v591_v16 = vadd.f32 %v575_v49, %v491_v25  ;;  %v367_v46 = vpop.permute.xlu1 %366  ;;  %v761_v49 = vadd.s32 16, %v3523_v13  ;;  %v3928_v25 = vmul.f32 %v2948_v19, %v1355_v22  ;;  %v696_v19 = vmul.f32 %v3564_v59, %v3610_v56 }
 0x1ea   : > { %v392_v55 = vmul.f32 %v3540_v18, %v367_v46 }
 0x1eb   : > { %v691_v30 = vadd.f32 %v675_v12, %v591_v16  ;;  %v779_v32 = vsub.s32 %v761_v49, %v3713_v7  ;;  %v762_v16 = vadd.s32 24, %v3523_v13 }
 0x1ed   : > { %v723_v47 = vadd.f32 %v707_v57, %v691_v30  ;;  %v800_v30 = vsub.s32 0, %v779_v32  ;;  %v780_v57 = vsub.s32 %v762_v16, %v3713_v7 }
 0x1ee   : > { %v3909_v50 = vpop.permute.xlu1 %451 }
 0x1ef   : > { %v755_v10 = vadd.f32 %v739_v23, %v723_v47  ;;  %v476_v2 = vmul.f32 %v3548_v40, %v3909_v50  ;;  %v580_v23 = vadd.f32 %v564_v36, %v3618_v15 }
 0x1f1   : > { %v870_v43 = vsel %vm854_vm5, 0.0, %v755_v10  ;;  %v3915_v61 = vadd.f32 %v476_v2, %v392_v55  ;;  %v2484_v55 = vmin.u32 %v800_v30, %v779_v32  ;;  %v803_v2 = vsub.s32 0, %v780_v57 }
 0x1f2   : > { %v3922_v48 = vmul.f32 0.5, %v870_v43 }
 0x1f3   : > { %v372_v63 = vpop.permute.xlu1 %371  ;;  %1386 = vxpose.xlu1.b32.start [1/16] %v3918_v8, 128  ;;  %vm843_vm6 = vcmp.le.s32.totalorder %v2484_v55, 3  ;;  %v2485_v15 = vmin.u32 %v803_v2, %v780_v57 }
 0x1f4   : > { %902 = vst [vmem:[#allocation2 + $0x70] sm:$0xff] %v3922_v48  ;;  %v393_v28 = vmul.f32 %v3540_v18, %v372_v63 }
 0x1f5   : > { %vm844_vm7 = vcmp.le.s32.totalorder %v2485_v15, 3 }
 0x1f6   : > { %v3930_v12 = vadd.f32 %v477_v41, %v393_v28  ;;  %v697_v28 = vmul.f32 %v3564_v59, %v3635_v51 }
 0x1f7   : > { %1387 = vxpose.xlu1.b32.cont [2/16] %v3928_v25, 128 }
 0x1f8   : > { %v508_v46 = vpop.permute.xlu1 %507 }
 0x1f9   : > { %v565_v47 = vmul.f32 %v3564_v59, %v508_v46  ;;  %v764_v46 = vadd.s32 40, %v3523_v13 }
 0x1fb   : > { %v581_v41 = vadd.f32 %v565_v47, %v3650_v26  ;;  %v782_v57 = vsub.s32 %v764_v46, %v3713_v7 }
 0x1fd   : > { %v604_v31 = vpop.permute.xlu1 %603 }
 0x1fe   : > { %v664_v10 = vmul.f32 %v3757_v9, %v604_v31  ;;  %v728_v63 = vmul.f32 %v604_v31, %v3540_v18 }
 0x200   : > { %v680_v22 = vadd.f32 %v664_v10, %v580_v23  ;;  %v765_v10 = vadd.s32 48, %v3523_v13 }
 0x201   : > { %v608_v43 = vpop.permute.xlu1 %607 }
 0x202   : > { %v712_v20 = vadd.f32 %v696_v19, %v680_v22  ;;  %v665_v49 = vmul.f32 %v3757_v9, %v608_v43  ;;  %v729_v30 = vmul.f32 %v608_v43, %v3540_v18 }
 0x204   : > { %v744_v16 = vadd.f32 %v728_v63, %v712_v20  ;;  %v681_v32 = vadd.f32 %v665_v49, %v581_v41  ;;  %v809_v41 = vsub.s32 0, %v782_v57  ;;  %v783_v20 = vsub.s32 %v765_v10, %v3713_v7  ;;  %v2949_v63 = vld [vmem:[#allocation4 + $0x68] sm:$0xff] }
 0x205   : > { %v1358_v49 = vmul.f32 %v2949_v63, %v3842_v29 }
 0x206   : > { %v859_v36 = vsel %vm843_vm6, 0.0, %v744_v16  ;;  %v713_v56 = vadd.f32 %v697_v28, %v681_v32  ;;  %v516_v23 = vpop.permute.xlu1 %515  ;;  %v2487_v46 = vmin.u32 %v809_v41, %v782_v57  ;;  %v700_v57 = vmul.f32 %v3564_v59, %v3716_v5 }
 0x207   : > { %v875_v26 = vmul.f32 0.5, %v859_v36  ;;  %v567_v22 = vmul.f32 %v3564_v59, %v516_v23  ;;  %v812_v36 = vsub.s32 0, %v783_v20  ;;  %v3969_v29 = vmul.f32 %v2949_v63, %v1358_v49  ;;  %v4746_v63 = vld [vmem:[#allocation33_spill] sm:$0xff] }
 0x208   : > { %v745_v47 = vadd.f32 %v729_v30, %v713_v56  ;;  %v699_v56 = vmul.f32 %v3564_v59, %v3684_v37  ;;  %vm846_vm8 = vcmp.le.s32.totalorder %v2487_v46, 3  ;;  %v470_v5 = vmul.f32 %v3548_v40, %v3798_v3 }
 0x209   : > { %891 = vst [vmem:[#allocation2 + $0x58] sm:$0xff] %v875_v26  ;;  %v1356_v31 = vmul.f32 %v3668_v62, %v875_v26 }
 0x20a   : > { %v860_v51 = vsel %vm844_vm7, 0.0, %v745_v47  ;;  %v520_v55 = vpop.permute.xlu1 %519 }
 0x20b   : > { %v876_v2 = vmul.f32 0.5, %v860_v51  ;;  %v3953_v19 = vmul.f32 %v1356_v31, %v3668_v62  ;;  %v583_v62 = vadd.f32 %v567_v22, %v3697_v35  ;;  %v568_v16 = vmul.f32 %v3564_v59, %v520_v55 }
 0x20c   : > { %v2488_v31 = vmin.u32 %v812_v36, %v783_v20  ;;  %v767_v51 = vadd.s32 64, %v3523_v13  ;;  %v386_v36 = vmul.f32 %v3540_v18, %v3768_v11 }
 0x20d   : > { %892 = vst [vmem:[#allocation2 + $0x18] sm:$0xff] %v876_v2  ;;  %v1357_v43 = vmul.f32 %v3680_v4, %v876_v2  ;;  %1388 = vxpose.xlu1.b32.cont [3/16] %v3953_v19, 128 }
 0x20e   : > { %vm847_vm9 = vcmp.le.s32.totalorder %v2488_v31, 3  ;;  %v785_v49 = vsub.s32 %v767_v51, %v3713_v7  ;;  %v2950_v31 = vld [vmem:[#allocation4 + $0x38] sm:$0xff] }
 0x20f   : > { %v616_v15 = vpop.permute.xlu1 %615  ;;  %v3961_v28 = vmul.f32 %v1357_v43, %v3680_v4  ;;  %v584_v4 = vadd.f32 %v568_v16, %v3728_v45 }
 0x210   : > { %v667_v32 = vmul.f32 %v3757_v9, %v616_v15  ;;  %v731_v35 = vmul.f32 %v616_v15, %v3540_v18  ;;  %v768_v15 = vadd.s32 72, %v3523_v13 }
 0x211   : > { %1389 = vxpose.xlu1.b32.cont [4/16] %v3961_v28, 128 }
 0x212   : > { %v683_v30 = vadd.f32 %v667_v32, %v583_v62 }
 0x213   : > { %v620_v23 = vpop.permute.xlu1 %619 }
 0x214   : > { %v715_v26 = vadd.f32 %v699_v56, %v683_v30  ;;  %v668_v47 = vmul.f32 %v3757_v9, %v620_v23  ;;  %v732_v45 = vmul.f32 %v620_v23, %v3540_v18  ;;  %v4747_v30 = vld [vmem:[#allocation34_spill] sm:$0xff] }
 0x215   : > { %1390 = vxpose.xlu1.b32.cont [5/16] %v3969_v29, 128 }
 0x216   : > { %v747_v10 = vadd.f32 %v731_v35, %v715_v26  ;;  %v684_v37 = vadd.f32 %v668_v47, %v584_v4  ;;  %v818_v4 = vsub.s32 0, %v785_v49  ;;  %v786_v26 = vsub.s32 %v768_v15, %v3713_v7 }
 0x217   : > { %v471_v35 = vmul.f32 %v3548_v40, %v3839_v33  ;;  %v486_v47 = vadd.f32 %v470_v5, %v386_v36  ;;  %v770_v36 = vadd.s32 88, %v3523_v13 }
 0x218   : > { %v862_v55 = vsel %vm846_vm8, 0.0, %v747_v10  ;;  %v716_v2 = vadd.f32 %v700_v57, %v684_v37  ;;  %v528_v22 = vpop.permute.xlu1 %527  ;;  %v1361_v57 = vmul.f32 %v2950_v31, %v3851_v1  ;;  %v387_v37 = vmul.f32 %v3540_v18, %v3817_v38 }
 0x219   : > { %v878_v43 = vmul.f32 0.5, %v862_v55  ;;  %v570_v56 = vmul.f32 %v3564_v59, %v528_v22  ;;  %v821_v22 = vsub.s32 0, %v786_v26 }
 0x21a   : > { %v748_v41 = vadd.f32 %v732_v45, %v716_v2  ;;  %v2490_v45 = vmin.u32 %v818_v4, %v785_v49  ;;  %v487_v1 = vadd.f32 %v471_v35, %v387_v37  ;;  %v703_v49 = vmul.f32 %v3564_v59, %v3839_v33 }
 0x21b   : > { %894 = vst [vmem:[#allocation2 + $0x68] sm:$0xff] %v878_v43  ;;  %v1359_v20 = vmul.f32 %v4746_v63, %v878_v43  ;;  %v586_v51 = vadd.f32 %v570_v56, %v486_v47  ;;  %v702_v43 = vmul.f32 %v3564_v59, %v3798_v3  ;;  %v473_v33 = vmul.f32 %v3548_v40, %v3870_v52 }
 0x21c   : > { %v863_v62 = vsel %vm847_vm9, 0.0, %v748_v41  ;;  %v532_v16 = vpop.permute.xlu1 %531  ;;  %vm849_vm10 = vcmp.le.s32.totalorder %v2490_v45, 3 }
 0x21d   : > { %v879_v32 = vmul.f32 0.5, %v863_v62  ;;  %v3985_v46 = vmul.f32 %v1359_v20, %v4746_v63  ;;  %v571_v55 = vmul.f32 %v3564_v59, %v532_v16  ;;  %v4006_v20 = vmul.f32 %v2950_v31, %v1361_v57 }
 0x21e   : > { %v2491_v16 = vmin.u32 %v821_v22, %v786_v26  ;;  %v788_v31 = vsub.s32 %v770_v36, %v3713_v7  ;;  %v771_v57 = vadd.s32 96, %v3523_v13 }
 0x21f   : > { %895 = vst [vmem:[#allocation2 + $0x8] sm:$0xff] %v879_v32  ;;  %v1360_v23 = vmul.f32 %v4747_v30, %v879_v32  ;;  %1391 = vxpose.xlu1.b32.cont [6/16] %v3985_v46, 128  ;;  %v587_v15 = vadd.f32 %v571_v55, %v487_v1 }
 0x220   : > { %vm850_vm11 = vcmp.le.s32.totalorder %v2491_v16, 3  ;;  %v789_v1 = vsub.s32 %v771_v57, %v3713_v7 }
 0x221   : > { %v628_v10 = vpop.permute.xlu1 %627  ;;  %v3997_v11 = vmul.f32 %v1360_v23, %v4747_v30 }
 0x222   : > { %v670_v2 = vmul.f32 %v3757_v9, %v628_v10  ;;  %v734_v38 = vmul.f32 %v628_v10, %v3540_v18  ;;  %v830_v16 = vsub.s32 0, %v789_v1 }
 0x223   : > { %1392 = vxpose.xlu1.b32.cont [7/16] %v3997_v11, 128 }
 0x224   : > { %v686_v41 = vadd.f32 %v670_v2, %v586_v51  ;;  %v389_v2 = vmul.f32 %v3540_v18, %v3864_v17 }
 0x225   : > { %v632_v63 = vpop.permute.xlu1 %631 }
 0x226   : > { %v718_v5 = vadd.f32 %v702_v43, %v686_v41  ;;  %v671_v62 = vmul.f32 %v3757_v9, %v632_v63  ;;  %v735_v23 = vmul.f32 %v632_v63, %v3540_v18  ;;  %v827_v43 = vsub.s32 0, %v788_v31 }
 0x227   : > { %1393 = vxpose.xlu1.b32.cont [8/16] %v4006_v20, 128  ;;  %v489_v40 = vadd.f32 %v473_v33, %v389_v2 }
 0x228   : > { %v750_v32 = vadd.f32 %v734_v38, %v718_v5  ;;  %v687_v3 = vadd.f32 %v671_v62, %v587_v15  ;;  %v2493_v62 = vmin.u32 %v827_v43, %v788_v31 }
 0x22a   : > { %v865_v56 = vsel %vm849_vm10, 0.0, %v750_v32  ;;  %v719_v30 = vadd.f32 %v703_v49, %v687_v3  ;;  %v540_v4 = vpop.permute.xlu1 %539  ;;  %v705_v49 = vmul.f32 %v3564_v59, %v3870_v52  ;;  %vm852_vm12 = vcmp.le.s32.totalorder %v2493_v62, 3 }
 0x22b   : > { %v881_v35 = vmul.f32 0.5, %v865_v56  ;;  %v573_v45 = vmul.f32 %v3564_v59, %v540_v4  ;;  %v2494_v4 = vmin.u32 %v830_v16, %v789_v1  ;;  %v706_v52 = vmul.f32 %v3564_v59, %v3682_v42  ;;  %v656_v42 = vpop.permute.xlu0 %655 }
 0x22c   : > { %v751_v47 = vadd.f32 %v735_v23, %v719_v30  ;;  %v709_v16 = vmul.f32 %v3564_v59, %v3708_v27  ;;  %v708_v27 = vmul.f32 %v3564_v59, %v3909_v50 }
 0x22d   : > { %897 = vst [vmem:[#allocation2 + $0x40] sm:$0xff] %v881_v35  ;;  %v1362_v26 = vmul.f32 %v3831_v39, %v881_v35  ;;  %v589_v5 = vadd.f32 %v573_v45, %v489_v40  ;;  %vm853_vm13 = vcmp.le.s32.totalorder %v2494_v4, 3 }
 0x22e   : > { %v866_v10 = vsel %vm850_vm11, 0.0, %v751_v47  ;;  %v544_v37 = vpop.permute.xlu1 %543 }
 0x22f   : > { %v882_v51 = vmul.f32 0.5, %v866_v10  ;;  %v4021_v55 = vmul.f32 %v1362_v26, %v3831_v39  ;;  %v2951_v39 = vld [vmem:[#allocation4 + $0x70] sm:$0xff]  ;;  %v574_v17 = vmul.f32 %v3564_v59, %v544_v37  ;;  %v773_v26 = vadd.s32 112, %v3523_v13 }
 0x230   : > { %v1364_v15 = vmul.f32 %v2951_v39, %v3877_v34 }
 0x231   : > { %898 = vst [vmem:[#allocation2 + $0x20] sm:$0xff] %v882_v51  ;;  %v1363_v22 = vmul.f32 %v3845_v54, %v882_v51  ;;  %1394 = vxpose.xlu1.b32.cont [9/16] %v4021_v55, 128  ;;  %v590_v34 = vadd.f32 %v574_v17, %v3884_v0  ;;  %v791_v45 = vsub.s32 %v773_v26, %v3713_v7 }
 0x232   : > { %v4038_v36 = vmul.f32 %v2951_v39, %v1364_v15 }
 0x233   : > { %v640_v41 = vpop.permute.xlu1 %639  ;;  %v4030_v63 = vmul.f32 %v1363_v22, %v3845_v54  ;;  %v774_v54 = vadd.s32 120, %v3523_v13 }
 0x234   : > { %v673_v38 = vmul.f32 %v3757_v9, %v640_v41  ;;  %v737_v30 = vmul.f32 %v640_v41, %v3540_v18 }
 0x235   : > { %1395 = vxpose.xlu1.b32.cont [10/16] %v4030_v63, 128  ;;  %v792_v10 = vsub.s32 %v774_v54, %v3713_v7  ;;  %v836_v7 = vsub.s32 0, %v791_v45 }
 0x236   : > { %v689_v32 = vadd.f32 %v673_v38, %v589_v5  ;;  %v677_v5 = vmul.f32 %v3757_v9, %v656_v42 }
 0x237   : > { %v644_v3 = vpop.permute.xlu1 %643  ;;  %v839_v43 = vsub.s32 0, %v792_v10 }
 0x238   : > { %v721_v56 = vadd.f32 %v705_v49, %v689_v32  ;;  %v674_v23 = vmul.f32 %v3757_v9, %v644_v3  ;;  %v738_v0 = vmul.f32 %v644_v3, %v3540_v18  ;;  %v2952_v3 = vld [vmem:[#allocation4 + $0x30] sm:$0xff] }
 0x239   : > { %1396 = vxpose.xlu1.b32.cont [11/16] %v4038_v36, 128  ;;  %v2497_v62 = vmin.u32 %v839_v43, %v792_v10  ;;  %v1367_v54 = vmul.f32 %v2952_v3, %v3922_v48 }
 0x23a   : > { %v753_v35 = vadd.f32 %v737_v30, %v721_v56  ;;  %v690_v47 = vadd.f32 %v674_v23, %v590_v34  ;;  %v2496_v23 = vmin.u32 %v836_v7, %v791_v45 }
 0x23b   : > { %vm856_vm14 = vcmp.le.s32.totalorder %v2497_v62, 3 }
 0x23c   : > { %v868_v31 = vsel %vm852_vm12, 0.0, %v753_v35  ;;  %v722_v57 = vadd.f32 %v706_v52, %v690_v47  ;;  %v552_v33 = vpop.permute.xlu1 %551  ;;  %v4073_v52 = vmul.f32 %v2952_v3, %v1367_v54  ;;  %vm855_vm15 = vcmp.le.s32.totalorder %v2496_v23, 3  ;;  %v4754_v54 = vld [vmem:[#allocation30_spill] sm:$0xff] }
 0x23d   : > { %v884_v37 = vmul.f32 0.5, %v868_v31  ;;  %v576_v15 = vmul.f32 %v3564_v59, %v552_v33  ;;  %v4748_v33 = vld [vmem:[#allocation25_spill] sm:$0xff] }
 0x23e   : > { %v754_v51 = vadd.f32 %v738_v0, %v722_v57  ;;  %v1050_v0 = vpop.trf.xlu0 }
 0x23f   : > { %900 = vst [vmem:[#allocation2 + $0x38] sm:$0xff] %v884_v37  ;;  %v1365_v2 = vmul.f32 %v3872_v58, %v884_v37  ;;  %v592_v34 = vadd.f32 %v576_v15, %v3915_v61  ;;  %v1066_v10 = vadd.f32 %v1050_v0, %v4748_v33 }
 0x240   : > { %v869_v22 = vsel %vm853_vm13, 0.0, %v754_v51  ;;  %v556_v1 = vpop.permute.xlu1 %555 }
 0x241   : > { %v885_v40 = vmul.f32 0.5, %v869_v22  ;;  %v577_v41 = vmul.f32 %v3564_v59, %v556_v1  ;;  %v4054_v39 = vmul.f32 %v1365_v2, %v3872_v58  ;;  %v1082_v37 = vsub.f32 0.0, %v1066_v10  ;;  %v4749_v2 = vld [vmem:[#allocation21_spill] sm:$0xff]  ;;  %v4750_v22 = vld [vmem:[#allocation27_spill] sm:$0xff] }
 0x242   : > { %v1051_v51 = vpop.trf.xlu0  ;;  %v4759_v10 = vld [vmem:[#allocation35_spill] sm:$0xff] }
 0x243   : > { %901 = vst [vmem:[#allocation2 + $0x60] sm:$0xff] %v885_v40  ;;  %v1366_v17 = vmul.f32 %v3879_v44, %v885_v40  ;;  %v593_v38 = vadd.f32 %v577_v41, %v3930_v12  ;;  %1397 = vxpose.xlu1.b32.cont [12/16] %v4054_v39, 128  ;;  %v741_v12 = vmul.f32 %v656_v42, %v3540_v18  ;;  %1098 = vst [vmem:[#allocation3 + $0x28] sm:$0xff] %v1082_v37 }
 0x244   : > { %v1067_v45 = vadd.f32 %v1051_v51, %v4749_v2 }
 0x245   : > { %v693_v49 = vadd.f32 %v677_v5, %v593_v38  ;;  %v652_v32 = vpop.permute.xlu1 %651  ;;  %v4064_v58 = vmul.f32 %v1366_v17, %v3879_v44  ;;  %v4752_v17 = vld [vmem:[#allocation22_spill] sm:$0xff] }
 0x246   : > { %v676_v56 = vmul.f32 %v3757_v9, %v652_v32  ;;  %v740_v48 = vmul.f32 %v652_v32, %v3540_v18  ;;  %v1083_v42 = vsub.f32 0.0, %v1067_v45 }
 0x247   : > { %v725_v30 = vadd.f32 %v709_v16, %v693_v49  ;;  %1398 = vxpose.xlu1.b32.cont [13/16] %v4064_v58, 128  ;;  %v4753_v16 = vld [vmem:[#allocation29_spill] sm:$0xff] }
 0x248   : > { %v692_v4 = vadd.f32 %v676_v56, %v592_v34  ;;  %1099 = vst [vmem:[#allocation3 + $0x68] sm:$0xff] %v1083_v42 }
 0x249   : > { %v757_v44 = vadd.f32 %v741_v12, %v725_v30  ;;  %v4755_v30 = vld [vmem:[#allocation23_spill] sm:$0xff] }
 0x24a   : > { %v724_v35 = vadd.f32 %v708_v27, %v692_v4 }
 0x24b   : > { %v872_v61 = vsel %vm856_vm14, 0.0, %v757_v44  ;;  %1399 = vxpose.xlu1.b32.cont [14/16] %v4073_v52, 128  ;;  %v4756_v44 = vld [vmem:[#allocation31_spill] sm:$0xff] }
 0x24c   : > { %v888_v9 = vmul.f32 0.5, %v872_v61  ;;  %v756_v47 = vadd.f32 %v740_v48, %v724_v35 }
 0x24e   : > { %904 = vst [vmem:[#allocation2 + $0x28] sm:$0xff] %v888_v9  ;;  %v871_v26 = vsel %vm855_vm15, 0.0, %v756_v47  ;;  %v1369_v57 = vmul.f32 %v3891_v14, %v888_v9  ;;  %v4757_v9 = vld [vmem:[#allocation32_spill] sm:$0xff] }
 0x24f   : > { %v887_v31 = vmul.f32 0.5, %v871_v26 }
 0x250   : > { %v4084_v18 = vmul.f32 %v1369_v57, %v3891_v14  ;;  %v4751_v14 = vld [vmem:[#allocation28_spill] sm:$0xff] }
 0x251   : > { %903 = vst [vmem:[#allocation2 + $0x78] sm:$0xff] %v887_v31  ;;  %v1368_v59 = vmul.f32 %v3886_v53, %v887_v31 }
 0x253   : > { %v4079_v50 = vmul.f32 %v1368_v59, %v3886_v53  ;;  %v1052_v53 = vpop.trf.xlu0  ;;  %v4758_v59 = vld [vmem:[#allocation24_spill] sm:$0xff] }
 0x254   : > { %v1068_v43 = vadd.f32 %v1052_v53, %v4750_v22 }
 0x255   : > { %1400 = vxpose.xlu1.b32.cont [15/16] %v4079_v50, 128 }
 0x256   : > { %v1084_v1 = vsub.f32 0.0, %v1068_v43 }
 0x257   : > { %v1053_v40 = vpop.trf.xlu0 }
 0x258   : > { %1100 = vst [vmem:[#allocation3 + $0x10] sm:$0xff] %v1084_v1  ;;  %v1069_v41 = vadd.f32 %v1053_v40, %v4751_v14 }
 0x259   : > { %1401 = vxpose.xlu1.b32.end [16/16] %v4084_v18, 128 }
 0x25a   : > { %v1085_v15 = vsub.f32 0.0, %v1069_v41 }
 0x25b   : > { %v1054_v5 = vpop.trf.xlu0 }
 0x25c   : > { %1101 = vst [vmem:[#allocation3 + $0x40] sm:$0xff] %v1085_v15  ;;  %v1070_v38 = vadd.f32 %v1054_v5, %v4752_v17 }
 0x25e   : > { %v1086_v7 = vsub.f32 0.0, %v1070_v38 }
 0x25f   : > { %v1055_v62 = vpop.trf.xlu0 }
 0x260   : > { %1102 = vst [vmem:[#allocation3 + $0x48] sm:$0xff] %v1086_v7  ;;  %v1071_v49 = vadd.f32 %v1055_v62, %v4753_v16 }
 0x262   : > { %v1087_v32 = vsub.f32 0.0, %v1071_v49 }
 0x263   : > { %v1056_v3 = vpop.trf.xlu0 }
 0x264   : > { %1103 = vst [vmem:[#allocation3 + $0x30] sm:$0xff] %v1087_v32  ;;  %v1072_v34 = vadd.f32 %v1056_v3, %v4754_v54 }
 0x266   : > { %v1088_v56 = vsub.f32 0.0, %v1072_v34 }
 0x267   : > { %v1057_v12 = vpop.trf.xlu0 }
 0x268   : > { %1104 = vst [vmem:[#allocation3 + $0x70] sm:$0xff] %v1088_v56  ;;  %v1073_v23 = vadd.f32 %v1057_v12, %v4755_v30 }
 0x26a   : > { %v1089_v27 = vsub.f32 0.0, %v1073_v23 }
 0x26b   : > { %v1058_v4 = vpop.trf.xlu0 }
 0x26c   : > { %1105 = vst [vmem:[#allocation3 + $0x38] sm:$0xff] %v1089_v27  ;;  %v1074_v35 = vadd.f32 %v1058_v4, %v4756_v44 }
 0x26e   : > { %v1090_v48 = vsub.f32 0.0, %v1074_v35 }
 0x26f   : > { %v1059_v61 = vpop.trf.xlu0 }
 0x270   : > { %1106 = vst [vmem:[#allocation3 + $0x20] sm:$0xff] %v1090_v48  ;;  %v1075_v47 = vadd.f32 %v1059_v61, %v4757_v9 }
 0x272   : > { %v1091_v26 = vsub.f32 0.0, %v1075_v47 }
 0x273   : > { %v1060_v31 = vpop.trf.xlu0 }
 0x274   : > { %1107 = vst [vmem:[#allocation3 + $0x78] sm:$0xff] %v1091_v26  ;;  %v1076_v57 = vadd.f32 %v1060_v31, %v4758_v59 }
 0x276   : > { %v1092_v0 = vsub.f32 0.0, %v1076_v57 }
 0x277   : > { %v1061_v33 = vpop.trf.xlu0 }
 0x278   : > { %1108 = vst [vmem:[#allocation3 + $0x18] sm:$0xff] %v1092_v0  ;;  %v1077_v37 = vadd.f32 %v1061_v33, %v4759_v10 }
 0x27a   : > { %v1093_v51 = vsub.f32 0.0, %v1077_v37 }
 0x27b   : > { %v1062_v2 = vpop.trf.xlu0 }
 0x27c   : > { %1109 = vst [vmem:[#allocation3 + $0x58] sm:$0xff] %v1093_v51  ;;  %v1078_v45 = vadd.f32 %v1062_v2, %v3786_v60 }
 0x27e   : > { %v1094_v42 = vsub.f32 0.0, %v1078_v45 }
 0x27f   : > { %v1063_v53 = vpop.trf.xlu0 }
 0x280   : > { %1110 = vst [vmem:[#allocation3] sm:$0xff] %v1094_v42  ;;  %v1079_v22 = vadd.f32 %v1063_v53, %v3529_v21 }
 0x282   : > { %v1095_v43 = vsub.f32 0.0, %v1079_v22 }
 0x283   : > { %v1064_v1 = vpop.trf.xlu0 }
 0x284   : > { %1111 = vst [vmem:[#allocation3 + $0x8] sm:$0xff] %v1095_v43  ;;  %v1080_v40 = vadd.f32 %v1064_v1, %v3794_v24 }
 0x286   : > { %v1096_v14 = vsub.f32 0.0, %v1080_v40 }
 0x287   : > { %v1065_v41 = vpop.trf.xlu0 }
 0x288   : > { %1112 = vst [vmem:[#allocation3 + $0x60] sm:$0xff] %v1096_v14  ;;  %v1081_v15 = vadd.f32 %v1065_v41, %v3805_v6 }
 0x28a   : > { %v1097_v5 = vsub.f32 0.0, %v1081_v15 }
 0x28c   : > { %1113 = vst [vmem:[#allocation3 + $0x50] sm:$0xff] %v1097_v5 }
 0x299   : > { %v1402_v17 = vpop.trf.xlu1 }
 0x29a   : > { %v1418_v60 = vadd.f32 %v1402_v17, %v3918_v8 }
 0x29c   : > { %1434 = vadd.xlane.f32.xlu0 %v1418_v60 }
 0x29d   : > { %v1403_v38 = vpop.trf.xlu1 }
 0x29e   : > { %v1419_v7 = vadd.f32 %v1403_v38, %v3928_v25 }
 0x2a0   : > { %1436 = vadd.xlane.f32.xlu1 %v1419_v7 }
 0x2a1   : > { %v1404_v21 = vpop.trf.xlu1 }
 0x2a2   : > { %v1420_v62 = vadd.f32 %v1404_v21, %v3953_v19 }
 0x2a4   : > { %1438 = vadd.xlane.f32.xlu0 %v1420_v62 }
 0x2a5   : > { %v1405_v24 = vpop.trf.xlu1 }
 0x2a6   : > { %v1421_v16 = vadd.f32 %v1405_v24, %v3961_v28 }
 0x2a8   : > { %1440 = vadd.xlane.f32.xlu0 %v1421_v16 }
 0x2a9   : > { %v1406_v49 = vpop.trf.xlu1 }
 0x2aa   : > { %v1422_v6 = vadd.f32 %v1406_v49, %v3969_v29 }
 0x2ac   : > { %1442 = vadd.xlane.f32.xlu1 %v1422_v6 }
 0x2ad   : > { %v1407_v32 = vpop.trf.xlu1 }
 0x2ae   : > { %v1423_v8 = vadd.f32 %v1407_v32, %v3985_v46 }
 0x2b0   : > { %1444 = vadd.xlane.f32.xlu0 %v1423_v8 }
 0x2b1   : > { %v1408_v3 = vpop.trf.xlu1 }
 0x2b2   : > { %v1424_v25 = vadd.f32 %v1408_v3, %v3997_v11 }
 0x2b4   : > { %1446 = vadd.xlane.f32.xlu1 %v1424_v25 }
 0x2b5   : > { %v1409_v54 = vpop.trf.xlu1 }
 0x2b6   : > { %v1425_v19 = vadd.f32 %v1409_v54, %v4006_v20 }
 0x2b8   : > { %1448 = vadd.xlane.f32.xlu0 %v1425_v19 }
 0x2b9   : > { %v1410_v34 = vpop.trf.xlu1 }
 0x2ba   : > { %v1426_v28 = vadd.f32 %v1410_v34, %v4021_v55 }
 0x2bc   : > { %1450 = vadd.xlane.f32.xlu1 %v1426_v28 }
 0x2bd   : > { %v1411_v56 = vpop.trf.xlu1 }
 0x2be   : > { %v1427_v29 = vadd.f32 %v1411_v56, %v4030_v63 }
 0x2c0   : > { %1452 = vadd.xlane.f32.xlu0 %v1427_v29 }
 0x2c1   : > { %v1412_v12 = vpop.trf.xlu1 }
 0x2c2   : > { %v1428_v46 = vadd.f32 %v1412_v12, %v4038_v36 }
 0x2c4   : > { %1454 = vadd.xlane.f32.xlu1 %v1428_v46 }
 0x2c5   : > { %v1413_v30 = vpop.trf.xlu1 }
 0x2c6   : > { %v1429_v11 = vadd.f32 %v1413_v30, %v4054_v39 }
 0x2c8   : > { %1456 = vadd.xlane.f32.xlu0 %v1429_v11 }
 0x2c9   : > { %v1414_v23 = vpop.trf.xlu1 }
 0x2ca   : > { %v1430_v20 = vadd.f32 %v1414_v23, %v4064_v58 }
 0x2cc   : > { %1458 = vadd.xlane.f32.xlu1 %v1430_v20 }
 0x2cd   : > { %v1415_v27 = vpop.trf.xlu1 }
 0x2ce   : > { %v1431_v55 = vadd.f32 %v1415_v27, %v4073_v52  ;;  %v4130_v52 = vstv %s2476_s20 }
 0x2d0   : > { %1460 = vadd.xlane.f32.xlu0 %v1431_v55 }
 0x2d1   : > { %v1416_v4 = vpop.trf.xlu1 }
 0x2d2   : > { %v1432_v63 = vadd.f32 %v1416_v4, %v4079_v50 }
 0x2d4   : > { %1462 = vadd.xlane.f32.xlu1 %v1432_v63 }
 0x2d5   : > { %v1417_v44 = vpop.trf.xlu1 }
 0x2d6   : > { %v1433_v36 = vadd.f32 %v1417_v44, %v4084_v18 }
 0x2d8   : > { %1464 = vadd.xlane.f32.xlu0 %v1433_v36 }
 0x325   : > { %v1435_v39 = vpop.xlane.xlu0 %1434 }
 0x326   : > { %v2546_v58 = vadd.f32 -1.0, %v1435_v39 }
 0x328   : > { %1483 = vst.msk [vmem:[#allocation6] sm:$0xff] %vm1482_vm0, %v2546_v58  ;;  %v1499_v50 = vmax.f32 %v2546_v58, 0.0 }
 0x329   : > { %v1437_v18 = vpop.xlane.xlu1 %1436 }
 0x32a   : > { %v1516_v35 = vmul.f32 %v4130_v52, %v1499_v50  ;;  %v2547_v48 = vadd.f32 -1.0, %v1437_v18 }
 0x32c   : > { %1532 = vst.msk [vmem:[#allocation5] sm:$0xff] %vm1482_vm0, %v1516_v35  ;;  %1484 = vst.msk [vmem:[#allocation6 + $0x8] sm:$0xff] %vm1482_vm0, %v2547_v48  ;;  %v1500_v61 = vmax.f32 %v2547_v48, 0.0 }
 0x32d   : > { %v1439_v9 = vpop.xlane.xlu0 %1438 }
 0x32e   : > { %v1517_v47 = vmul.f32 %v4130_v52, %v1500_v61  ;;  %v2548_v26 = vadd.f32 -1.0, %v1439_v9 }
 0x330   : > { %1533 = vst.msk [vmem:[#allocation5 + $0x8] sm:$0xff] %vm1482_vm0, %v1517_v47  ;;  %1485 = vst.msk [vmem:[#allocation6 + $0x10] sm:$0xff] %vm1482_vm0, %v2548_v26  ;;  %v1501_v31 = vmax.f32 %v2548_v26, 0.0 }
 0x331   : > { %v1441_v59 = vpop.xlane.xlu0 %1440 }
 0x332   : > { %v1518_v57 = vmul.f32 %v4130_v52, %v1501_v31  ;;  %v2549_v0 = vadd.f32 -1.0, %v1441_v59 }
 0x334   : > { %1534 = vst.msk [vmem:[#allocation5 + $0x10] sm:$0xff] %vm1482_vm0, %v1518_v57  ;;  %1486 = vst.msk [vmem:[#allocation6 + $0x18] sm:$0xff] %vm1482_vm0, %v2549_v0  ;;  %v1502_v33 = vmax.f32 %v2549_v0, 0.0 }
 0x335   : > { %v1443_v10 = vpop.xlane.xlu1 %1442 }
 0x336   : > { %v1519_v37 = vmul.f32 %v4130_v52, %v1502_v33  ;;  %v2550_v51 = vadd.f32 -1.0, %v1443_v10 }
 0x338   : > { %1535 = vst.msk [vmem:[#allocation5 + $0x18] sm:$0xff] %vm1482_vm0, %v1519_v37  ;;  %1487 = vst.msk [vmem:[#allocation6 + $0x20] sm:$0xff] %vm1482_vm0, %v2550_v51  ;;  %v1503_v2 = vmax.f32 %v2550_v51, 0.0 }
 0x339   : > { %v1445_v45 = vpop.xlane.xlu0 %1444 }
 0x33a   : > { %v1520_v42 = vmul.f32 %v4130_v52, %v1503_v2  ;;  %v2551_v53 = vadd.f32 -1.0, %v1445_v45 }
 0x33c   : > { %1536 = vst.msk [vmem:[#allocation5 + $0x20] sm:$0xff] %vm1482_vm0, %v1520_v42  ;;  %1488 = vst.msk [vmem:[#allocation6 + $0x28] sm:$0xff] %vm1482_vm0, %v2551_v53  ;;  %v1504_v22 = vmax.f32 %v2551_v53, 0.0 }
 0x33d   : > { %v1447_v43 = vpop.xlane.xlu1 %1446 }
 0x33e   : > { %v1521_v1 = vmul.f32 %v4130_v52, %v1504_v22  ;;  %v2552_v40 = vadd.f32 -1.0, %v1447_v43 }
 0x340   : > { %1537 = vst.msk [vmem:[#allocation5 + $0x28] sm:$0xff] %vm1482_vm0, %v1521_v1  ;;  %1489 = vst.msk [vmem:[#allocation6 + $0x30] sm:$0xff] %vm1482_vm0, %v2552_v40  ;;  %v1505_v14 = vmax.f32 %v2552_v40, 0.0 }
 0x341   : > { %v1449_v41 = vpop.xlane.xlu0 %1448 }
 0x342   : > { %v1522_v15 = vmul.f32 %v4130_v52, %v1505_v14  ;;  %v2553_v5 = vadd.f32 -1.0, %v1449_v41 }
 0x344   : > { %1538 = vst.msk [vmem:[#allocation5 + $0x30] sm:$0xff] %vm1482_vm0, %v1522_v15  ;;  %1490 = vst.msk [vmem:[#allocation6 + $0x38] sm:$0xff] %vm1482_vm0, %v2553_v5  ;;  %v1506_v17 = vmax.f32 %v2553_v5, 0.0 }
 0x345   : > { %v1451_v60 = vpop.xlane.xlu1 %1450 }
 0x346   : > { %v1523_v38 = vmul.f32 %v4130_v52, %v1506_v17  ;;  %v2554_v7 = vadd.f32 -1.0, %v1451_v60 }
 0x348   : > { %1539 = vst.msk [vmem:[#allocation5 + $0x38] sm:$0xff] %vm1482_vm0, %v1523_v38  ;;  %1491 = vst.msk [vmem:[#allocation6 + $0x40] sm:$0xff] %vm1482_vm0, %v2554_v7  ;;  %v1507_v21 = vmax.f32 %v2554_v7, 0.0 }
 0x349   : > { %v1453_v62 = vpop.xlane.xlu0 %1452 }
 0x34a   : > { %v1524_v24 = vmul.f32 %v4130_v52, %v1507_v21  ;;  %v2555_v16 = vadd.f32 -1.0, %v1453_v62 }
 0x34c   : > { %1540 = vst.msk [vmem:[#allocation5 + $0x40] sm:$0xff] %vm1482_vm0, %v1524_v24  ;;  %1492 = vst.msk [vmem:[#allocation6 + $0x48] sm:$0xff] %vm1482_vm0, %v2555_v16  ;;  %v1508_v49 = vmax.f32 %v2555_v16, 0.0 }
 0x34d   : > { %v1455_v6 = vpop.xlane.xlu1 %1454 }
 0x34e   : > { %v1525_v32 = vmul.f32 %v4130_v52, %v1508_v49  ;;  %v2556_v8 = vadd.f32 -1.0, %v1455_v6 }
 0x350   : > { %1541 = vst.msk [vmem:[#allocation5 + $0x48] sm:$0xff] %vm1482_vm0, %v1525_v32  ;;  %1493 = vst.msk [vmem:[#allocation6 + $0x50] sm:$0xff] %vm1482_vm0, %v2556_v8  ;;  %v1509_v3 = vmax.f32 %v2556_v8, 0.0 }
 0x351   : > { %v1457_v25 = vpop.xlane.xlu0 %1456 }
 0x352   : > { %v1526_v54 = vmul.f32 %v4130_v52, %v1509_v3  ;;  %v2557_v19 = vadd.f32 -1.0, %v1457_v25 }
 0x354   : > { %1542 = vst.msk [vmem:[#allocation5 + $0x50] sm:$0xff] %vm1482_vm0, %v1526_v54  ;;  %1494 = vst.msk [vmem:[#allocation6 + $0x58] sm:$0xff] %vm1482_vm0, %v2557_v19  ;;  %v1510_v34 = vmax.f32 %v2557_v19, 0.0 }
 0x355   : > { %v1459_v28 = vpop.xlane.xlu1 %1458 }
 0x356   : > { %v1527_v56 = vmul.f32 %v4130_v52, %v1510_v34  ;;  %v2558_v29 = vadd.f32 -1.0, %v1459_v28 }
 0x358   : > { %1543 = vst.msk [vmem:[#allocation5 + $0x58] sm:$0xff] %vm1482_vm0, %v1527_v56  ;;  %1495 = vst.msk [vmem:[#allocation6 + $0x60] sm:$0xff] %vm1482_vm0, %v2558_v29  ;;  %v1511_v12 = vmax.f32 %v2558_v29, 0.0 }
 0x359   : > { %v1461_v46 = vpop.xlane.xlu0 %1460 }
 0x35a   : > { %v1528_v30 = vmul.f32 %v4130_v52, %v1511_v12  ;;  %v2559_v11 = vadd.f32 -1.0, %v1461_v46 }
 0x35c   : > { %1544 = vst.msk [vmem:[#allocation5 + $0x60] sm:$0xff] %vm1482_vm0, %v1528_v30  ;;  %1496 = vst.msk [vmem:[#allocation6 + $0x68] sm:$0xff] %vm1482_vm0, %v2559_v11  ;;  %v1512_v23 = vmax.f32 %v2559_v11, 0.0 }
 0x35d   : > { %v1463_v20 = vpop.xlane.xlu1 %1462 }
 0x35e   : > { %v1529_v27 = vmul.f32 %v4130_v52, %v1512_v23  ;;  %v2560_v55 = vadd.f32 -1.0, %v1463_v20 }
 0x360   : > { %1545 = vst.msk [vmem:[#allocation5 + $0x68] sm:$0xff] %vm1482_vm0, %v1529_v27  ;;  %1497 = vst.msk [vmem:[#allocation6 + $0x70] sm:$0xff] %vm1482_vm0, %v2560_v55  ;;  %v1513_v4 = vmax.f32 %v2560_v55, 0.0 }
 0x361   : > { %v1465_v63 = vpop.xlane.xlu0 %1464 }
 0x362   : > { %v1530_v44 = vmul.f32 %v4130_v52, %v1513_v4  ;;  %v2561_v36 = vadd.f32 -1.0, %v1465_v63 }
 0x364   : > { %1546 = vst.msk [vmem:[#allocation5 + $0x70] sm:$0xff] %vm1482_vm0, %v1530_v44  ;;  %1498 = vst.msk [vmem:[#allocation6 + $0x78] sm:$0xff] %vm1482_vm0, %v2561_v36  ;;  %v1514_v39 = vmax.f32 %v2561_v36, 0.0 }
 0x366   : > { %v1531_v58 = vmul.f32 %v4130_v52, %v1514_v39 }
 0x368   : > { %1547 = vst.msk [vmem:[#allocation5 + $0x78] sm:$0xff] %vm1482_vm0, %v1531_v58 }
 0x369 LB: >> { %v1588_v52 = vld [vmem:[#allocation6] sm:$0xff]  ;;  %v3167_v50 = vmov 0   ;;  %v1589_v35 = vld [vmem:[#allocation6 + $0x8] sm:$0xff]  ;;  %v1594_v9 = vld [vmem:[#allocation6 + $0x30] sm:$0xff]  ;;  %s2302_s28 = smul.f32 %s3152_s11, %s4126_s10   ;;  %s2594_s8 = sshll.u32 %s3156_s22, 7  ;;  %s3156_s22 = sphi %s4190_s22, %s1553_s22   ;;  %s3152_s11 = sphi %s4122_s11, %s4803_s11   ;;  %s3148_s17 = sphi %s4124_s17, %s4802_s17  }
 0x36a   : >> { %2953 = vset.pattern.permute.xlu0 %v3167_v50  ;;  %v2562_v18 = vmul.f32 -1.442695, %v1588_v52  ;;  %2954 = vset.pattern.permute.xlu1 %v3167_v50  ;;  %v2563_v48 = vmul.f32 -1.442695, %v1589_v35  ;;  %v1592_v61 = vld [vmem:[#allocation6 + $0x20] sm:$0xff]  ;;  %v1598_v57 = vld [vmem:[#allocation6 + $0x50] sm:$0xff]  ;;  %s1993_s30 = smul.f32 %s3152_s11, %s4120_s9  ;;  %s4530_s29 = scalar_lea.vmem %s4182_s27, %s2594_s8 [#allocation14] }
 0x36b   : >> { %v2566_v47 = vmul.f32 -1.442695, %v1592_v61  ;;  %v2568_v26 = vmul.f32 -1.442695, %v1594_v9  ;;  %v1596_v31 = vld [vmem:[#allocation6 + $0x40] sm:$0xff]  ;;  %v1590_v0 = vld [vmem:[#allocation6 + $0x10] sm:$0xff]  ;;  %s2303_s26 = smul.f32 %s3148_s17, %s4128_s19  }
 0x36c   : >> { %2955 = vpow2.f32 %v2562_v18  ;;  %v2570_v59 = vmul.f32 -1.442695, %v1596_v31  ;;  %v1591_v33 = vld [vmem:[#allocation6 + $0x18] sm:$0xff]  ;;  %v2564_v10 = vmul.f32 -1.442695, %v1590_v0  ;;  %v1600_v2 = vld [vmem:[#allocation6 + $0x60] sm:$0xff] }
 0x36d   : >> { %2957 = vpow2.f32 %v2563_v48  ;;  %v2565_v37 = vmul.f32 -1.442695, %v1591_v33  ;;  %v2572_v51 = vmul.f32 -1.442695, %v1598_v57  ;;  %v1593_v45 = vld [vmem:[#allocation6 + $0x28] sm:$0xff]  ;;  %v1595_v42 = vld [vmem:[#allocation6 + $0x38] sm:$0xff] }
 0x36e   : >> { %2959 = vpow2.f32 %v2566_v47  ;;  %v2567_v53 = vmul.f32 -1.442695, %v1593_v45  ;;  %v2569_v22 = vmul.f32 -1.442695, %v1595_v42  ;;  %v1597_v43 = vld [vmem:[#allocation6 + $0x48] sm:$0xff]  ;;  %v1602_v40 = vld [vmem:[#allocation6 + $0x70] sm:$0xff] }
 0x36f   : >> { %2961 = vpow2.f32 %v2568_v26  ;;  %v2574_v1 = vmul.f32 -1.442695, %v1600_v2  ;;  %v2571_v14 = vmul.f32 -1.442695, %v1597_v43  ;;  %v1599_v41 = vld [vmem:[#allocation6 + $0x58] sm:$0xff]  ;;  %v1601_v62 = vld [vmem:[#allocation6 + $0x68] sm:$0xff] }
 0x370   : >> { %2963 = vpow2.f32 %v2570_v59  ;;  %v2576_v60 = vmul.f32 -1.442695, %v1602_v40  ;;  %v2573_v21 = vmul.f32 -1.442695, %v1599_v41  ;;  %v2575_v49 = vmul.f32 -1.442695, %v1601_v62 }
 0x371   : >> { %2965 = vpow2.f32 %v2564_v10  ;;  %v1603_v32 = vld [vmem:[#allocation6 + $0x78] sm:$0xff]  ;;  %v1556_v28 = vld [vmem:[#allocation5] sm:$0xff]  ;;  %v1557_v11 = vld [vmem:[#allocation5 + $0x8] sm:$0xff]  ;;  %s1553_s22 = sadd.s32 1, %s3156_s22  }
 0x372   : >> { %2967 = vpow2.f32 %v2565_v37  ;;  %v2577_v19 = vmul.f32 -1.442695, %v1603_v32  ;;  %v1572_v23 = vmul.f32 2.0, %v1556_v28  ;;  %v1573_v4 = vmul.f32 2.0, %v1557_v11  ;;  %v1560_v36 = vld [vmem:[#allocation5 + $0x20] sm:$0xff]  ;;  %v4203_v18 = vld [vmem:[#allocation5 + $0x10] sm:$0xff] }
 0x373   : >> { %2969 = vpow2.f32 %v2567_v53  ;;  %4760 = vst [vmem:[#allocation36_spill] sm:$0xff] %v4203_v18  ;;  %v1576_v61 = vmul.f32 2.0, %v1560_v36  ;;  %v1562_v9 = vld [vmem:[#allocation5 + $0x30] sm:$0xff]  ;;  %v4208_v31 = vld [vmem:[#allocation5 + $0x18] sm:$0xff]  ;;  %v1574_v59 = vmul.f32 2.0, %v4203_v18  ;;  %v4215_v45 = vld [vmem:[#allocation5 + $0x28] sm:$0xff] }
 0x374   : >> { %2971 = vpow2.f32 %v2572_v51  ;;  %4761 = vst [vmem:[#allocation37_spill] sm:$0xff] %v4208_v31  ;;  %v1578_v0 = vmul.f32 2.0, %v1562_v9  ;;  %v1564_v51 = vld [vmem:[#allocation5 + $0x40] sm:$0xff]  ;;  %v1575_v2 = vmul.f32 2.0, %v4208_v31  ;;  %4762 = vst [vmem:[#allocation38_spill] sm:$0xff] %v4215_v45  ;;  %v1722_v31 = vld [vmem:[#allocation3 + $0x70] sm:$0xff] }
 0x375   : >> { %2973 = vpow2.f32 %v2569_v22  ;;  %v1580_v40 = vmul.f32 2.0, %v1564_v51  ;;  %v4259_v51 = vld [vmem:[#allocation4 + $0x8] sm:$0xff]  ;;  %v1724_v18 = vld [vmem:[#allocation3 + $0x20] sm:$0xff]  ;;  %v4780_v13 = vld [vmem:[#allocation26_spill] sm:$0xff]  ;;  %p1550_p3 = scmp.ge.s32.totalorder %s1553_s22, 4  }
 0x376   : >> { %2975 = vpow2.f32 %v2574_v1  ;;  %s2305_s5 = scalar_lea.sflag (%p1550_p3), [#allocation9], %s3346_s4 }
 0x377   : >> { %2977 = vpow2.f32 %v2571_v14  ;;  %v1577_v14 = vmul.f32 2.0, %v4215_v45  ;;  %v4348_v45 = vld [vmem:[#allocation4 + $0x50] sm:$0xff] }
 0x379   : >> { %v2956_v15 = vpop.eup %2955 }
 0x37a   : >> { %v2958_v5 = vpop.eup %2957  ;;  %v1652_v17 = vadd.f32 1.0, %v2956_v15 }
 0x37b   : >> { %v2960_v38 = vpop.eup %2959  ;;  %v1653_v7 = vadd.f32 1.0, %v2958_v5  ;;  %v1566_v5 = vld [vmem:[#allocation5 + $0x50] sm:$0xff] }
 0x37c   : >> { %v2962_v24 = vpop.eup %2961  ;;  %2979 = vrcp.f32 %v1652_v17  ;;  %v1656_v16 = vadd.f32 1.0, %v2960_v38 }
 0x37d   : >> { %2981 = vrcp.f32 %v1653_v7  ;;  %v1658_v6 = vadd.f32 1.0, %v2962_v24  ;;  %v2964_v8 = vpop.eup %2963 }
 0x37e   : >> { %2983 = vpow2.f32 %v2576_v60  ;;  %v2966_v3 = vpop.eup %2965  ;;  %v1660_v56 = vadd.f32 1.0, %v2964_v8  ;;  %v4222_v60 = vld [vmem:[#allocation5 + $0x38] sm:$0xff] }
 0x37f   : >> { %2985 = vpow2.f32 %v2573_v21  ;;  %v2968_v25 = vpop.eup %2967  ;;  %v1654_v54 = vadd.f32 1.0, %v2966_v3  ;;  %4763 = vst [vmem:[#allocation39_spill] sm:$0xff] %v4222_v60  ;;  %v1582_v21 = vmul.f32 2.0, %v1566_v5  ;;  %v1579_v62 = vmul.f32 2.0, %v4222_v60  ;;  %v4225_v3 = vld [vmem:[#allocation5 + $0x48] sm:$0xff]  ;;  %v4346_v60 = vld [vmem:[#allocation2 + $0x78] sm:$0xff] }
 0x380   : >> { %2987 = vrcp.f32 %v1656_v16  ;;  %v2970_v34 = vpop.eup %2969  ;;  %v1655_v29 = vadd.f32 1.0, %v2968_v25  ;;  %4764 = vst [vmem:[#allocation40_spill] sm:$0xff] %v4225_v3  ;;  %v1581_v28 = vmul.f32 2.0, %v4225_v3  ;;  %v4281_v5 = vld [vmem:[#allocation2 + $0x8] sm:$0xff] }
 0x381   : >> { %2989 = vpow2.f32 %v2575_v49  ;;  %v2972_v12 = vpop.eup %2971  ;;  %v1657_v46 = vadd.f32 1.0, %v2970_v34  ;;  %v1568_v49 = vld [vmem:[#allocation5 + $0x60] sm:$0xff]  ;;  %4770 = vst [vmem:[#allocation46_spill] sm:$0xff] %v4281_v5 }
 0x382   : >> { %2991 = vrcp.f32 %v1658_v6  ;;  %v2974_v30 = vpop.eup %2973  ;;  %v1662_v27 = vadd.f32 1.0, %v2972_v12  ;;  %v1584_v25 = vmul.f32 2.0, %v1568_v49  ;;  %v4228_v12 = vld [vmem:[#allocation5 + $0x58] sm:$0xff]  ;;  %v4295_v49 = vld [vmem:[#allocation2 + $0x20] sm:$0xff] }
 0x383   : >> { %2993 = vrcp.f32 %v1654_v54  ;;  %v2976_v20 = vpop.eup %2975  ;;  %v1659_v63 = vadd.f32 1.0, %v2974_v30  ;;  %4765 = vst [vmem:[#allocation41_spill] sm:$0xff] %v4228_v12  ;;  %4774 = vst [vmem:[#allocation50_spill] sm:$0xff] %v4295_v49 }
 0x384   : >> { %2995 = vrcp.f32 %v1655_v29  ;;  %v2978_v55 = vpop.eup %2977  ;;  %v1664_v50 = vadd.f32 1.0, %v2976_v20  ;;  %v1570_v29 = vld [vmem:[#allocation5 + $0x70] sm:$0xff]  ;;  %v1583_v20 = vmul.f32 2.0, %v4228_v12 }
 0x385   : >> { %2997 = vpow2.f32 %v2577_v19  ;;  %v1661_v47 = vadd.f32 1.0, %v2978_v55  ;;  %v1586_v11 = vmul.f32 2.0, %v1570_v29  ;;  %v4231_v55 = vld [vmem:[#allocation5 + $0x68] sm:$0xff] }
 0x386   : >> { %2999 = vrcp.f32 %v1660_v56  ;;  %4766 = vst [vmem:[#allocation42_spill] sm:$0xff] %v4231_v55 }
 0x387   : >> { %3001 = vrcp.f32 %v1657_v46 }
 0x388   : >> { %3003 = vrcp.f32 %v1662_v27 }
 0x389   : >> { %v2980_v44 = vpop.eup %2979  ;;  %3005 = vrcp.f32 %v1659_v63 }
 0x38a   : >> { %v2982_v39 = vpop.eup %2981  ;;  %v4201_v58 = vmul.f32 %v2980_v44, %v1572_v23  ;;  %3007 = vrcp.f32 %v1664_v50  ;;  %v1585_v44 = vmul.f32 2.0, %v4231_v55 }
 0x38b   : >> { %v2984_v52 = vpop.eup %2983  ;;  %v4206_v48 = vmul.f32 %v2982_v39, %v1573_v4  ;;  %3009 = vrcp.f32 %v1661_v47  ;;  %v4234_v39 = vld [vmem:[#allocation5 + $0x78] sm:$0xff] }
 0x38c   : >> { %v2986_v35 = vpop.eup %2985  ;;  %1734 = vperm.xlu0 %2953, %v4201_v58   ;;  %v1666_v33 = vadd.f32 1.0, %v2984_v52  ;;  %4767 = vst [vmem:[#allocation43_spill] sm:$0xff] %v4234_v39  ;;  %v1587_v50 = vmul.f32 2.0, %v4234_v39  ;;  %v4334_v39 = vstv %s1993_s30 }
 0x38d   : >> { %v2988_v26 = vpop.eup %2987  ;;  %v1663_v42 = vadd.f32 1.0, %v2986_v35 }
 0x38e   : >> { %v2990_v57 = vpop.eup %2989  ;;  %v4212_v37 = vmul.f32 %v2988_v26, %v1576_v61  ;;  %3011 = vrcp.f32 %v1666_v33 }
 0x38f   : >> { %v2992_v10 = vpop.eup %2991  ;;  %3013 = vrcp.f32 %v1663_v42  ;;  %v1665_v38 = vadd.f32 1.0, %v2990_v57  ;;  %v4263_v42 = vld [vmem:[#allocation4] sm:$0xff] }
 0x390   : >> { %1739 = vperm.xlu0 %2953, %v4206_v48   ;;  %v2994_v53 = vpop.eup %2993  ;;  %v1706_v15 = vmul.f32 %v2992_v10, %v1578_v0 }
 0x391   : >> { %v2996_v22 = vpop.eup %2995  ;;  %v4217_v43 = vmul.f32 %v2994_v53, %v1574_v59  ;;  %3015 = vrcp.f32 %v1665_v38  ;;  %v4265_v53 = vld [vmem:[#allocation2 + $0x58] sm:$0xff]  ;;  %v4285_v38 = vld [vmem:[#allocation2 + $0x48] sm:$0xff] }
 0x392   : >> { %v2998_v1 = vpop.eup %2997  ;;  %v1703_v17 = vmul.f32 %v2996_v22, %v1575_v2  ;;  %v4261_v2 = vld [vmem:[#allocation2] sm:$0xff]  ;;  %v4267_v22 = vld [vmem:[#allocation4 + $0x48] sm:$0xff]  ;;  %4771 = vst [vmem:[#allocation47_spill] sm:$0xff] %v4285_v38 }
 0x393   : >> { %v3000_v41 = vpop.eup %2999  ;;  %1744 = vperm.xlu1 %2954, %v4217_v43   ;;  %v1667_v32 = vadd.f32 1.0, %v2998_v1  ;;  %v4271_v1 = vld [vmem:[#allocation4 + $0x60] sm:$0xff] }
 0x394   : >> { %1754 = vperm.xlu0 %2953, %v4212_v37   ;;  %v3002_v7 = vpop.eup %3001  ;;  %v1708_v16 = vmul.f32 %v3000_v41, %v1580_v40  ;;  %v4273_v40 = vld [vmem:[#allocation2 + $0x50] sm:$0xff]  ;;  %v4277_v41 = vld [vmem:[#allocation2 + $0x68] sm:$0xff] }
 0x395   : >> { %v3004_v24 = vpop.eup %3003  ;;  %v1705_v6 = vmul.f32 %v3002_v7, %v1577_v14  ;;  %3017 = vrcp.f32 %v1667_v32  ;;  %4768 = vst [vmem:[#allocation44_spill] sm:$0xff] %v4273_v40  ;;  %v4275_v14 = vld [vmem:[#allocation4 + $0x68] sm:$0xff]  ;;  %4769 = vst [vmem:[#allocation45_spill] sm:$0xff] %v4277_v41  ;;  %v4287_v7 = vld [vmem:[#allocation4 + $0x38] sm:$0xff] }
 0x396   : >> { %v3006_v8 = vpop.eup %3005  ;;  %v1710_v19 = vmul.f32 %v3004_v24, %v1582_v21  ;;  %v1718_v21 = vld [vmem:[#allocation3 + $0x10] sm:$0xff]  ;;  %v4291_v24 = vld [vmem:[#allocation2 + $0x40] sm:$0xff]  ;;  %v1723_v32 = vld [vmem:[#allocation3 + $0x38] sm:$0xff]  ;;  %v1919_v55 = vmul.f32 %v4287_v7, %v4285_v38 }
 0x397   : >> { %1749 = vperm.xlu1 %2954, %v1703_v17   ;;  %v3008_v54 = vpop.eup %3007  ;;  %v1707_v34 = vmul.f32 %v3006_v8, %v1579_v62  ;;  %v1719_v62 = vld [vmem:[#allocation3 + $0x40] sm:$0xff]  ;;  %4772 = vst [vmem:[#allocation48_spill] sm:$0xff] %v4291_v24 }
 0x398   : >> { %1764 = vperm.xlu0 %2953, %v1706_v15   ;;  %v3010_v56 = vpop.eup %3009  ;;  %v1712_v30 = vmul.f32 %v3008_v54, %v1584_v25  ;;  %v4297_v25 = vld [vmem:[#allocation4 + $0x28] sm:$0xff]  ;;  %v4299_v54 = vld [vmem:[#allocation2 + $0x10] sm:$0xff] }
 0x399   : >> { %v1709_v23 = vmul.f32 %v3010_v56, %v1581_v28  ;;  %4775 = vst [vmem:[#allocation51_spill] sm:$0xff] %v4297_v25  ;;  %4776 = vst [vmem:[#allocation52_spill] sm:$0xff] %v4299_v54  ;;  %v1717_v28 = vld [vmem:[#allocation3 + $0x68] sm:$0xff]  ;;  %v4344_v3 = vmul.f32 %v4297_v25, %v4295_v49 }
 0x39b   : >> { %1759 = vperm.xlu1 %2954, %v1705_v6   ;;  %v3012_v46 = vpop.eup %3011  ;;  %4779 = vst [vmem:[#allocation55_spill] sm:$0xff] %v4344_v3 }
 0x39c   : >> { %1774 = vperm.xlu0 %2953, %v1708_v16   ;;  %v3014_v27 = vpop.eup %3013  ;;  %v1714_v4 = vmul.f32 %v3012_v46, %v1586_v11  ;;  %v4308_v46 = vstv %s3152_s11  ;;  %v1914_v11 = vmul.f32 %v4267_v22, %v4265_v53  ;;  %s4803_s11 = smov %s2302_s28 }
 0x39d   : >> { %v1711_v63 = vmul.f32 %v3014_v27, %v1583_v20  ;;  %v4316_v20 = vld [vmem:[#allocation4 + $0x20] sm:$0xff] }
 0x39e   : >> { %v3016_v36 = vpop.eup %3015  ;;  %v4318_v27 = vld [vmem:[#allocation2 + $0x60] sm:$0xff] }
 0x39f   : >> { %1769 = vperm.xlu1 %2954, %v1707_v34   ;;  %v1713_v52 = vmul.f32 %v3016_v36, %v1585_v44 }
 0x3a0   : >> { %1784 = vperm.xlu0 %2953, %v1710_v19  }
 0x3a2   : >> { %v3018_v35 = vpop.eup %3017 }
 0x3a3   : >> { %1779 = vperm.xlu1 %2954, %v1709_v23   ;;  %v1715_v61 = vmul.f32 %v3018_v35, %v1587_v50  ;;  %v4330_v50 = vld [vmem:[#allocation2 + $0x70] sm:$0xff] }
 0x3a4   : >> { %1794 = vperm.xlu0 %2953, %v1712_v30   ;;  %4778 = vst [vmem:[#allocation54_spill] sm:$0xff] %v4330_v50  ;;  %v4332_v35 = vld [vmem:[#allocation4 + $0x30] sm:$0xff] }
 0x3a7   : >> { %1789 = vperm.xlu1 %2954, %v1711_v63  }
 0x3a8   : >> { %1804 = vperm.xlu0 %2953, %v1714_v4  }
 0x3ab   : >> { %1799 = vperm.xlu1 %2954, %v1713_v52  }
 0x3af   : >> { %1809 = vperm.xlu1 %2954, %v1715_v61  }
 0x3c6   : >> { %1828 = vxpose.xlu0.b32.start [1/16] (narrow) %v4201_v58, 8 }
 0x3ca   : >> { %1829 = vxpose.xlu0.b32.cont [2/16] (narrow) %v4206_v48, 8 }
 0x3ce   : >> { %1830 = vxpose.xlu0.b32.cont [3/16] (narrow) %v4217_v43, 8  ;;  %v4269_v43 = vld [vmem:[#allocation2 + $0x18] sm:$0xff] }
 0x3d2   : >> { %1831 = vxpose.xlu0.b32.cont [4/16] (narrow) %v1703_v17, 8  ;;  %v4283_v17 = vld [vmem:[#allocation4 + $0x10] sm:$0xff] }
 0x3d3   : >> { %v1918_v36 = vmul.f32 %v4283_v17, %v4281_v5 }
 0x3d6   : >> { %1832 = vxpose.xlu0.b32.cont [5/16] (narrow) %v4212_v37, 8  ;;  %v4257_v37 = vld [vmem:[#allocation2 + $0x30] sm:$0xff] }
 0x3d7   : >> { %v1912_v29 = vmul.f32 %v4259_v51, %v4257_v37 }
 0x3da   : >> { %1833 = vxpose.xlu0.b32.cont [6/16] (narrow) %v1705_v6, 8  ;;  %v1721_v6 = vld [vmem:[#allocation3 + $0x30] sm:$0xff] }
 0x3de   : >> { %1834 = vxpose.xlu0.b32.cont [7/16] (narrow) %v1706_v15, 8  ;;  %v4279_v15 = vld [vmem:[#allocation4 + $0x18] sm:$0xff] }
 0x3df   : >> { %v1917_v44 = vmul.f32 %v4279_v15, %v4277_v41 }
 0x3e2   : >> { %1835 = vxpose.xlu0.b32.cont [8/16] (narrow) %v1707_v34, 8  ;;  %v1716_v34 = vld [vmem:[#allocation3 + $0x28] sm:$0xff] }
 0x3e6   : >> { %1836 = vxpose.xlu0.b32.cont [9/16] (narrow) %v1708_v16, 8  ;;  %v4293_v16 = vld [vmem:[#allocation4 + $0x40] sm:$0xff] }
 0x3e7   : >> { %4773 = vst [vmem:[#allocation49_spill] sm:$0xff] %v4293_v16  ;;  %v4340_v12 = vmul.f32 %v4293_v16, %v4291_v24 }
 0x3ea   : >> { %1837 = vxpose.xlu0.b32.cont [10/16] (narrow) %v1709_v23, 8  ;;  %v4314_v23 = vld [vmem:[#allocation2 + $0x38] sm:$0xff] }
 0x3eb   : >> { %4777 = vst [vmem:[#allocation53_spill] sm:$0xff] %v4314_v23  ;;  %v4356_v24 = vmul.f32 %v4316_v20, %v4314_v23 }
 0x3ee   : >> { %1838 = vxpose.xlu0.b32.cont [11/16] (narrow) %v1710_v19, 8  ;;  %v4301_v19 = vld [vmem:[#allocation4 + $0x70] sm:$0xff] }
 0x3ef   : >> { %v4352_v38 = vmul.f32 %v4301_v19, %v4299_v54  ;;  %v4781_v54 = vsub.s32 0, %v4780_v13 }
 0x3f2   : >> { %1839 = vxpose.xlu0.b32.cont [12/16] (narrow) %v1711_v63, 8  ;;  %v1916_v63 = vmul.f32 %v4275_v14, %v4273_v40  ;;  %v1725_v40 = vld [vmem:[#allocation3 + $0x78] sm:$0xff] }
 0x3f6   : >> { %1840 = vxpose.xlu0.b32.cont [13/16] (narrow) %v1712_v30, 8  ;;  %v1913_v30 = vmul.f32 %v4263_v42, %v4261_v2 }
 0x3fa   : >> { %1841 = vxpose.xlu0.b32.cont [14/16] (narrow) %v1713_v52, 8  ;;  %v4328_v52 = vld [vmem:[#allocation4 + $0x58] sm:$0xff] }
 0x3fb   : >> { %v4360_v3 = vmul.f32 %v4328_v52, %v4318_v27 }
 0x3fe   : >> { %1842 = vxpose.xlu0.b32.cont [15/16] (narrow) %v1714_v4, 8  ;;  %v1915_v4 = vmul.f32 %v4271_v1, %v4269_v43 }
 0x402   : >> { %1843 = vxpose.xlu0.b32.end [16/16] (narrow) %v1715_v61, 8  ;;  %v1720_v61 = vld [vmem:[#allocation3 + $0x48] sm:$0xff] }
 0x407   : >> { %v4243_v58 = vpop.permute.xlu0 %1734 }
 0x40b   : >> { %v4245_v48 = vpop.permute.xlu0 %1739 }
 0x40e   : >> { %v1745_v26 = vpop.permute.xlu1 %1744 }
 0x40f   : >> { %v4247_v9 = vpop.permute.xlu0 %1754  ;;  %v1814_v5 = vadd.f32 %v1745_v26, %v1718_v21  ;;  %v4364_v26 = vmul.f32 %v4332_v35, %v4330_v50  ;;  %v1813_v21 = vadd.f32 %v4245_v48, %v1717_v28 }
 0x412   : >> { %v1750_v57 = vpop.permute.xlu1 %1749 }
 0x413   : >> { %v4249_v47 = vpop.permute.xlu0 %1764  ;;  %v1815_v41 = vadd.f32 %v1750_v57, %v1719_v62  ;;  %v1812_v57 = vadd.f32 %v4243_v58, %v1716_v34 }
 0x416   : >> { %v1760_v33 = vpop.permute.xlu1 %1759 }
 0x417   : >> { %v4251_v59 = vpop.permute.xlu0 %1774  ;;  %v1817_v16 = vadd.f32 %v1760_v33, %v1721_v6  ;;  %v4374_v33 = vmul.f32 %v4348_v45, %v4346_v60  ;;  %v1816_v6 = vadd.f32 %v4247_v9, %v1720_v61 }
 0x41a   : >> { %v1770_v8 = vpop.permute.xlu1 %1769 }
 0x41b   : >> { %v4253_v0 = vpop.permute.xlu0 %1784  ;;  %v1819_v49 = vadd.f32 %v1770_v8, %v1723_v32  ;;  %v1818_v32 = vadd.f32 %v4249_v47, %v1722_v31  ;;  %v1820_v8 = vadd.f32 %v4251_v59, %v1724_v18 }
 0x41e   : >> { %v1780_v62 = vpop.permute.xlu1 %1779 }
 0x41f   : >> { %v4255_v10 = vpop.permute.xlu0 %1794  ;;  %v1821_v50 = vadd.f32 %v1780_v62, %v1725_v40 }
 0x422   : >> { %v4387_v62 = vpop.permute.xlu1 %1789 }
 0x423   : >> { %v4303_v56 = vpop.permute.xlu0 %1804 }
 0x442   : >> { %v1844_v25 = vpop.trf.xlu0 }
 0x443   : >> { %v4370_v23 = vrot.slane %v1844_v25, %v4781_v54 }
 0x445   : >> { %v1864_v58 = vadd.f32 %v4370_v23, %v1812_v57  ;;  %v1865_v48 = vadd.f32 %v4370_v23, %v1813_v21  ;;  %v1866_v34 = vadd.f32 %v4370_v23, %v1814_v5  ;;  %v1867_v25 = vadd.f32 %v4370_v23, %v1815_v41 }
 0x446   : >> { %v1868_v54 = vadd.f32 %v4370_v23, %v1816_v6  ;;  %v1869_v28 = vadd.f32 %v4370_v23, %v1817_v16  ;;  %v1870_v13 = vadd.f32 %v4370_v23, %v1818_v32  ;;  %v1871_v9 = vadd.f32 %v4370_v23, %v1819_v49 }
 0x447   : >> { %v1928_v31 = vmul.f32 %v1912_v29, %v1864_v58  ;;  %v1929_v47 = vmul.f32 %v1913_v30, %v1865_v48  ;;  %v1930_v18 = vmul.f32 %v1914_v11, %v1866_v34  ;;  %v1931_v59 = vmul.f32 %v1915_v4, %v1867_v25 }
 0x448   : >> { %v1932_v40 = vmul.f32 %v1916_v63, %v1868_v54  ;;  %v1933_v61 = vmul.f32 %v1917_v44, %v1869_v28  ;;  %v1934_v57 = vmul.f32 %v1918_v36, %v1870_v13  ;;  %v1935_v21 = vmul.f32 %v1919_v55, %v1871_v9 }
 0x449   : >> { %v1945_v41 = vmul.f32 %v4308_v46, %v1928_v31  ;;  %v1946_v5 = vmul.f32 %v4308_v46, %v1929_v47  ;;  %v1947_v16 = vmul.f32 %v4308_v46, %v1930_v18  ;;  %v1948_v6 = vmul.f32 %v4308_v46, %v1931_v59 }
 0x44a   : >> { %v1949_v49 = vmul.f32 %v4308_v46, %v1932_v40  ;;  %v1950_v29 = vmul.f32 %v4308_v46, %v1933_v61  ;;  %v1951_v30 = vmul.f32 %v4308_v46, %v1934_v57  ;;  %v1952_v11 = vmul.f32 %v4308_v46, %v1935_v21  ;;  %v1726_v61 = vld [vmem:[#allocation3 + $0x18] sm:$0xff]  ;;  %v1728_v57 = vld [vmem:[#allocation3] sm:$0xff] }
 0x44b   : >> { %v1961_v13 = vsub.f32 %v4259_v51, %v1945_v41  ;;  %v1962_v55 = vsub.f32 %v4263_v42, %v1946_v5  ;;  %v1963_v4 = vsub.f32 %v4267_v22, %v1947_v16  ;;  %v1964_v63 = vsub.f32 %v4271_v1, %v1948_v6  ;;  %v1800_v1 = vpop.permute.xlu1 %1799  ;;  %v1727_v6 = vld [vmem:[#allocation3 + $0x58] sm:$0xff] }
 0x44c   : >> { %v1965_v44 = vsub.f32 %v4275_v14, %v1949_v49  ;;  %v1966_v36 = vsub.f32 %v4279_v15, %v1950_v29  ;;  %v1967_v32 = vsub.f32 %v4283_v17, %v1951_v30  ;;  %v1968_v58 = vsub.f32 %v4287_v7, %v1952_v11  ;;  %v1729_v49 = vld [vmem:[#allocation3 + $0x8] sm:$0xff] }
 0x44d   : >> { %v1977_v48 = vand.u32 2147483647, %v1961_v13  ;;  %v1978_v34 = vand.u32 2147483647, %v1962_v55  ;;  %v1979_v25 = vand.u32 2147483647, %v1963_v4  ;;  %v4406_v54 = vadd.f32 %v4370_v23, %v1820_v8 }
 0x44e   : >> { %v1980_v51 = vand.u32 2147483647, %v1964_v63  ;;  %v1981_v42 = vand.u32 2147483647, %v1965_v44  ;;  %v1982_v28 = vand.u32 2147483647, %v1966_v36  ;;  %v1873_v22 = vadd.f32 %v4370_v23, %v1821_v50 }
 0x44f   : >> { %v1995_v14 = vsub.f32 %v1977_v48, %v4334_v39  ;;  %v1996_v15 = vsub.f32 %v1978_v34, %v4334_v39  ;;  %v1997_v17 = vsub.f32 %v1979_v25, %v4334_v39  ;;  %v1983_v9 = vand.u32 2147483647, %v1967_v32  ;;  %v4421_v36 = vld [vmem:[#allocation2 + $0x28] sm:$0xff]  ;;  %v4423_v32 = vld [vmem:[#allocation4 + $0x78] sm:$0xff]  ;;  %v1731_v48 = vld [vmem:[#allocation3 + $0x50] sm:$0xff]  ;;  %v1810_v34 = vpop.permute.xlu1 %1809 }
 0x450   : >> { %v1998_v7 = vsub.f32 %v1980_v51, %v4334_v39  ;;  %v1999_v31 = vsub.f32 %v1981_v42, %v4334_v39  ;;  %v2000_v8 = vsub.f32 %v1982_v28, %v4334_v39  ;;  %v1984_v47 = vand.u32 2147483647, %v1968_v58  ;;  %v1730_v58 = vld [vmem:[#allocation3 + $0x60] sm:$0xff] }
 0x451   : >> { %v2011_v18 = vmax.f32 %v1995_v14, 0.0  ;;  %v2012_v59 = vmax.f32 %v1996_v15, 0.0  ;;  %v2013_v40 = vmax.f32 %v1997_v17, 0.0  ;;  %v2001_v50 = vsub.f32 %v1983_v9, %v4334_v39 }
 0x452   : >> { %v2014_v21 = vmax.f32 %v1998_v7, 0.0  ;;  %v2015_v41 = vmax.f32 %v1999_v31, 0.0  ;;  %v2016_v5 = vmax.f32 %v2000_v8, 0.0  ;;  %v2002_v16 = vsub.f32 %v1984_v47, %v4334_v39  ;;  %v4782_v31 = vld [vmem:[#allocation44_spill] sm:$0xff]  ;;  %v4783_v47 = vld [vmem:[#allocation55_spill] sm:$0xff] }
 0x453   : >> { %v2027_v29 = vmin.f32 %v2011_v18, 1.0  ;;  %v2028_v30 = vmin.f32 %v2012_v59, 1.0  ;;  %v2029_v11 = vmin.f32 %v2013_v40, 1.0  ;;  %v2017_v13 = vmax.f32 %v2001_v50, 0.0 }
 0x454   : >> { %v2030_v55 = vmin.f32 %v2014_v21, 1.0  ;;  %v4417_v4 = vmin.f32 %v2015_v41, 1.0  ;;  %v4419_v63 = vmin.f32 %v2016_v5, 1.0  ;;  %v2018_v44 = vmax.f32 %v2002_v16, 0.0 }
 0x455   : >> { %v2059_v25 = vmul.f32 %v2027_v29, %v4257_v37  ;;  %2043 = vst [vmem:[#allocation4 + $0x8] sm:$0xff] %v2027_v29  ;;  %2044 = vst [vmem:[#allocation4] sm:$0xff] %v2028_v30  ;;  %v2060_v51 = vmul.f32 %v2028_v30, %v4261_v2  ;;  %v2061_v42 = vmul.f32 %v2029_v11, %v4265_v53  ;;  %v4428_v28 = vmin.f32 %v2017_v13, 1.0 }
 0x456   : >> { %2045 = vst [vmem:[#allocation4 + $0x48] sm:$0xff] %v2029_v11  ;;  %v1823_v14 = vadd.f32 %v4387_v62, %v1727_v6  ;;  %v1825_v15 = vadd.f32 %v1800_v1, %v1729_v49  ;;  %2046 = vst [vmem:[#allocation4 + $0x60] sm:$0xff] %v2030_v55  ;;  %v2062_v17 = vmul.f32 %v2030_v55, %v4269_v43  ;;  %v4434_v37 = vmin.f32 %v2018_v44, 1.0  ;;  %v4784_v6 = vld [vmem:[#allocation49_spill] sm:$0xff] }
 0x457   : >> { %2047 = vst [vmem:[#allocation4 + $0x68] sm:$0xff] %v4417_v4  ;;  %2048 = vst [vmem:[#allocation4 + $0x18] sm:$0xff] %v4419_v63  ;;  %v1822_v9 = vadd.f32 %v4253_v0, %v1726_v61  ;;  %v1824_v2 = vadd.f32 %v4255_v10, %v1728_v57  ;;  %v4438_v7 = vmul.f32 %v2059_v25, %v2027_v29  ;;  %v4785_v29 = vld [vmem:[#allocation51_spill] sm:$0xff] }
 0x458   : >> { %2049 = vst [vmem:[#allocation4 + $0x10] sm:$0xff] %v4428_v28  ;;  %v1927_v53 = vmul.f32 %v4423_v32, %v4421_v36  ;;  %v1826_v62 = vadd.f32 %v4303_v56, %v1730_v58  ;;  %v1827_v43 = vadd.f32 %v1810_v34, %v1731_v48  ;;  %v4444_v1 = vmul.f32 %v2060_v51, %v2028_v30 }
 0x459   : >> { %v2063_v8 = vmul.f32 %v4417_v4, %v4782_v31  ;;  %2050 = vst [vmem:[#allocation4 + $0x38] sm:$0xff] %v4434_v37  ;;  %2091 = vxpose.xlu1.b32.start [1/16] %v4438_v7, 128  ;;  %v4450_v0 = vmul.f32 %v2061_v42, %v2029_v11  ;;  %v1936_v10 = vmul.f32 %v4340_v12, %v4406_v54 }
 0x45a   : >> { %v1937_v18 = vmul.f32 %v4783_v47, %v1873_v22  ;;  %v1874_v59 = vadd.f32 %v4370_v23, %v1822_v9  ;;  %v4456_v56 = vmul.f32 %v2062_v17, %v2030_v55  ;;  %v1875_v40 = vadd.f32 %v4370_v23, %v1823_v14 }
 0x45b   : >> { %v1876_v50 = vadd.f32 %v4370_v23, %v1824_v2  ;;  %v1877_v61 = vadd.f32 %v4370_v23, %v1825_v15  ;;  %v1953_v57 = vmul.f32 %v4308_v46, %v1936_v10  ;;  %v1878_v12 = vadd.f32 %v4370_v23, %v1826_v62 }
 0x45c   : >> { %v1954_v21 = vmul.f32 %v4308_v46, %v1937_v18  ;;  %v1938_v41 = vmul.f32 %v4352_v38, %v1874_v59  ;;  %v1939_v54 = vmul.f32 %v4356_v24, %v1875_v40  ;;  %v1879_v16 = vadd.f32 %v4370_v23, %v1827_v43 }
 0x45d   : >> { %v1940_v22 = vmul.f32 %v4360_v3, %v1876_v50  ;;  %v1941_v5 = vmul.f32 %v4364_v26, %v1877_v61  ;;  %2092 = vxpose.xlu1.b32.cont [2/16] %v4444_v1, 128  ;;  %v1969_v49 = vsub.f32 %v4784_v6, %v1953_v57  ;;  %v1942_v38 = vmul.f32 %v4374_v33, %v1878_v12  ;;  %v4786_v57 = vld [vmem:[#allocation45_spill] sm:$0xff] }
 0x45e   : >> { %v1970_v30 = vsub.f32 %v4785_v29, %v1954_v21  ;;  %v1955_v11 = vmul.f32 %v4308_v46, %v1938_v41  ;;  %v1956_v13 = vmul.f32 %v4308_v46, %v1939_v54  ;;  %v1943_v55 = vmul.f32 %v1927_v53, %v1879_v16 }
 0x45f   : >> { %v1957_v24 = vmul.f32 %v4308_v46, %v1940_v22  ;;  %v1958_v3 = vmul.f32 %v4308_v46, %v1941_v5  ;;  %v1985_v26 = vand.u32 2147483647, %v1969_v49  ;;  %v1959_v58 = vmul.f32 %v4308_v46, %v1942_v38 }
 0x460   : >> { %v1986_v44 = vand.u32 2147483647, %v1970_v30  ;;  %v1971_v23 = vsub.f32 %v4301_v19, %v1955_v11  ;;  %v1972_v48 = vsub.f32 %v4316_v20, %v1956_v13  ;;  %v1960_v33 = vmul.f32 %v4308_v46, %v1943_v55  ;;  %v4788_v30 = vld [vmem:[#allocation47_spill] sm:$0xff]  ;;  %v4789_v13 = vld [vmem:[#allocation48_spill] sm:$0xff]  ;;  %v4790_v55 = vld [vmem:[#allocation50_spill] sm:$0xff] }
 0x461   : >> { %v1973_v34 = vsub.f32 %v4328_v52, %v1957_v24  ;;  %v1974_v25 = vsub.f32 %v4332_v35, %v1958_v3  ;;  %2093 = vxpose.xlu1.b32.cont [3/16] %v4450_v0, 128  ;;  %v2003_v51 = vsub.f32 %v1985_v26, %v4334_v39  ;;  %v1975_v15 = vsub.f32 %v4348_v45, %v1959_v58 }
 0x462   : >> { %v2004_v42 = vsub.f32 %v1986_v44, %v4334_v39  ;;  %v1987_v14 = vand.u32 2147483647, %v1971_v23  ;;  %v1988_v19 = vand.u32 2147483647, %v1972_v48  ;;  %v1976_v20 = vsub.f32 %v4423_v32, %v1960_v33  ;;  %v4791_v44 = vld [vmem:[#allocation52_spill] sm:$0xff]  ;;  %v4792_v48 = vld [vmem:[#allocation53_spill] sm:$0xff] }
 0x463   : >> { %v1989_v17 = vand.u32 2147483647, %v1973_v34  ;;  %v1990_v9 = vand.u32 2147483647, %v1974_v25  ;;  %v2019_v2 = vmax.f32 %v2003_v51, 0.0  ;;  %v4496_v61 = vmul.f32 %v2063_v8, %v4417_v4  ;;  %v4787_v8 = vld [vmem:[#allocation46_spill] sm:$0xff] }
 0x464   : >> { %v2020_v52 = vmax.f32 %v2004_v42, 0.0  ;;  %v2005_v35 = vsub.f32 %v1987_v14, %v4334_v39  ;;  %v1991_v53 = vand.u32 2147483647, %v1975_v15  ;;  %v2006_v46 = vsub.f32 %v1988_v19, %v4334_v39  ;;  %v4793_v33 = vld [vmem:[#allocation54_spill] sm:$0xff] }
 0x465   : >> { %v2007_v62 = vsub.f32 %v1989_v17, %v4334_v39  ;;  %v2008_v43 = vsub.f32 %v1990_v9, %v4334_v39  ;;  %v1992_v31 = vand.u32 2147483647, %v1976_v20  ;;  %2094 = vxpose.xlu1.b32.cont [4/16] %v4456_v56, 128  ;;  %v2035_v45 = vmin.f32 %v2019_v2, 1.0 }
 0x466   : >> { %v2036_v10 = vmin.f32 %v2020_v52, 1.0  ;;  %v2021_v47 = vmax.f32 %v2005_v35, 0.0  ;;  %v2009_v18 = vsub.f32 %v1991_v53, %v4334_v39  ;;  %v2022_v32 = vmax.f32 %v2006_v46, 0.0 }
 0x467   : >> { %v2023_v59 = vmax.f32 %v2007_v62, 0.0  ;;  %v2024_v40 = vmax.f32 %v2008_v43, 0.0  ;;  %v2010_v50 = vsub.f32 %v1992_v31, %v4334_v39  ;;  %v2064_v21 = vmul.f32 %v4419_v63, %v4786_v57  ;;  %2051 = vst [vmem:[#allocation4 + $0x40] sm:$0xff] %v2035_v45 }
 0x468   : >> { %2052 = vst [vmem:[#allocation4 + $0x28] sm:$0xff] %v2036_v10  ;;  %v2037_v41 = vmin.f32 %v2021_v47, 1.0  ;;  %v2025_v12 = vmax.f32 %v2009_v18, 0.0  ;;  %v2038_v54 = vmin.f32 %v2022_v32, 1.0  ;;  %v2065_v49 = vmul.f32 %v4428_v28, %v4787_v8 }
 0x469   : >> { %v2039_v22 = vmin.f32 %v2023_v59, 1.0  ;;  %v2040_v5 = vmin.f32 %v2024_v40, 1.0  ;;  %v2026_v16 = vmax.f32 %v2010_v50, 0.0  ;;  %2095 = vxpose.xlu1.b32.cont [5/16] %v4496_v61, 128  ;;  %v2080_v4 = vmul.f32 %v2064_v21, %v4419_v63 }
 0x46a   : >> { %2053 = vst [vmem:[#allocation4 + $0x70] sm:$0xff] %v2037_v41  ;;  %v2041_v6 = vmin.f32 %v2025_v12, 1.0  ;;  %2054 = vst [vmem:[#allocation4 + $0x20] sm:$0xff] %v2038_v54  ;;  %v2081_v29 = vmul.f32 %v2065_v49, %v4428_v28  ;;  %v2066_v11 = vmul.f32 %v4434_v37, %v4788_v30  ;;  %v2067_v24 = vmul.f32 %v2035_v45, %v4789_v13 }
 0x46b   : >> { %2055 = vst [vmem:[#allocation4 + $0x58] sm:$0xff] %v2039_v22  ;;  %2056 = vst [vmem:[#allocation4 + $0x30] sm:$0xff] %v2040_v5  ;;  %v2042_v39 = vmin.f32 %v2026_v16, 1.0  ;;  %v2068_v63 = vmul.f32 %v2036_v10, %v4790_v55  ;;  %v2069_v23 = vmul.f32 %v2037_v41, %v4791_v44  ;;  %v2070_v28 = vmul.f32 %v2038_v54, %v4792_v48 }
 0x46c   : >> { %2057 = vst [vmem:[#allocation4 + $0x50] sm:$0xff] %v2041_v6  ;;  %v2082_v38 = vmul.f32 %v2066_v11, %v4434_v37  ;;  %v2083_v3 = vmul.f32 %v2067_v24, %v2035_v45  ;;  %v2071_v37 = vmul.f32 %v2039_v22, %v4318_v27  ;;  %v2072_v51 = vmul.f32 %v2040_v5, %v4793_v33  ;;  %v4795_v33 = vld [vmem:[#allocation37_spill] sm:$0xff] }
 0x46d   : >> { %2058 = vst [vmem:[#allocation4 + $0x78] sm:$0xff] %v2042_v39  ;;  %2096 = vxpose.xlu1.b32.cont [6/16] %v2080_v4, 128  ;;  %v2084_v26 = vmul.f32 %v2068_v63, %v2036_v10  ;;  %v2085_v58 = vmul.f32 %v2069_v23, %v2037_v41  ;;  %v2086_v34 = vmul.f32 %v2070_v28, %v2038_v54 }
 0x46e   : >> { %v4513_v25 = vmul.f32 %v2071_v37, %v2039_v22  ;;  %v4517_v42 = vmul.f32 %v2072_v51, %v2040_v5  ;;  %v2073_v14 = vmul.f32 %v2041_v6, %v4346_v60  ;;  %v2074_v19 = vmul.f32 %v2042_v39, %v4421_v36 }
 0x470   : >> { %v4521_v15 = vmul.f32 %v2073_v14, %v2041_v6  ;;  %v4525_v27 = vmul.f32 %v2074_v19, %v2042_v39  ;;  %v4560_v6 = vstv %s3148_s17  ;;  %v2207_v14 = vld [vmem:[#allocation5 + $0x20] sm:$0xff]  ;;  %s4802_s17 = smov %s2303_s26 }
 0x471   : >> { %2097 = vxpose.xlu1.b32.cont [7/16] %v2081_v29, 128 }
 0x475   : >> { %2098 = vxpose.xlu1.b32.cont [8/16] %v2082_v38, 128 }
 0x479   : >> { %2099 = vxpose.xlu1.b32.cont [9/16] %v2083_v3, 128 }
 0x47d   : >> { %2100 = vxpose.xlu1.b32.cont [10/16] %v2084_v26, 128 }
 0x481   : >> { %2101 = vxpose.xlu1.b32.cont [11/16] %v2085_v58, 128 }
 0x485   : >> { %2102 = vxpose.xlu1.b32.cont [12/16] %v2086_v34, 128 }
 0x489   : >> { %2103 = vxpose.xlu1.b32.cont [13/16] %v4513_v25, 128 }
 0x48d   : >> { %2104 = vxpose.xlu1.b32.cont [14/16] %v4517_v42, 128 }
 0x491   : >> { %2105 = vxpose.xlu1.b32.cont [15/16] %v4521_v15, 128 }
 0x495   : >> { %2106 = vxpose.xlu1.b32.end [16/16] %v4525_v27, 128 }
 0x4d5   : >> { %v2107_v60 = vpop.trf.xlu1 }
 0x4d6   : >> { %v2123_v17 = vadd.f32 %v2107_v60, %v4438_v7 }
 0x4d8   : >> { %2286 = vst [vmem:[%s4530_s29] sm:$0xff] %v2123_v17  ;;  %2139 = vadd.xlane.f32.xlu0 %v2123_v17 }
 0x4d9   : >> { %v2108_v36 = vpop.trf.xlu1 }
 0x4da   : >> { %v2124_v9 = vadd.f32 %v2108_v36, %v4444_v1 }
 0x4dc   : >> { %2287 = vst [vmem:[%s4530_s29 + $0x8] sm:$0xff] %v2124_v9  ;;  %2141 = vadd.xlane.f32.xlu1 %v2124_v9 }
 0x4dd   : >> { %v2109_v20 = vpop.trf.xlu1 }
 0x4de   : >> { %v2125_v2 = vadd.f32 %v2109_v20, %v4450_v0 }
 0x4e0   : >> { %2288 = vst [vmem:[%s4530_s29 + $0x10] sm:$0xff] %v2125_v2  ;;  %2143 = vadd.xlane.f32.xlu0 %v2125_v2  ;;  %v4796_v2 = vld [vmem:[#allocation38_spill] sm:$0xff] }
 0x4e1   : >> { %v2110_v52 = vpop.trf.xlu1 }
 0x4e2   : >> { %v2126_v7 = vadd.f32 %v2110_v52, %v4456_v56 }
 0x4e4   : >> { %2289 = vst [vmem:[%s4530_s29 + $0x18] sm:$0xff] %v2126_v7  ;;  %2145 = vadd.xlane.f32.xlu0 %v2126_v7 }
 0x4e5   : >> { %v2111_v35 = vpop.trf.xlu1 }
 0x4e6   : >> { %v2127_v1 = vadd.f32 %v2111_v35, %v4496_v61  ;;  %v2209_v35 = vld [vmem:[#allocation5 + $0x30] sm:$0xff] }
 0x4e8   : >> { %2290 = vst [vmem:[%s4530_s29 + $0x20] sm:$0xff] %v2127_v1  ;;  %2147 = vadd.xlane.f32.xlu1 %v2127_v1 }
 0x4e9   : >> { %v2112_v53 = vpop.trf.xlu1 }
 0x4ea   : >> { %v2128_v46 = vadd.f32 %v2112_v53, %v2080_v4  ;;  %v2203_v4 = vld [vmem:[#allocation5] sm:$0xff] }
 0x4ec   : >> { %2291 = vst [vmem:[%s4530_s29 + $0x28] sm:$0xff] %v2128_v46  ;;  %2149 = vadd.xlane.f32.xlu0 %v2128_v46 }
 0x4ed   : >> { %v2113_v0 = vpop.trf.xlu1 }
 0x4ee   : >> { %v2129_v62 = vadd.f32 %v2113_v0, %v2081_v29 }
 0x4f0   : >> { %2292 = vst [vmem:[%s4530_s29 + $0x30] sm:$0xff] %v2129_v62  ;;  %2151 = vadd.xlane.f32.xlu1 %v2129_v62 }
 0x4f1   : >> { %v2114_v56 = vpop.trf.xlu1 }
 0x4f2   : >> { %v2130_v43 = vadd.f32 %v2114_v56, %v2082_v38  ;;  %v2204_v38 = vld [vmem:[#allocation5 + $0x8] sm:$0xff] }
 0x4f4   : >> { %2293 = vst [vmem:[%s4530_s29 + $0x38] sm:$0xff] %v2130_v43  ;;  %2153 = vadd.xlane.f32.xlu0 %v2130_v43 }
 0x4f5   : >> { %v2115_v31 = vpop.trf.xlu1 }
 0x4f6   : >> { %v2131_v45 = vadd.f32 %v2115_v31, %v2083_v3 }
 0x4f8   : >> { %2294 = vst [vmem:[%s4530_s29 + $0x40] sm:$0xff] %v2131_v45  ;;  %2155 = vadd.xlane.f32.xlu1 %v2131_v45  ;;  %v4797_v45 = vld [vmem:[#allocation39_spill] sm:$0xff] }
 0x4f9   : >> { %v2116_v10 = vpop.trf.xlu1 }
 0x4fa   : >> { %v2132_v47 = vadd.f32 %v2116_v10, %v2084_v26 }
 0x4fc   : >> { %2295 = vst [vmem:[%s4530_s29 + $0x48] sm:$0xff] %v2132_v47  ;;  %2157 = vadd.xlane.f32.xlu0 %v2132_v47 }
 0x4fd   : >> { %v2117_v18 = vpop.trf.xlu1 }
 0x4fe   : >> { %v2133_v32 = vadd.f32 %v2117_v18, %v2085_v58  ;;  %v4794_v58 = vld [vmem:[#allocation36_spill] sm:$0xff] }
 0x4ff   : >> { %v2211_v18 = vld [vmem:[#allocation5 + $0x40] sm:$0xff] }
 0x500   : >> { %2296 = vst [vmem:[%s4530_s29 + $0x50] sm:$0xff] %v2133_v32  ;;  %2159 = vadd.xlane.f32.xlu1 %v2133_v32 }
 0x501   : >> { %v2118_v59 = vpop.trf.xlu1 }
 0x502   : >> { %v2134_v40 = vadd.f32 %v2118_v59, %v2086_v34 }
 0x504   : >> { %2297 = vst [vmem:[%s4530_s29 + $0x58] sm:$0xff] %v2134_v40  ;;  %2161 = vadd.xlane.f32.xlu0 %v2134_v40 }
 0x505   : >> { %v2119_v50 = vpop.trf.xlu1 }
 0x506   : >> { %v2135_v61 = vadd.f32 %v2119_v50, %v4513_v25 }
 0x508   : >> { %2298 = vst [vmem:[%s4530_s29 + $0x60] sm:$0xff] %v2135_v61  ;;  %2163 = vadd.xlane.f32.xlu1 %v2135_v61 }
 0x509   : >> { %v2120_v57 = vpop.trf.xlu1 }
 0x50a   : >> { %v2136_v21 = vadd.f32 %v2120_v57, %v4517_v42 }
 0x50c   : >> { %2299 = vst [vmem:[%s4530_s29 + $0x68] sm:$0xff] %v2136_v21  ;;  %2165 = vadd.xlane.f32.xlu0 %v2136_v21 }
 0x50d   : >> { %v2121_v41 = vpop.trf.xlu1 }
 0x50e   : >> { %v2137_v12 = vadd.f32 %v2121_v41, %v4521_v15 }
 0x510   : >> { %2300 = vst [vmem:[%s4530_s29 + $0x70] sm:$0xff] %v2137_v12  ;;  %2167 = vadd.xlane.f32.xlu1 %v2137_v12  ;;  %v4798_v12 = vld [vmem:[#allocation40_spill] sm:$0xff] }
 0x511   : >> { %v2122_v54 = vpop.trf.xlu1 }
 0x512   : >> { %v2138_v22 = vadd.f32 %v2122_v54, %v4525_v27 }
 0x514   : >> { %2301 = vst [vmem:[%s4530_s29 + $0x78] sm:$0xff] %v2138_v22  ;;  %2169 = vadd.xlane.f32.xlu0 %v2138_v22 }
 0x561   : >> { %v2140_v5 = vpop.xlane.xlu0 %2139 }
 0x562   : >> { %v2578_v16 = vadd.f32 -1.0, %v2140_v5  ;;  %v2213_v5 = vld [vmem:[#allocation5 + $0x50] sm:$0xff] }
 0x564   : >> { %2187 = vst.msk [vmem:[#allocation6] sm:$0xff] %vm1482_vm0, %v2578_v16  ;;  %v2219_v39 = vmax.f32 %v2578_v16, 0.0 }
 0x565   : >> { %v2142_v8 = vpop.xlane.xlu1 %2141 }
 0x566   : >> { %v2236_v49 = vmul.f32 %v4560_v6, %v2219_v39  ;;  %v2579_v29 = vadd.f32 -1.0, %v2142_v8 }
 0x568   : >> { %v2252_v30 = vadd.f32 %v2236_v49, %v2203_v4  ;;  %2188 = vst.msk [vmem:[#allocation6 + $0x8] sm:$0xff] %vm1482_vm0, %v2579_v29  ;;  %v2220_v11 = vmax.f32 %v2579_v29, 0.0 }
 0x569   : >> { %v2144_v13 = vpop.xlane.xlu0 %2143 }
 0x56a   : >> { %2268 = vst.msk [vmem:[#allocation5] sm:$0xff] %vm1482_vm0, %v2252_v30  ;;  %v2237_v24 = vmul.f32 %v4560_v6, %v2220_v11  ;;  %v2580_v3 = vadd.f32 -1.0, %v2144_v13 }
 0x56c   : >> { %v2253_v55 = vadd.f32 %v2237_v24, %v2204_v38  ;;  %2189 = vst.msk [vmem:[#allocation6 + $0x10] sm:$0xff] %vm1482_vm0, %v2580_v3  ;;  %v2221_v63 = vmax.f32 %v2580_v3, 0.0  ;;  %v4799_v38 = vld [vmem:[#allocation41_spill] sm:$0xff]  ;;  %v2215_v3 = vld [vmem:[#allocation5 + $0x60] sm:$0xff] }
 0x56d   : >> { %v2146_v26 = vpop.xlane.xlu0 %2145 }
 0x56e   : >> { %2269 = vst.msk [vmem:[#allocation5 + $0x8] sm:$0xff] %vm1482_vm0, %v2253_v55  ;;  %v2238_v44 = vmul.f32 %v4560_v6, %v2221_v63  ;;  %v2581_v23 = vadd.f32 -1.0, %v2146_v26 }
 0x570   : >> { %v2254_v48 = vadd.f32 %v2238_v44, %v4794_v58  ;;  %2190 = vst.msk [vmem:[#allocation6 + $0x18] sm:$0xff] %vm1482_vm0, %v2581_v23  ;;  %v2222_v28 = vmax.f32 %v2581_v23, 0.0 }
 0x571   : >> { %v2148_v34 = vpop.xlane.xlu1 %2147 }
 0x572   : >> { %2270 = vst.msk [vmem:[#allocation5 + $0x10] sm:$0xff] %vm1482_vm0, %v2254_v48  ;;  %v2239_v37 = vmul.f32 %v4560_v6, %v2222_v28  ;;  %v2582_v25 = vadd.f32 -1.0, %v2148_v34  ;;  %v4800_v34 = vld [vmem:[#allocation42_spill] sm:$0xff] }
 0x574   : >> { %v2255_v51 = vadd.f32 %v2239_v37, %v4795_v33  ;;  %2191 = vst.msk [vmem:[#allocation6 + $0x20] sm:$0xff] %vm1482_vm0, %v2582_v25  ;;  %v2223_v42 = vmax.f32 %v2582_v25, 0.0  ;;  %v2217_v33 = vld [vmem:[#allocation5 + $0x70] sm:$0xff] }
 0x575   : >> { %v2150_v15 = vpop.xlane.xlu0 %2149 }
 0x576   : >> { %2271 = vst.msk [vmem:[#allocation5 + $0x18] sm:$0xff] %vm1482_vm0, %v2255_v51  ;;  %v2240_v19 = vmul.f32 %v4560_v6, %v2223_v42  ;;  %v2583_v27 = vadd.f32 -1.0, %v2150_v15 }
 0x578   : >> { %v2256_v60 = vadd.f32 %v2240_v19, %v2207_v14  ;;  %2192 = vst.msk [vmem:[#allocation6 + $0x28] sm:$0xff] %vm1482_vm0, %v2583_v27  ;;  %v2224_v17 = vmax.f32 %v2583_v27, 0.0 }
 0x579   : >> { %v2152_v36 = vpop.xlane.xlu1 %2151 }
 0x57a   : >> { %2272 = vst.msk [vmem:[#allocation5 + $0x20] sm:$0xff] %vm1482_vm0, %v2256_v60  ;;  %v2241_v9 = vmul.f32 %v4560_v6, %v2224_v17  ;;  %v2584_v20 = vadd.f32 -1.0, %v2152_v36  ;;  %v4801_v60 = vld [vmem:[#allocation43_spill] sm:$0xff] }
 0x57c   : >> { %v2257_v52 = vadd.f32 %v2241_v9, %v4796_v2  ;;  %2193 = vst.msk [vmem:[#allocation6 + $0x30] sm:$0xff] %vm1482_vm0, %v2584_v20  ;;  %v2225_v7 = vmax.f32 %v2584_v20, 0.0 }
 0x57d   : >> { %v2154_v1 = vpop.xlane.xlu0 %2153 }
 0x57e   : >> { %2273 = vst.msk [vmem:[#allocation5 + $0x28] sm:$0xff] %vm1482_vm0, %v2257_v52  ;;  %v2242_v53 = vmul.f32 %v4560_v6, %v2225_v7  ;;  %v2585_v46 = vadd.f32 -1.0, %v2154_v1 }
 0x580   : >> { %v2258_v0 = vadd.f32 %v2242_v53, %v2209_v35  ;;  %2194 = vst.msk [vmem:[#allocation6 + $0x38] sm:$0xff] %vm1482_vm0, %v2585_v46  ;;  %v2226_v62 = vmax.f32 %v2585_v46, 0.0 }
 0x581   : >> { %v2156_v56 = vpop.xlane.xlu1 %2155 }
 0x582   : >> { %2274 = vst.msk [vmem:[#allocation5 + $0x30] sm:$0xff] %vm1482_vm0, %v2258_v0  ;;  %v2243_v43 = vmul.f32 %v4560_v6, %v2226_v62  ;;  %v2586_v31 = vadd.f32 -1.0, %v2156_v56 }
 0x584   : >> { %v2259_v10 = vadd.f32 %v2243_v43, %v4797_v45  ;;  %2195 = vst.msk [vmem:[#allocation6 + $0x40] sm:$0xff] %vm1482_vm0, %v2586_v31  ;;  %v2227_v47 = vmax.f32 %v2586_v31, 0.0 }
 0x585   : >> { %v2158_v32 = vpop.xlane.xlu0 %2157 }
 0x586   : >> { %2275 = vst.msk [vmem:[#allocation5 + $0x38] sm:$0xff] %vm1482_vm0, %v2259_v10  ;;  %v2244_v59 = vmul.f32 %v4560_v6, %v2227_v47  ;;  %v2587_v40 = vadd.f32 -1.0, %v2158_v32 }
 0x588   : >> { %v2260_v50 = vadd.f32 %v2244_v59, %v2211_v18  ;;  %2196 = vst.msk [vmem:[#allocation6 + $0x48] sm:$0xff] %vm1482_vm0, %v2587_v40  ;;  %v2228_v61 = vmax.f32 %v2587_v40, 0.0 }
 0x589   : >> { %v2160_v57 = vpop.xlane.xlu1 %2159 }
 0x58a   : >> { %2276 = vst.msk [vmem:[#allocation5 + $0x40] sm:$0xff] %vm1482_vm0, %v2260_v50  ;;  %v2245_v21 = vmul.f32 %v4560_v6, %v2228_v61  ;;  %v2588_v41 = vadd.f32 -1.0, %v2160_v57 }
 0x58c   : >> { %v2261_v54 = vadd.f32 %v2245_v21, %v4798_v12  ;;  %2197 = vst.msk [vmem:[#allocation6 + $0x50] sm:$0xff] %vm1482_vm0, %v2588_v41  ;;  %v2229_v22 = vmax.f32 %v2588_v41, 0.0 }
 0x58d   : >> { %v2162_v16 = vpop.xlane.xlu0 %2161 }
 0x58e   : >> { %2277 = vst.msk [vmem:[#allocation5 + $0x48] sm:$0xff] %vm1482_vm0, %v2261_v54  ;;  %v2246_v39 = vmul.f32 %v4560_v6, %v2229_v22  ;;  %v2589_v4 = vadd.f32 -1.0, %v2162_v16 }
 0x590   : >> { %v2262_v8 = vadd.f32 %v2246_v39, %v2213_v5  ;;  %2198 = vst.msk [vmem:[#allocation6 + $0x58] sm:$0xff] %vm1482_vm0, %v2589_v4  ;;  %v2230_v49 = vmax.f32 %v2589_v4, 0.0 }
 0x591   : >> { %v2164_v29 = vpop.xlane.xlu1 %2163 }
 0x592   : >> { %2278 = vst.msk [vmem:[#allocation5 + $0x50] sm:$0xff] %vm1482_vm0, %v2262_v8  ;;  %v2247_v30 = vmul.f32 %v4560_v6, %v2230_v49  ;;  %v2590_v11 = vadd.f32 -1.0, %v2164_v29 }
 0x594   : >> { %v2263_v13 = vadd.f32 %v2247_v30, %v4799_v38  ;;  %2199 = vst.msk [vmem:[#allocation6 + $0x60] sm:$0xff] %vm1482_vm0, %v2590_v11  ;;  %v2231_v24 = vmax.f32 %v2590_v11, 0.0 }
 0x595   : >> { %v2166_v55 = vpop.xlane.xlu0 %2165 }
 0x596   : >> { %2279 = vst.msk [vmem:[#allocation5 + $0x58] sm:$0xff] %vm1482_vm0, %v2263_v13  ;;  %v2248_v63 = vmul.f32 %v4560_v6, %v2231_v24  ;;  %v2591_v26 = vadd.f32 -1.0, %v2166_v55 }
 0x598   : >> { %v2264_v44 = vadd.f32 %v2248_v63, %v2215_v3  ;;  %2200 = vst.msk [vmem:[#allocation6 + $0x68] sm:$0xff] %vm1482_vm0, %v2591_v26  ;;  %v2232_v23 = vmax.f32 %v2591_v26, 0.0 }
 0x599   : >> { %v2168_v58 = vpop.xlane.xlu1 %2167 }
 0x59a   : >> { %2280 = vst.msk [vmem:[#allocation5 + $0x60] sm:$0xff] %vm1482_vm0, %v2264_v44  ;;  %v2249_v48 = vmul.f32 %v4560_v6, %v2232_v23  ;;  %v2592_v28 = vadd.f32 -1.0, %v2168_v58 }
 0x59c   : >> { %v2265_v37 = vadd.f32 %v2249_v48, %v4800_v34  ;;  %2201 = vst.msk [vmem:[#allocation6 + $0x70] sm:$0xff] %vm1482_vm0, %v2592_v28  ;;  %v2233_v25 = vmax.f32 %v2592_v28, 0.0 }
 0x59d   : >> { %v2170_v51 = vpop.xlane.xlu0 %2169 }
 0x59e   : >> { %2281 = vst.msk [vmem:[#allocation5 + $0x68] sm:$0xff] %vm1482_vm0, %v2265_v37  ;;  %v2250_v42 = vmul.f32 %v4560_v6, %v2233_v25  ;;  %v2593_v14 = vadd.f32 -1.0, %v2170_v51 }
 0x5a0   : >> { %v2266_v15 = vadd.f32 %v2250_v42, %v2217_v33  ;;  %2202 = vst.msk [vmem:[#allocation6 + $0x78] sm:$0xff] %vm1482_vm0, %v2593_v14  ;;  %v2234_v19 = vmax.f32 %v2593_v14, 0.0 }
 0x5a2   : >> { %2282 = vst.msk [vmem:[#allocation5 + $0x70] sm:$0xff] %vm1482_vm0, %v2266_v15  ;;  %v2251_v27 = vmul.f32 %v4560_v6, %v2234_v19  ;;  %1552 = sbr.rel (!%p1550_p3) target bundleno = 873 (0x369), region = 108 }
 0x5a4   : >> { %v2267_v17 = vadd.f32 %v2251_v27, %v4801_v60 }
 0x5a6   : >> { %2283 = vst.msk [vmem:[#allocation5 + $0x78] sm:$0xff] %vm1482_vm0, %v2267_v17 }
 0x5a7   : > { %s2601_s6 = sshll.u32 %s3216_s16, 11  ;;  %s2328_s23 = sshll.u32 %s4182_s27, 4  ;;  %s2329_s23 = int_to_ptr.vmem [resolvable:$true] %s2328_s23 }
 0x5a8   : > { %s2317_s28 = scalar_lea.hbm %s4672_s3, %s2601_s6  ;;  %s3168_s22 = smov 2048  }
 0x5a9   : > { %p4804_p9 = scmp.ne.s32.totalorder %s4720_s24, 0  ;;  %s3169_s4 = smov 4096  }
 0x5aa   : > { %s3170_s9 = smov 16   ;;  %s3171_s11 = smov 128  }
 0x5ab   : > { %2610 = sst [smem:[#allocation16]] (%p4804_p9), %s3168_s22  ;;  %s3172_s16 = smov 8  }
 0x5ac   : > { %2611 = sst [smem:[#allocation16 + $0x1]] (%p4804_p9), %s3169_s4  ;;  %s3173_s17 = smov 131072  }
 0x5ad   : > { %2612 = sst [smem:[#allocation16 + $0x2]] (%p4804_p9), %s3170_s9  ;;  %s3174_s10 = smov 0  }
 0x5ae   : > { %2613 = sst [smem:[#allocation16 + $0x3]] (%p4804_p9), %s3171_s11 }
 0x5af   : > { %2614 = sst [smem:[#allocation16 + $0x4]] (%p4804_p9), %s3171_s11 }
 0x5b0   : > { %2615 = sst [smem:[#allocation16 + $0x5]] (%p4804_p9), %s3172_s16 }
 0x5b1   : > { %2616 = dma.general (%p4804_p9), %s2329_s23, 8192, %s2317_s28, %s2305_s5, %s3173_s17, [#allocation16], %s3174_s10, 0  }
 0x5b2 PF: > { %s2356_s19 = sand.u32 1, %s3132_s12   ;;  %p4805_p2 = scmp.ne.s32.totalorder %s4721_s25, 0 }
 0x5b3   : > { %p4806_p0 = scmp.ge.s32.totalorder %s3144_s15, 2  ;;  %s2357_s27 = scalar_lea.sflag [#allocation9], %s2356_s19 }
 0x5b5   : > { %p2630_p7 = pnand %p4806_p0, %p4805_p2 }
 0x5b7   : > { %p2631_p4 = pneg %p2630_p7 }
 0x5b9   : > { %3127 = dma.done.wait (%p2631_p4), %s2357_s27, 8192  }
 0x5ba   : > { %3129 = vsyncadd (%p2631_p4), %s2357_s27, 4294959104  ;;  %p20_p8 = scmp.ge.s32.totalorder %s3220_s18, 4   ;;  %s4807_s12 = smov %s3136_s13 }
 0x5bb   : > { %s4808_s13 = smov %s3140_s14  ;;  %s4809_s14 = smov %s3232_s21 }
 0x5bc   : > { %s4810_s15 = smov %s3220_s18  ;;  %22 = sbr.rel (!%p20_p8) target bundleno = 8 (0x8), region = 119 }
 0x5c1   :  { %2362 = vsyncpa [#allocation8], 1 }
 0x5c2   :  { %2364 = vsyncpa [#allocation8 + $0x1], 1 }
 0x5c3   :  { %2365 = vsyncpa [#allocation13], 1 }
 0x5c4   :  { %2367 = vsyncpa [#allocation13 + $0x1], 1 }
 0x5c5   :  { %2368 = vsyncpa [#allocation9], 1 }
 0x5c6   :  { %2370 = vsyncpa [#allocation9 + $0x1], 1 }
 0x5c7   :  { %2371 = vsyncpa [#allocation10], 1 }
 0x5c8   :  { %2373 = vsyncpa [#allocation10 + $0x1], 1 }

</bundles_post_ra>
